<compile_context>
chip_gen: v7x
topology: tpu7x:2x2x1
jax: 0.10.0
libtpu: 0.0.40
codegen_flags: <defaults>
</compile_context>

<pallas_src>
import functools

import numpy as np
import jax
import jax.numpy as jnp
from jax import lax
from jax.experimental import pallas as pl
from jax.experimental.pallas import tpu as pltpu


LANE = 128
TARGET_TILE_M = 1024            # ~512-1024 output rows per grid step
VMEM_LIMIT_BYTES = 64 * 1024 * 1024


def _round_up(x, m):
    return (x + m - 1) // m * m


def _pick_row_tile(hout, wout, target_m=TARGET_TILE_M):
    """Largest divisor TH of hout with TH*wout <= target_m and TH*wout % 8 == 0."""
    if hout * wout <= target_m:
        return hout
    for d in range(hout - 1, 0, -1):
        if hout % d == 0 and d * wout <= target_m and (d * wout) % 8 == 0:
            return d
    return hout


def _pick_m_tile(m, target_m=TARGET_TILE_M):
    if m <= target_m:
        return m
    t = target_m - target_m % 8
    while t > 0:
        if m % t == 0:
            return t
        t -= 8
    return m


def _phase_planes(xp, s, hreq, wreq):
    """Split a zero-padded NHWC image into s*s stride-phase planes of identical
    shape (N, s*s, hreq, wreq, C). Tap (kh, kw) of a stride-s 3x3 conv then maps
    to a *contiguous* slice of plane (kh % s) * s + (kw % s)."""
    planes = []
    for ph in range(s):
        for pw in range(s):
            p = xp[:, ph::s, pw::s, :][:, :hreq, :wreq, :]
            pad_h = hreq - p.shape[1]
            pad_w = wreq - p.shape[2]
            if pad_h or pad_w:   # padded rows/cols are never read by any tap
                p = jnp.pad(p, ((0, 0), (0, pad_h), (0, pad_w), (0, 0)))
            planes.append(p)
    return jnp.stack(planes, axis=1)


# ----------------------------------------------------------------------------
# Pallas kernels
# ----------------------------------------------------------------------------
def _conv3x3_bn_relu_kernel(x_ref, w_ref, scale_ref, bias_ref, o_ref, lhs_ref,
                            *, s, th, wout, cin):
    # x_ref:     (1, s*s, Hph, Wph, Cin) bf16  phase-decomposed padded input,
    #                                          resident across the row-tile axis
    # w_ref:     (9*Cin, CoutP)          bf16  tap-major folded weights
    # scale_ref: (1, CoutP) f32          folded BN scale
    # bias_ref:  (1, CoutP) f32          folded BN bias
    # o_ref:     (1, TH*Wout, CoutP) f32
    # lhs_ref:   (TH*Wout, 9*Cin) f32    scratch: im2col tile assembled in VMEM
    t = pl.program_id(1)
    for kh in range(3):                      # static, unrolled: 9 taps
        for kw in range(3):
            plane = (kh % s) * s + (kw % s)
            r0 = t * th + (kh // s)
            c0 = kw // s
            tap = x_ref[0, plane, pl.ds(r0, th), pl.ds(c0, wout), :]
            k = kh * 3 + kw
            lhs_ref[:, k * cin:(k + 1) * cin] = (
                tap.astype(jnp.float32).reshape(th * wout, cin))
    acc = jnp.dot(lhs_ref[...].astype(jnp.bfloat16), w_ref[...],
                  preferred_element_type=jnp.float32)
    y = acc * scale_ref[...] + bias_ref[...]
    o_ref[0] = jnp.maximum(y, 0.0).astype(o_ref.dtype)


def _matmul_bn_relu_kernel(x_ref, w_ref, scale_ref, bias_ref, o_ref):
    # x_ref: (1, TM, Cin) bf16; w_ref: (Cin, CP) bf16; scale/bias: (1, CP) f32.
    acc = jnp.dot(x_ref[0], w_ref[...], preferred_element_type=jnp.float32)
    y = acc * scale_ref[...] + bias_ref[...]
    o_ref[0] = jnp.maximum(y, 0.0).astype(o_ref.dtype)


# ----------------------------------------------------------------------------
# Layer wrappers
# ----------------------------------------------------------------------------
def conv3x3_bn_relu_nhwc(x, w_oihw, scale, bias, stride):
    """ZeroPad2d(1) + Conv2d(k=3, stride, bias=False) + folded BN + ReLU (NHWC)."""
    n, h, w, cin = x.shape
    cout = w_oihw.shape[0]
    s = int(stride)
    hout = (h - 1) // s + 1
    wout = (w - 1) // s + 1
    cout_p = _round_up(cout, LANE)
    hreq = hout + 2 // s
    wreq = wout + 2 // s

    xp = jnp.pad(x, ((0, 0), (1, 1), (1, 1), (0, 0))).astype(jnp.bfloat16)
    xph = _phase_planes(xp, s, hreq, wreq)          # (N, s*s, hreq, wreq, Cin)

    wk = jnp.transpose(w_oihw, (2, 3, 1, 0)).reshape(9 * cin, cout)
    wk = jnp.pad(wk, ((0, 0), (0, cout_p - cout))).astype(jnp.bfloat16)
    scale_p = jnp.pad(scale.astype(jnp.float32), (0, cout_p - cout)).reshape(1, cout_p)
    bias_p = jnp.pad(bias.astype(jnp.float32), (0, cout_p - cout)).reshape(1, cout_p)

    th = _pick_row_tile(hout, wout)
    tm = th * wout
    nt = hout // th

    kernel = functools.partial(_conv3x3_bn_relu_kernel, s=s, th=th, wout=wout, cin=cin)
    out = pl.pallas_call(
        kernel,
        out_shape=jax.ShapeDtypeStruct((n, hout * wout, cout_p), jnp.float32),
        grid=(n, nt),
        in_specs=[
            pl.BlockSpec((1, s * s, hreq, wreq, cin), lambda b, t: (b, 0, 0, 0, 0)),
            pl.BlockSpec((9 * cin, cout_p), lambda b, t: (0, 0)),
            pl.BlockSpec((1, cout_p), lambda b, t: (0, 0)),
            pl.BlockSpec((1, cout_p), lambda b, t: (0, 0)),
        ],
        out_specs=pl.BlockSpec((1, tm, cout_p), lambda b, t: (b, t, 0)),
        scratch_shapes=[pltpu.VMEM((tm, 9 * cin), jnp.float32)],
        compiler_params=pltpu.CompilerParams(
            dimension_semantics=("parallel", "parallel"),
            vmem_limit_bytes=VMEM_LIMIT_BYTES),
    )(xph, wk, scale_p, bias_p)
    return out[:, :, :cout].reshape(n, hout, wout, cout)


def deconv_bn_relu_nhwc(x, w_iokk, scale, bias, s):
    """ConvTranspose2d(k=s, stride=s, bias=False) + folded BN + ReLU (NHWC).
    kernel == stride => no overlap: per-pixel matmul into s*s*Cout lanes, then a
    cheap subpixel rearrangement in the wrapper."""
    n, h, w, cin = x.shape
    s = int(s)
    cout = w_iokk.shape[1]
    cflat = s * s * cout
    cflat_p = _round_up(cflat, LANE)

    w2 = jnp.transpose(w_iokk, (0, 2, 3, 1)).reshape(cin, cflat)
    w2 = jnp.pad(w2, ((0, 0), (0, cflat_p - cflat))).astype(jnp.bfloat16)
    scale_p = jnp.pad(jnp.tile(scale.astype(jnp.float32), s * s),
                      (0, cflat_p - cflat)).reshape(1, cflat_p)
    bias_p = jnp.pad(jnp.tile(bias.astype(jnp.float32), s * s),
                     (0, cflat_p - cflat)).reshape(1, cflat_p)

    m = h * w
    tm = _pick_m_tile(m)
    nt = m // tm
    xb = x.reshape(n, m, cin).astype(jnp.bfloat16)

    y = pl.pallas_call(
        _matmul_bn_relu_kernel,
        out_shape=jax.ShapeDtypeStruct((n, m, cflat_p), jnp.float32),
        grid=(n, nt),
        in_specs=[
            pl.BlockSpec((1, tm, cin), lambda b, t: (b, t, 0)),
            pl.BlockSpec((cin, cflat_p), lambda b, t: (0, 0)),
            pl.BlockSpec((1, cflat_p), lambda b, t: (0, 0)),
            pl.BlockSpec((1, cflat_p), lambda b, t: (0, 0)),
        ],
        out_specs=pl.BlockSpec((1, tm, cflat_p), lambda b, t: (b, t, 0)),
        compiler_params=pltpu.CompilerParams(
            dimension_semantics=("parallel", "parallel"),
            vmem_limit_bytes=VMEM_LIMIT_BYTES),
    )(xb, w2, scale_p, bias_p)

    y = y[:, :, :cflat].reshape(n, h, w, s, s, cout)
    y = jnp.transpose(y, (0, 1, 3, 2, 4, 5)).reshape(n, h * s, w * s, cout)
    return y


# ----------------------------------------------------------------------------
# Backbone (mirrors BaseBEVBackbone.forward_backbone2d)
# ----------------------------------------------------------------------------
def backbone2d_pallas(spatial_features_nchw, params):
    x = jnp.transpose(spatial_features_nchw, (0, 2, 3, 1))   # -> NHWC
    h0 = spatial_features_nchw.shape[2]
    ups, ret = [], {}
    for i, block in enumerate(params["blocks"]):
        for layer in block:
            x = conv3x3_bn_relu_nhwc(x, layer["w"], layer["scale"], layer["bias"],
                                     layer["stride"])
        stride_k = int(h0 // x.shape[1])
        ret["spatial_features_%dx" % stride_k] = jnp.transpose(x, (0, 3, 1, 2))
        if len(params["deblocks"]) > 0:
            d = params["deblocks"][i]
            ups.append(deconv_bn_relu_nhwc(x, d["w"], d["scale"], d["bias"], d["stride"]))
        else:
            ups.append(x)
    out = jnp.concatenate(ups, axis=-1) if len(ups) > 1 else ups[0]
    ret["spatial_features_2d"] = jnp.transpose(out, (0, 3, 1, 2))  # back to NCHW
    return ret


# ----------------------------------------------------------------------------
# Pure-JAX reference (same bf16 operand rounding so tolerances stay tight)
# ----------------------------------------------------------------------------
def _bf16_round(a):
    return a.astype(jnp.bfloat16).astype(jnp.float32)


def _ref_conv_bn_relu(x_nchw, w_oihw, scale, bias, stride):
    y = lax.conv_general_dilated(
        _bf16_round(x_nchw), _bf16_round(w_oihw), window_strides=(stride, stride),
        padding=((1, 1), (1, 1)), dimension_numbers=("NCHW", "OIHW", "NCHW"),
        precision=lax.Precision.HIGHEST)
    y = y * scale[None, :, None, None] + bias[None, :, None, None]
    return jnp.maximum(y, 0.0)


def _ref_deconv_bn_relu(x_nchw, w_iokk, scale, bias, s):
    n, cin, h, w = x_nchw.shape
    cout = w_iokk.shape[1]
    y = jnp.einsum("nchw,cdij->ndhiwj", _bf16_round(x_nchw), _bf16_round(w_iokk),
                   precision=lax.Precision.HIGHEST).reshape(n, cout, h * s, w * s)
    y = y * scale[None, :, None, None] + bias[None, :, None, None]
    return jnp.maximum(y, 0.0)


def backbone2d_ref(spatial_features_nchw, params):
    x = spatial_features_nchw
    ups = []
    for i, block in enumerate(params["blocks"]):
        for layer in block:
            x = _ref_conv_bn_relu(x, layer["w"], layer["scale"], layer["bias"],
                                  layer["stride"])
        if len(params["deblocks"]) > 0:
            d = params["deblocks"][i]
            ups.append(_ref_deconv_bn_relu(x, d["w"], d["scale"], d["bias"], d["stride"]))
        else:
            ups.append(x)
    return jnp.concatenate(ups, axis=1) if len(ups) > 1 else ups[0]


# ----------------------------------------------------------------------------
# Deterministic synthetic parameters (BN folded, eval mode)
# ----------------------------------------------------------------------------
def _bn_fold(key, c, eps=1e-3):
    k1, k2, k3, k4 = jax.random.split(key, 4)
    gamma = jax.random.uniform(k1, (c,), minval=0.5, maxval=1.5)
    beta = jax.random.normal(k2, (c,)) * 0.1
    mean = jax.random.normal(k3, (c,)) * 0.1
    var = jax.random.uniform(k4, (c,), minval=0.5, maxval=1.5)
    scale = gamma / jnp.sqrt(var + eps)
    bias = beta - mean * scale
    return scale.astype(jnp.float32), bias.astype(jnp.float32)


def init_params(key, input_channels, layer_nums, layer_strides, num_filters,
                upsample_strides, num_upsample_filters):
    assert len(layer_nums) == len(layer_strides) == len(num_filters)
    assert len(upsample_strides) == len(num_upsample_filters)
    params = {"blocks": [], "deblocks": []}
    c_in_list = [input_channels] + list(num_filters[:-1])
    for idx in range(len(layer_nums)):
        layers = []
        c_in, c_out = c_in_list[idx], num_filters[idx]
        key, kw, kb = jax.random.split(key, 3)
        w = jax.random.normal(kw, (c_out, c_in, 3, 3), jnp.float32) * 0.1
        scale, bias = _bn_fold(kb, c_out)
        layers.append(dict(w=w, scale=scale, bias=bias, stride=layer_strides[idx]))
        for _ in range(layer_nums[idx]):
            key, kw, kb = jax.random.split(key, 3)
            w = jax.random.normal(kw, (c_out, c_out, 3, 3), jnp.float32) * 0.1
            scale, bias = _bn_fold(kb, c_out)
            layers.append(dict(w=w, scale=scale, bias=bias, stride=1))
        params["blocks"].append(layers)
        if len(upsample_strides) > 0:
            s = upsample_strides[idx]
            cu = num_upsample_filters[idx]
            key, kw, kb = jax.random.split(key, 3)
            # torch ConvTranspose2d weight layout: (Cin, Cout, k, k) with k == stride
            w = jax.random.normal(kw, (c_out, cu, s, s), jnp.float32) * 0.1
            scale, bias = _bn_fold(kb, cu)
            params["deblocks"].append(dict(w=w, scale=scale, bias=bias, stride=s))
    return params


# ----------------------------------------------------------------------------
if __name__ == "__main__":
    LAYER_NUMS = [1, 1]
    LAYER_STRIDES = [1, 2]
    NUM_FILTERS = [8, 16]
    UPSAMPLE_STRIDES = [1, 2]
    NUM_UPSAMPLE_FILTERS = [8, 8]
    N, C, H, W = 2, 4, 16, 16

    key = jax.random.PRNGKey(0)
    kx, kp = jax.random.split(key)
    spatial_features = jax.random.normal(kx, (N, C, H, W), jnp.float32)

    params = init_params(kp, C, LAYER_NUMS, LAYER_STRIDES, NUM_FILTERS,
                         UPSAMPLE_STRIDES, NUM_UPSAMPLE_FILTERS)

    data_dict = backbone2d_pallas(spatial_features, params)
    out = data_dict["spatial_features_2d"]
    jax.block_until_ready(out)

    # Shape check (num_bev_features = sum(NUM_UPSAMPLE_FILTERS))
    assert out.shape == (N, sum(NUM_UPSAMPLE_FILTERS), H, W), out.shape

    # Numerical check vs. a pure-JAX reference using the same bf16 operand
    # rounding (loose tolerance covers bf16 re-quantization between layers).
    ref = backbone2d_ref(spatial_features, params)
    np.testing.assert_allclose(np.asarray(out), np.asarray(ref), rtol=1e-2, atol=1e-2)

    print("KERNEL_OK")
</pallas_src>

<mosaic_0001>
module attributes {stable_mosaic.version = 11 : i64} {
  func.func @_conv3x3_bn_relu_kernel(%arg0: i32, %arg1: i32, %arg2: memref<1x1x18x18x4xbf16, #tpu.memory_space<vmem>>, %arg3: memref<36x128xbf16, #tpu.memory_space<vmem>>, %arg4: memref<1x128xf32, #tpu.memory_space<vmem>>, %arg5: memref<1x128xf32, #tpu.memory_space<vmem>>, %arg6: memref<1x256x128xf32, #tpu.memory_space<vmem>>, %arg7: memref<256x36xf32, #tpu.memory_space<vmem>>) attributes {dimension_semantics = [#tpu.dimension_semantics<parallel>, #tpu.dimension_semantics<parallel>], iteration_bounds = array<i64: 2, 1>, scalar_prefetch = 0 : i64, scratch_operands = 1 : i64, tpu.core_type = #tpu.core_type<tc>, window_params = [{transform_indices = @transform_0, window_bounds = array<i64: 1, 1, 18, 18, 4>}, {pipeline_mode = #tpu.pipeline_mode<synchronous>, transform_indices = @transform_1, window_bounds = array<i64: 36, 128>}, {pipeline_mode = #tpu.pipeline_mode<synchronous>, transform_indices = @transform_2, window_bounds = array<i64: 1, 128>}, {pipeline_mode = #tpu.pipeline_mode<synchronous>, transform_indices = @transform_3, window_bounds = array<i64: 1, 128>}, {transform_indices = @transform_4, window_bounds = array<i64: 1, 256, 128>}]} {
    %c16_i32 = arith.constant 16 : i32
    %0 = arith.muli %arg1, %c16_i32 : i32
    %c0_i32 = arith.constant 0 : i32
    %1 = arith.addi %0, %c0_i32 : i32
    %c0 = arith.constant 0 : index
    %c0_0 = arith.constant 0 : index
    %2 = arith.index_cast %1 : i32 to index
    %c0_1 = arith.constant 0 : index
    %c0_2 = arith.constant 0 : index
    %3 = vector.load %arg2[%c0, %c0_0, %2, %c0_1, %c0_2] : memref<1x1x18x18x4xbf16, #tpu.memory_space<vmem>>, vector<1x1x16x16x4xbf16>
    %4 = vector.shape_cast %3 : vector<1x1x16x16x4xbf16> to vector<16x16x4xbf16>
    %5 = arith.extf %4 : vector<16x16x4xbf16> to vector<16x16x4xf32>
    %6 = vector.shape_cast %5 : vector<16x16x4xf32> to vector<256x4xf32>
    %c0_3 = arith.constant 0 : index
    %c0_4 = arith.constant 0 : index
    %7 = vector.load %arg7[%c0_3, %c0_4] : memref<256x36xf32, #tpu.memory_space<vmem>>, vector<256x4xf32>
    tpu.vector_store %arg7[%c0_3, %c0_4], %6 {strides = array<i32>} : memref<256x36xf32, #tpu.memory_space<vmem>>, vector<256x4xf32>,
    %c16_i32_5 = arith.constant 16 : i32
    %8 = arith.muli %arg1, %c16_i32_5 : i32
    %c0_i32_6 = arith.constant 0 : i32
    %9 = arith.addi %8, %c0_i32_6 : i32
    %c0_7 = arith.constant 0 : index
    %c0_8 = arith.constant 0 : index
    %10 = arith.index_cast %9 : i32 to index
    %c1 = arith.constant 1 : index
    %c0_9 = arith.constant 0 : index
    %11 = vector.load %arg2[%c0_7, %c0_8, %10, %c1, %c0_9] : memref<1x1x18x18x4xbf16, #tpu.memory_space<vmem>>, vector<1x1x16x16x4xbf16>
    %12 = vector.shape_cast %11 : vector<1x1x16x16x4xbf16> to vector<16x16x4xbf16>
    %13 = arith.extf %12 : vector<16x16x4xbf16> to vector<16x16x4xf32>
    %14 = vector.shape_cast %13 : vector<16x16x4xf32> to vector<256x4xf32>
    %c0_10 = arith.constant 0 : index
    %c4 = arith.constant 4 : index
    %15 = vector.load %arg7[%c0_10, %c4] : memref<256x36xf32, #tpu.memory_space<vmem>>, vector<256x4xf32>
    tpu.vector_store %arg7[%c0_10, %c4], %14 {strides = array<i32>} : memref<256x36xf32, #tpu.memory_space<vmem>>, vector<256x4xf32>,
    %c16_i32_11 = arith.constant 16 : i32
    %16 = arith.muli %arg1, %c16_i32_11 : i32
    %c0_i32_12 = arith.constant 0 : i32
    %17 = arith.addi %16, %c0_i32_12 : i32
    %c0_13 = arith.constant 0 : index
    %c0_14 = arith.constant 0 : index
    %18 = arith.index_cast %17 : i32 to index
    %c2 = arith.constant 2 : index
    %c0_15 = arith.constant 0 : index
    %19 = vector.load %arg2[%c0_13, %c0_14, %18, %c2, %c0_15] : memref<1x1x18x18x4xbf16, #tpu.memory_space<vmem>>, vector<1x1x16x16x4xbf16>
    %20 = vector.shape_cast %19 : vector<1x1x16x16x4xbf16> to vector<16x16x4xbf16>
    %21 = arith.extf %20 : vector<16x16x4xbf16> to vector<16x16x4xf32>
    %22 = vector.shape_cast %21 : vector<16x16x4xf32> to vector<256x4xf32>
    %c0_16 = arith.constant 0 : index
    %c8 = arith.constant 8 : index
    %23 = vector.load %arg7[%c0_16, %c8] : memref<256x36xf32, #tpu.memory_space<vmem>>, vector<256x4xf32>
    tpu.vector_store %arg7[%c0_16, %c8], %22 {strides = array<i32>} : memref<256x36xf32, #tpu.memory_space<vmem>>, vector<256x4xf32>,
    %c16_i32_17 = arith.constant 16 : i32
    %24 = arith.muli %arg1, %c16_i32_17 : i32
    %c1_i32 = arith.constant 1 : i32
    %25 = arith.addi %24, %c1_i32 : i32
    %c0_18 = arith.constant 0 : index
    %c0_19 = arith.constant 0 : index
    %26 = arith.index_cast %25 : i32 to index
    %c0_20 = arith.constant 0 : index
    %c0_21 = arith.constant 0 : index
    %27 = vector.load %arg2[%c0_18, %c0_19, %26, %c0_20, %c0_21] : memref<1x1x18x18x4xbf16, #tpu.memory_space<vmem>>, vector<1x1x16x16x4xbf16>
    %28 = vector.shape_cast %27 : vector<1x1x16x16x4xbf16> to vector<16x16x4xbf16>
    %29 = arith.extf %28 : vector<16x16x4xbf16> to vector<16x16x4xf32>
    %30 = vector.shape_cast %29 : vector<16x16x4xf32> to vector<256x4xf32>
    %c0_22 = arith.constant 0 : index
    %c12 = arith.constant 12 : index
    %31 = vector.load %arg7[%c0_22, %c12] : memref<256x36xf32, #tpu.memory_space<vmem>>, vector<256x4xf32>
    tpu.vector_store %arg7[%c0_22, %c12], %30 {strides = array<i32>} : memref<256x36xf32, #tpu.memory_space<vmem>>, vector<256x4xf32>,
    %c16_i32_23 = arith.constant 16 : i32
    %32 = arith.muli %arg1, %c16_i32_23 : i32
    %c1_i32_24 = arith.constant 1 : i32
    %33 = arith.addi %32, %c1_i32_24 : i32
    %c0_25 = arith.constant 0 : index
    %c0_26 = arith.constant 0 : index
    %34 = arith.index_cast %33 : i32 to index
    %c1_27 = arith.constant 1 : index
    %c0_28 = arith.constant 0 : index
    %35 = vector.load %arg2[%c0_25, %c0_26, %34, %c1_27, %c0_28] : memref<1x1x18x18x4xbf16, #tpu.memory_space<vmem>>, vector<1x1x16x16x4xbf16>
    %36 = vector.shape_cast %35 : vector<1x1x16x16x4xbf16> to vector<16x16x4xbf16>
    %37 = arith.extf %36 : vector<16x16x4xbf16> to vector<16x16x4xf32>
    %38 = vector.shape_cast %37 : vector<16x16x4xf32> to vector<256x4xf32>
    %c0_29 = arith.constant 0 : index
    %c16 = arith.constant 16 : index
    %39 = vector.load %arg7[%c0_29, %c16] : memref<256x36xf32, #tpu.memory_space<vmem>>, vector<256x4xf32>
    tpu.vector_store %arg7[%c0_29, %c16], %38 {strides = array<i32>} : memref<256x36xf32, #tpu.memory_space<vmem>>, vector<256x4xf32>,
    %c16_i32_30 = arith.constant 16 : i32
    %40 = arith.muli %arg1, %c16_i32_30 : i32
    %c1_i32_31 = arith.constant 1 : i32
    %41 = arith.addi %40, %c1_i32_31 : i32
    %c0_32 = arith.constant 0 : index
    %c0_33 = arith.constant 0 : index
    %42 = arith.index_cast %41 : i32 to index
    %c2_34 = arith.constant 2 : index
    %c0_35 = arith.constant 0 : index
    %43 = vector.load %arg2[%c0_32, %c0_33, %42, %c2_34, %c0_35] : memref<1x1x18x18x4xbf16, #tpu.memory_space<vmem>>, vector<1x1x16x16x4xbf16>
    %44 = vector.shape_cast %43 : vector<1x1x16x16x4xbf16> to vector<16x16x4xbf16>
    %45 = arith.extf %44 : vector<16x16x4xbf16> to vector<16x16x4xf32>
    %46 = vector.shape_cast %45 : vector<16x16x4xf32> to vector<256x4xf32>
    %c0_36 = arith.constant 0 : index
    %c20 = arith.constant 20 : index
    %47 = vector.load %arg7[%c0_36, %c20] : memref<256x36xf32, #tpu.memory_space<vmem>>, vector<256x4xf32>
    tpu.vector_store %arg7[%c0_36, %c20], %46 {strides = array<i32>} : memref<256x36xf32, #tpu.memory_space<vmem>>, vector<256x4xf32>,
    %c16_i32_37 = arith.constant 16 : i32
    %48 = arith.muli %arg1, %c16_i32_37 : i32
    %c2_i32 = arith.constant 2 : i32
    %49 = arith.addi %48, %c2_i32 : i32
    %c0_38 = arith.constant 0 : index
    %c0_39 = arith.constant 0 : index
    %50 = arith.index_cast %49 : i32 to index
    %c0_40 = arith.constant 0 : index
    %c0_41 = arith.constant 0 : index
    %51 = vector.load %arg2[%c0_38, %c0_39, %50, %c0_40, %c0_41] : memref<1x1x18x18x4xbf16, #tpu.memory_space<vmem>>, vector<1x1x16x16x4xbf16>
    %52 = vector.shape_cast %51 : vector<1x1x16x16x4xbf16> to vector<16x16x4xbf16>
    %53 = arith.extf %52 : vector<16x16x4xbf16> to vector<16x16x4xf32>
    %54 = vector.shape_cast %53 : vector<16x16x4xf32> to vector<256x4xf32>
    %c0_42 = arith.constant 0 : index
    %c24 = arith.constant 24 : index
    %55 = vector.load %arg7[%c0_42, %c24] : memref<256x36xf32, #tpu.memory_space<vmem>>, vector<256x4xf32>
    tpu.vector_store %arg7[%c0_42, %c24], %54 {strides = array<i32>} : memref<256x36xf32, #tpu.memory_space<vmem>>, vector<256x4xf32>,
    %c16_i32_43 = arith.constant 16 : i32
    %56 = arith.muli %arg1, %c16_i32_43 : i32
    %c2_i32_44 = arith.constant 2 : i32
    %57 = arith.addi %56, %c2_i32_44 : i32
    %c0_45 = arith.constant 0 : index
    %c0_46 = arith.constant 0 : index
    %58 = arith.index_cast %57 : i32 to index
    %c1_47 = arith.constant 1 : index
    %c0_48 = arith.constant 0 : index
    %59 = vector.load %arg2[%c0_45, %c0_46, %58, %c1_47, %c0_48] : memref<1x1x18x18x4xbf16, #tpu.memory_space<vmem>>, vector<1x1x16x16x4xbf16>
    %60 = vector.shape_cast %59 : vector<1x1x16x16x4xbf16> to vector<16x16x4xbf16>
    %61 = arith.extf %60 : vector<16x16x4xbf16> to vector<16x16x4xf32>
    %62 = vector.shape_cast %61 : vector<16x16x4xf32> to vector<256x4xf32>
    %c0_49 = arith.constant 0 : index
    %c28 = arith.constant 28 : index
    %63 = vector.load %arg7[%c0_49, %c28] : memref<256x36xf32, #tpu.memory_space<vmem>>, vector<256x4xf32>
    tpu.vector_store %arg7[%c0_49, %c28], %62 {strides = array<i32>} : memref<256x36xf32, #tpu.memory_space<vmem>>, vector<256x4xf32>,
    %c16_i32_50 = arith.constant 16 : i32
    %64 = arith.muli %arg1, %c16_i32_50 : i32
    %c2_i32_51 = arith.constant 2 : i32
    %65 = arith.addi %64, %c2_i32_51 : i32
    %c0_52 = arith.constant 0 : index
    %c0_53 = arith.constant 0 : index
    %66 = arith.index_cast %65 : i32 to index
    %c2_54 = arith.constant 2 : index
    %c0_55 = arith.constant 0 : index
    %67 = vector.load %arg2[%c0_52, %c0_53, %66, %c2_54, %c0_55] : memref<1x1x18x18x4xbf16, #tpu.memory_space<vmem>>, vector<1x1x16x16x4xbf16>
    %68 = vector.shape_cast %67 : vector<1x1x16x16x4xbf16> to vector<16x16x4xbf16>
    %69 = arith.extf %68 : vector<16x16x4xbf16> to vector<16x16x4xf32>
    %70 = vector.shape_cast %69 : vector<16x16x4xf32> to vector<256x4xf32>
    %c0_56 = arith.constant 0 : index
    %c32 = arith.constant 32 : index
    %71 = vector.load %arg7[%c0_56, %c32] : memref<256x36xf32, #tpu.memory_space<vmem>>, vector<256x4xf32>
    tpu.vector_store %arg7[%c0_56, %c32], %70 {strides = array<i32>} : memref<256x36xf32, #tpu.memory_space<vmem>>, vector<256x4xf32>,
    %c0_57 = arith.constant 0 : index
    %c0_58 = arith.constant 0 : index
    %72 = vector.load %arg7[%c0_57, %c0_58] : memref<256x36xf32, #tpu.memory_space<vmem>>, vector<256x36xf32>
    %73 = arith.truncf %72 : vector<256x36xf32> to vector<256x36xbf16>
    %c0_59 = arith.constant 0 : index
    %c0_60 = arith.constant 0 : index
    %74 = vector.load %arg3[%c0_59, %c0_60] : memref<36x128xbf16, #tpu.memory_space<vmem>>, vector<36x128xbf16>
    %cst = arith.constant dense<0.000000e+00> : vector<256x128xf32>
    %75 = tpu.matmul %73, %74, %cst {dimension_numbers = #tpu.dot_dimension_numbers<[1], [0], [0], [1], [0, 0, 1, 1], [], []>} : vector<256x36xbf16>, vector<36x128xbf16>, vector<256x128xf32> -> vector<256x128xf32>
    %c0_61 = arith.constant 0 : index
    %c0_62 = arith.constant 0 : index
    %76 = vector.load %arg4[%c0_61, %c0_62] : memref<1x128xf32, #tpu.memory_space<vmem>>, vector<1x128xf32>
    %77 = vector.broadcast %76 : vector<1x128xf32> to vector<256x128xf32>
    %78 = arith.mulf %75, %77 : vector<256x128xf32>
    %c0_63 = arith.constant 0 : index
    %c0_64 = arith.constant 0 : index
    %79 = vector.load %arg5[%c0_63, %c0_64] : memref<1x128xf32, #tpu.memory_space<vmem>>, vector<1x128xf32>
    %80 = vector.broadcast %79 : vector<1x128xf32> to vector<256x128xf32>
    %81 = arith.addf %78, %80 : vector<256x128xf32>
    %cst_65 = arith.constant 0.000000e+00 : f32
    %82 = vector.broadcast %cst_65 : f32 to vector<256x128xf32>
    %83 = arith.maximumf %81, %82 : vector<256x128xf32>
    %c0_66 = arith.constant 0 : index
    %c0_67 = arith.constant 0 : index
    %c0_68 = arith.constant 0 : index
    %84 = vector.load %arg6[%c0_66, %c0_67, %c0_68] : memref<1x256x128xf32, #tpu.memory_space<vmem>>, vector<1x256x128xf32>
    %85 = vector.shape_cast %84 : vector<1x256x128xf32> to vector<256x128xf32>
    %86 = vector.shape_cast %83 : vector<256x128xf32> to vector<1x256x128xf32>
    tpu.vector_store %arg6[%c0_66, %c0_67, %c0_68], %86 {strides = array<i32>} : memref<1x256x128xf32, #tpu.memory_space<vmem>>, vector<1x256x128xf32>,
    return
  }
  func.func @transform_0(%arg0: i32, %arg1: i32) -> (i32, i32, i32, i32, i32) {
    %c0_i32 = arith.constant 0 : i32
    %c0_i32_0 = arith.constant 0 : i32
    %c0_i32_1 = arith.constant 0 : i32
    %c0_i32_2 = arith.constant 0 : i32
    %c0_i32_3 = arith.constant 0 : i32
    return %arg0, %c0_i32, %c0_i32_0, %c0_i32_1, %c0_i32_2 : i32, i32, i32, i32, i32
  }
  func.func @transform_1(%arg0: i32, %arg1: i32) -> (i32, i32) {
    %c0_i32 = arith.constant 0 : i32
    %c0_i32_0 = arith.constant 0 : i32
    %c0_i32_1 = arith.constant 0 : i32
    return %c0_i32, %c0_i32_0 : i32, i32
  }
  func.func @transform_2(%arg0: i32, %arg1: i32) -> (i32, i32) {
    %c0_i32 = arith.constant 0 : i32
    %c0_i32_0 = arith.constant 0 : i32
    %c0_i32_1 = arith.constant 0 : i32
    return %c0_i32, %c0_i32_0 : i32, i32
  }
  func.func @transform_3(%arg0: i32, %arg1: i32) -> (i32, i32) {
    %c0_i32 = arith.constant 0 : i32
    %c0_i32_0 = arith.constant 0 : i32
    %c0_i32_1 = arith.constant 0 : i32
    return %c0_i32, %c0_i32_0 : i32, i32
  }
  func.func @transform_4(%arg0: i32, %arg1: i32) -> (i32, i32, i32) {
    %c0_i32 = arith.constant 0 : i32
    %c0_i32_0 = arith.constant 0 : i32
    return %arg0, %arg1, %c0_i32 : i32, i32, i32
  }
}

</mosaic_0001>

<bundles_post_ra>
// kernel: tpu_custom_call.1
= control target key start
LH: loop header
LB: loop body
LE: loop exit
PB: predicated region body
PF: predicated region fallthrough
CT: control target
= control target key end

     0   :  { %9 = vsyncpa [#allocation4], 0  ;;  %s7154_s0 = inlined_call_operand.hbm [shape: bf16[2,1,18,18,4], index: 0, kind: input, shape index: {}]   ;;  %s7155_s1 = inlined_call_operand.hbm [shape: bf16[36,128], index: 1, kind: input, shape index: {}]   ;;  %s7156_s2 = inlined_call_operand.hbm [shape: f32[1,128], index: 2, kind: input, shape index: {}]   ;;  %s7157_s3 = inlined_call_operand.hbm [shape: f32[1,128], index: 3, kind: input, shape index: {}]   ;;  %s7158_s4 = inlined_call_operand.hbm [shape: f32[2,256,128], index: 4, kind: output, shape index: {}]  }
   0x1   :  { %11 = vsyncpa [#allocation4 + $0x1], 0 }
   0x2   :  { %12 = vsyncpa [#allocation7], 0 }
   0x3   :  { %13 = vsyncpa [#allocation10], 0 }
   0x4   :  { %14 = vsyncpa [#allocation5], 0 }
   0x5   :  { %16 = vsyncpa [#allocation5 + $0x1], 0  ;;  %s5110_s15 = smov 0   ;;  %s5112_s16 = smov 0  }
   0x6   :  { %s5114_s17 = smov 0   ;;  %s5116_s18 = smov 0  }
   0x7   :  { %s5118_s19 = smov 0   ;;  %s5120_s20 = smov 0  }
   0x8 LB: > { %s3514_s21 = sadd.s32 4294967295, %s5067_s20   ;;  %s3515_s22 = sadd.s32 4294967294, %s5067_s20   ;;  %s5067_s20 = sphi %s5120_s20, %s22_s20   ;;  %s5063_s19 = sphi %s5118_s19, %s7189_s19   ;;  %s5059_s18 = sphi %s5116_s18, %s7188_s18   ;;  %s5055_s17 = sphi %s5114_s17, %s7187_s17   ;;  %s5051_s16 = sphi %s5112_s16, %s7186_s16   ;;  %s5047_s15 = sphi %s5110_s15, %s7185_s15  }
   0x9   : > { %p54_p0 = scmp.ne.s32.totalorder %s5051_s16, %s5047_s15  ;;  %p5144_p1 = scmp.eq.s32.totalorder %s3514_s21, 0 }
   0xa   : > { %p5148_p2 = scmp.eq.s32.totalorder %s3514_s21, 1  ;;  %p149_p3 = scmp.eq.s32.totalorder %s3515_s22, 1 }
   0xb   : > { %s7166_s23 = scalar_select %p5144_p1, 1, 0 }
   0xc   : > { %s7167_s24 = scalar_select %p5148_p2, 1, 0 }
   0xd   : > { %p5154_p4 = por %p5144_p1, %p54_p0  ;;  %p3516_p5 = scmp.ge.s32.totalorder %s5067_s20, 1 }
   0xe   : > { %p5159_p6 = por %p149_p3, %p54_p0  ;;  %p156_p7 = scmp.lt.s32.totalorder %s5067_s20, 3 }
   0xf   : > { %s7168_s25 = scalar_select %p5154_p4, 1, 0 }
  0x10   : > { %s7169_s26 = scalar_select %p5159_p6, 1, 0 }
  0x11   : > { %p5164_p8 = pnand %p3516_p5, %p156_p7  ;;  %s5069_s28 = smov [#allocation6]  }
  0x12   : > { %7170 = sst [smem:[#allocation16_spill]] %s7169_s26  ;;  %s168_s29 = sshll.u32 %s5069_s28, 4  ;;  %s5168_s29 = int_to_ptr.vmem [resolvable:$true] %s168_s29 }
  0x13   : > { %s7171_s27 = scalar_select %p5164_p8, 1, 0 }
  0x14   : > { %p4132_p9 = pneg %p5164_p8  ;;  %s5070_s5 = smov [#allocation8]  }
  0x15   : > { %s182_s6 = sshll.u32 %s5070_s5, 4  ;;  %s5071_s7 = smov [#allocation9]   ;;  %s5179_s6 = int_to_ptr.vmem [resolvable:$true] %s182_s6 }
  0x16   : > { %p5175_p11 = pnand %p4132_p9, %p5144_p1  ;;  %s5181_s8 = sshll.u32 %s5071_s7, 4  ;;  %s194_s8 = int_to_ptr.vmem [resolvable:$true] %s5181_s8 }
  0x17   : > { %s4863_s11 = scalar_lea.hbm %s7155_s1, 320 }
  0x18   : > { %p4864_p12 = scmp.ne.s32.totalorder %s7155_s1, %s4863_s11  ;;  %p5191_p13 = pneg %p5175_p11 }
  0x19   : > { %p4870_p5 = scmp.lt.u32.totalorder %s4863_s11, %s7155_s1 }
  0x1a   : > { %p4866_p0 = pnand %p5191_p13, %p4864_p12 }
  0x1c   : > { %p4867_p3 = pneg %p4866_p0 }
  0x1e   : > { %p4872_p7 = pnand %p4870_p5, %p4867_p3 }
  0x20   : > { %4875 = shalt.err (!%p4872_p7)
}
  0x21   : > { %s4876_s28 = scalar_lea.vmem %s5168_s29, 320  ;;  %p4884_p1 = scmp.lt.s32.totalorder %s5168_s29, %s5168_s29 }
  0x22   : > { %p4877_p9 = scmp.ne.s32.totalorder %s5168_s29, %s4876_s28  ;;  %p4885_p4 = scmp.lt.s32.totalorder %s4876_s28, %s4876_s28 }
  0x24   : > { %p4879_p10 = pnand %p4877_p9, %p5191_p13  ;;  %p4886_p12 = por %p4885_p4, %p4884_p1 }
  0x26   : > { %p4880_p6 = pneg %p4879_p10 }
  0x28   : > { %p4887_p0 = pnand %p4886_p12, %p4880_p6 }
  0x2a   : > { %4890 = shalt.err (!%p4887_p0)
}
  0x2b   : > { %s7164_s5 = smov 64   ;;  %s5073_s7 = smov 4  }
  0x2c   : > { %4135 = dma.hbm_to_vmem [thread:$0]  (!%p5175_p11), %s7155_s1, 320, %s5168_s29, [#allocation7], %s7164_s5, %s7164_s5, %s5073_s7  }
  0x2d   : > { %s4891_s13 = scalar_lea.hbm %s7156_s2, 16 }
  0x2e   : > { %p4892_p1 = scmp.ne.s32.totalorder %s7156_s2, %s4891_s13  ;;  %p4898_p10 = scmp.lt.u32.totalorder %s4891_s13, %s7156_s2 }
  0x30   : > { %p4894_p4 = pnand %p4892_p1, %p5191_p13 }
  0x32   : > { %p4895_p6 = pneg %p4894_p4 }
  0x34   : > { %p4900_p3 = pnand %p4898_p10, %p4895_p6 }
  0x36   : > { %4903 = shalt.err (!%p4900_p3)
}
  0x37   : > { %s4904_s29 = scalar_lea.vmem %s5179_s6, 16  ;;  %s4911_s9 = scalar_lea.vmem %s5179_s6, 32 }
  0x38   : > { %p4905_p5 = scmp.ne.s32.totalorder %s5179_s6, %s4904_s29  ;;  %p4912_p12 = scmp.lt.s32.totalorder %s5179_s6, %s5179_s6 }
  0x39   : > { %p4913_p0 = scmp.lt.s32.totalorder %s4911_s9, %s4904_s29 }
  0x3a   : > { %p4907_p7 = pnand %p4905_p5, %p5191_p13 }
  0x3b   : > { %p4914_p1 = por %p4913_p0, %p4912_p12 }
  0x3c   : > { %p4908_p9 = pneg %p4907_p7 }
  0x3e   : > { %p4915_p4 = pnand %p4914_p1, %p4908_p9 }
  0x40   : > { %4918 = shalt.err (!%p4915_p4)
}
  0x41   : > { %4138 = dma.hbm_to_vmem [thread:$0]  (!%p5175_p11), %s7156_s2, 16, %s5179_s6, [#allocation7]  }
  0x42   : > { %s4919_s13 = scalar_lea.hbm %s7157_s3, 16 }
  0x43   : > { %p4920_p6 = scmp.ne.s32.totalorder %s7157_s3, %s4919_s13  ;;  %p4926_p5 = scmp.lt.u32.totalorder %s4919_s13, %s7157_s3 }
  0x45   : > { %p4922_p10 = pnand %p4920_p6, %p5191_p13 }
  0x47   : > { %p4923_p3 = pneg %p4922_p10 }
  0x49   : > { %p4928_p7 = pnand %p4926_p5, %p4923_p3 }
  0x4b   : > { %4931 = shalt.err (!%p4928_p7)
}
  0x4c   : > { %s4932_s9 = scalar_lea.vmem %s194_s8, 16  ;;  %s4939_s6 = scalar_lea.vmem %s194_s8, 32 }
  0x4d   : > { %p4933_p9 = scmp.ne.s32.totalorder %s194_s8, %s4932_s9  ;;  %p4940_p1 = scmp.lt.s32.totalorder %s194_s8, %s194_s8 }
  0x4e   : > { %p4941_p4 = scmp.lt.s32.totalorder %s4939_s6, %s4932_s9 }
  0x4f   : > { %p4935_p12 = pnand %p4933_p9, %p5191_p13 }
  0x50   : > { %p4942_p8 = por %p4941_p4, %p4940_p1 }
  0x51   : > { %p4936_p0 = pneg %p4935_p12 }
  0x53   : > { %p4943_p2 = pnand %p4942_p8, %p4936_p0 }
  0x55   : > { %4946 = shalt.err (!%p4943_p2)
}
  0x56   : > { %4141 = dma.hbm_to_vmem [thread:$0]  (!%p5175_p11), %s7157_s3, 16, %s194_s8, [#allocation10]  }
  0x57   : > { %s41_s14 = sadd.s32 1, %s5055_s17  ;;  %s34_s11 = sadd.s32 1, %s5063_s19 }
  0x58   : > { %p48_p2 = scmp.ne.s32.totalorder %s5055_s17, %s5051_s16  ;;  %p36_p8 = scmp.ge.s32.totalorder %s34_s11, 2 }
  0x59   : > { %p49_p13 = scmp.eq.s32.totalorder %s5067_s20, 0  ;;  %p7174_p6 = scmp.ne.s32.totalorder %s7167_s24, 0 }
  0x5a   : > { %p4153_p3 = scmp.lt.s32.totalorder %s5067_s20, 2  ;;  %s7191_s11 = smov (%p36_p8, %s34_s11), 0 }
  0x5b   : > { %p5265_p10 = por %p7174_p6, %p48_p2  ;;  %p50_p5 = por %p49_p13, %p48_p2 }
  0x5c   : > { %s204_s12 = sand.u32 1, %s5055_s17   ;;  %s38_s13 = ssub.s32 %s5063_s19, %s7191_s11 }
  0x5d   : > { %p39_p7 = scmp.eq.s32.totalorder %s38_s13, 0  ;;  %s4113_s8 = smul.u32 216, %s204_s12 }
  0x5e   : > { %s4114_s21 = smul.u32 3456, %s5063_s19  ;;  %p5276_p11 = pnand %p4153_p3, %p50_p5 }
  0x5f   : > { %s5281_s24 = scalar_select %p39_p7, %s5055_s17, %s41_s14  }
  0x60   : > { %s5286_s9 = scalar_lea.hbm %s7154_s0, %s4114_s21  ;;  %s208_s6 = scalar_lea.vmem [#allocation3], %s4113_s8 }
  0x61   : > { %s215_s26 = sshll.u32 %s208_s6, 4  ;;  %s5290_s10 = scalar_lea.sflag [#allocation4], %s204_s12  ;;  %s5288_s26 = int_to_ptr.vmem [resolvable:$true] %s215_s26 }
  0x62   : > { %s4947_s13 = scalar_lea.hbm %s5286_s9, 3456  ;;  %p4949_p12 = pneg %p5276_p11 }
  0x63   : > { %p4948_p9 = scmp.ne.s32.totalorder %s5286_s9, %s4947_s13  ;;  %s4952_s28 = scalar_lea.hbm %s7154_s0, 6912 }
  0x64   : > { %p4953_p4 = scmp.lt.u32.totalorder %s5286_s9, %s7154_s0  ;;  %p4954_p2 = scmp.lt.u32.totalorder %s4952_s28, %s4947_s13 }
  0x65   : > { %p4950_p0 = pnand %p4949_p12, %p4948_p9  ;;  %p4956_p13 = scmp.lt.u32.totalorder %s4947_s13, %s5286_s9 }
  0x66   : > { %p4955_p8 = por %p4954_p2, %p4953_p4 }
  0x67   : > { %p4951_p1 = pneg %p4950_p0 }
  0x68   : > { %p4957_p6 = por %p4956_p13, %p4955_p8 }
  0x6a   : > { %p4958_p3 = pnand %p4957_p6, %p4951_p1 }
  0x6c   : > { %4961 = shalt.err (!%p4958_p3)
}
  0x6d   : > { %s4962_s12 = scalar_lea.vmem %s5288_s26, 3456  ;;  %s5074_s8 = smov [#allocation3]  }
  0x6e   : > { %p4963_p5 = scmp.ne.s32.totalorder %s5288_s26, %s4962_s12  ;;  %s4967_s6 = sshll.u32 %s5074_s8, 4  ;;  %s4968_s6 = int_to_ptr.vmem [resolvable:$false] %s4967_s6 }
  0x6f   : > { %s4969_s5 = scalar_lea.vmem %s4968_s6, 6912  ;;  %p4970_p0 = scmp.lt.s32.totalorder %s5288_s26, %s4968_s6 }
  0x70   : > { %p4965_p7 = pnand %p4963_p5, %p4949_p12  ;;  %p4971_p4 = scmp.lt.s32.totalorder %s4969_s5, %s4962_s12 }
  0x72   : > { %p4966_p9 = pneg %p4965_p7  ;;  %p4972_p2 = por %p4971_p4, %p4970_p0 }
  0x74   : > { %p4973_p8 = pnand %p4972_p2, %p4966_p9 }
  0x76   : > { %4976 = shalt.err (!%p4973_p8)
}
  0x77   : > { %s7177_s13 = smov 64   ;;  %p7178_p12 = scmp.ne.s32.totalorder %s7171_s27, 0 }
  0x78   : > { %4145 = dma.hbm_to_vmem [thread:$0]  (!%p5276_p11), %s5286_s9, 3456, %s5288_s26, %s5290_s10, %s7177_s13, %s7177_s13, %s5073_s7  }
  0x79   : > { %227 = sbr.rel (%p7178_p12) target bundleno = 767 (0x2ff), region = 36  ;;  %s5324_s14 = sand.u32 (!%p7178_p12), 1, %s5051_s16  }
  0x7a   : > { %s4115_s21 = smul.u32 (!%p7178_p12), 216, %s5324_s14  ;;  %s230_s28 = scalar_lea.sflag (!%p7178_p12), [#allocation4], %s5324_s14 }
  0x7b   : > { %p7179_p1 = scmp.ne.s32.totalorder (!%p7178_p12), %s7168_s25, 0 }
  0x7c   : > { %s5328_s29 = scalar_lea.vmem (!%p7178_p12), [#allocation3], %s4115_s21 }
  0x80   : > { %5030 = dma.done.wait (%p7179_p1), %s230_s28, 3456  }
  0x81   : > { %5032 = vsyncadd (%p7179_p1), %s230_s28, 4294963840  ;;  %p7180_p11 = scmp.ne.s32.totalorder %s7166_s23, 0 }
  0x83   : > { %5034 = dma.done.wait (%p7180_p11), [#allocation7], 336  }
  0x84   : > { %5036 = vsyncadd (%p7180_p11), [#allocation7], 4294966960 }
  0x85   : > { %5038 = dma.done.wait (%p7180_p11), [#allocation10], 16  }
  0x86   : > { %5040 = vsyncadd (%p7180_p11), [#allocation10], 4294967280  ;;  %v5343_v0 = vld [vmem:[%s5328_s29 + $0x18] sm:$0xff]   ;;  %v381_v1 = vld [vmem:[%s5328_s29 + $0x20] sm:$0x1]  ;;  %vm517_vm0 = vcmask 1046528  }
  0x87   : > { %v3843_v2 = vld [vmem:[%s5328_s29] sm:$0xff]   ;;  %v3848_v3 = vunpack.c.l.bf16 %v5343_v0  ;;  %v3849_v4 = vunpack.c.h.bf16 %v5343_v0  ;;  %v429_v5 = vunpack.c.l.bf16 %v381_v1  ;;  %v375_v7 = vld [vmem:[%s5328_s29 + $0x8] sm:$0x1]  ;;  %v384_v9 = vld [vmem:[%s5328_s29 + $0x2c] sm:$0x1]  ;;  %s5075_s23 = smov 4  }
  0x88   : > { %v3844_v6 = vunpack.c.l.bf16 %v3843_v2  ;;  %v382_v8 = vld [vmem:[%s5328_s29 + $0x24] sm:$0xff]   ;;  %v3845_v10 = vunpack.c.h.bf16 %v3843_v2  ;;  %v423_v11 = vunpack.c.l.bf16 %v375_v7  ;;  %v376_v14 = vld [vmem:[%s5328_s29 + $0xc] sm:$0xff]   ;;  %v432_v21 = vunpack.c.l.bf16 %v384_v9  ;;  %v378_v23 = vld [vmem:[%s5328_s29 + $0x14] sm:$0x1]  ;;  %s5076_s25 = smov 8   ;;  %s5077_s27 = smov 12  }
  0x89   : > { %v430_v12 = vunpack.c.l.bf16 %v382_v8  ;;  %v431_v13 = vunpack.c.h.bf16 %v382_v8  ;;  %v528_v15 = vrot.slane %v3848_v3, 1  ;;  %v529_v16 = vrot.slane %v3849_v4, 1  ;;  %v388_v28 = vld [vmem:[%s5328_s29 + $0x3c] sm:$0xff]   ;;  %v390_v33 = vld [vmem:[%s5328_s29 + $0x44] sm:$0x1]  ;;  %v5366_v38 = vld [vmem:[%s5328_s29 + $0x30] sm:$0xff]  }
  0x8a   : > { %v531_v17 = vrot.slane %v429_v5, 1  ;;  %v518_v18 = vrot.slane %v3844_v6, 1  ;;  %v519_v19 = vrot.slane %v3845_v10, 1  ;;  %v521_v20 = vrot.slane %v423_v11, 1  ;;  %v387_v43 = vld [vmem:[%s5328_s29 + $0x38] sm:$0x1] }
  0x8b   : > { %v533_v22 = vrot.slane %v430_v12, 1  ;;  %v530_v24 = vsel %vm517_vm0, %v528_v15, %v529_v16  ;;  %v534_v26 = vrot.slane %v431_v13, 1  ;;  %v424_v27 = vunpack.c.l.bf16 %v376_v14  ;;  %v394_v52 = vld [vmem:[%s5328_s29 + $0x54] sm:$0xff]   ;;  %v396_v57 = vld [vmem:[%s5328_s29 + $0x5c] sm:$0x1]  ;;  %v5379_v58 = vld [vmem:[%s5328_s29 + $0x48] sm:$0xff]  }
  0x8c   : > { %v532_v25 = vsel %vm517_vm0, %v529_v16, %v531_v17  ;;  %v520_v30 = vsel %vm517_vm0, %v518_v18, %v519_v19  ;;  %v522_v31 = vsel %vm517_vm0, %v519_v19, %v521_v20  ;;  %v536_v32 = vrot.slane %v432_v21, 1  ;;  %v393_v6 = vld [vmem:[%s5328_s29 + $0x50] sm:$0x1]  ;;  %v402_v16 = vld [vmem:[%s5328_s29 + $0x74] sm:$0x1]  ;;  %v5397_v17 = vld [vmem:[%s5328_s29 + $0x60] sm:$0xff]  }
  0x8d   : > { %v4230_v29 = vpack.i.bf16 %v532_v25, %v530_v24  ;;  %v4220_v34 = vpack.i.bf16 %v522_v31, %v520_v30  ;;  %v535_v35 = vsel %vm517_vm0, %v533_v22, %v534_v26  ;;  %v425_v36 = vunpack.c.h.bf16 %v376_v14  ;;  %v400_v11 = vld [vmem:[%s5328_s29 + $0x6c] sm:$0xff]   ;;  %v406_v31 = vld [vmem:[%s5328_s29 + $0x84] sm:$0xff]   ;;  %s5078_s7 = smov 16   ;;  %s5079_s22 = smov 20  }
  0x8e   : > { %v426_v37 = vunpack.c.l.bf16 %v378_v23  ;;  %v537_v39 = vsel %vm517_vm0, %v534_v26, %v536_v32  ;;  %v523_v40 = vrot.slane %v424_v27, 1  ;;  %v436_v41 = vunpack.c.l.bf16 %v388_v28  ;;  %v399_v26 = vld [vmem:[%s5328_s29 + $0x68] sm:$0x1]  ;;  %s5080_s9 = smov 24   ;;  %s5081_s26 = smov 28  }
  0x8f   : > { %4231 = vrot.lane.b32.xlu1 %v4230_v29, %s5075_s23  ;;  %v437_v42 = vunpack.c.h.bf16 %v388_v28  ;;  %4221 = vrot.lane.b32.xlu0 %v4220_v34, %s5075_s23  ;;  %v4235_v44 = vpack.i.bf16 %v537_v39, %v535_v35  ;;  %v524_v45 = vrot.slane %v425_v36, 1  ;;  %v438_v47 = vunpack.c.l.bf16 %v390_v33  ;;  %s5082_s10 = smov 32   ;;  %s3526_s12 = sshll.u32 %s5324_s14, 8 }
  0x90   : > { %v526_v46 = vrot.slane %v426_v37, 1  ;;  %v543_v48 = vrot.slane %v436_v41, 1  ;;  %v3852_v50 = vunpack.c.l.bf16 %v5366_v38  ;;  %v3853_v51 = vunpack.c.h.bf16 %v5366_v38  ;;  %v408_v41 = vld [vmem:[%s5328_s29 + $0x8c] sm:$0x1]  ;;  %s7013_s8 = scalar_lea.vmem [#allocation11], %s3526_s12  ;;  %s3809_s6 = sshll.u32 %s5059_s18, 12 }
  0x91   : > { %v544_v49 = vrot.slane %v437_v42, 1  ;;  %v525_v53 = vsel %vm517_vm0, %v523_v40, %v524_v45  ;;  %v546_v55 = vrot.slane %v438_v47, 1  ;;  %v435_v56 = vunpack.c.l.bf16 %v387_v43  ;;  %v5415_v42 = vld [vmem:[%s5328_s29 + $0x78] sm:$0xff]   ;;  %s3391_s5 = sshll.u32 %s7013_s8, 4  ;;  %s7098_s21 = scalar_lea.hbm %s7158_s4, %s3809_s6  ;;  %s7102_s5 = int_to_ptr.vmem [resolvable:$true] %s3391_s5 }
  0x92   : > { %v527_v54 = vsel %vm517_vm0, %v524_v45, %v526_v46  ;;  %v538_v61 = vrot.slane %v3852_v50, 1  ;;  %v539_v62 = vrot.slane %v3853_v51, 1  ;;  %v442_v2 = vunpack.c.l.bf16 %v394_v52  ;;  %s3376_s28 = scalar_lea.sflag [#allocation5], %s5324_s14 }
  0x93   : > { %4236 = vrot.lane.b32.xlu1 %v4235_v44, %s5075_s23  ;;  %v4225_v59 = vpack.i.bf16 %v527_v54, %v525_v53  ;;  %v545_v60 = vsel %vm517_vm0, %v543_v48, %v544_v49  ;;  %v547_v63 = vsel %vm517_vm0, %v544_v49, %v546_v55  ;;  %v541_v1 = vrot.slane %v435_v56, 1  ;;  %v405_v53 = vld [vmem:[%s5328_s29 + $0x80] sm:$0x1] }
  0x94   : > { %v443_v5 = vunpack.c.h.bf16 %v394_v52  ;;  %v4245_v7 = vpack.i.bf16 %v547_v63, %v545_v60  ;;  %v540_v8 = vsel %vm517_vm0, %v538_v61, %v539_v62  ;;  %v444_v9 = vunpack.c.l.bf16 %v396_v57 }
  0x95   : > { %4226 = vrot.lane.b32.xlu0 %v4225_v59, %s5075_s23  ;;  %v3856_v10 = vunpack.c.l.bf16 %v5379_v58  ;;  %v542_v12 = vsel %vm517_vm0, %v539_v62, %v541_v1  ;;  %v553_v13 = vrot.slane %v442_v2, 1  ;;  %v3857_v15 = vunpack.c.h.bf16 %v5379_v58  ;;  %v412_v59 = vld [vmem:[%s5328_s29 + $0x9c] sm:$0xff]   ;;  %v414_v1 = vld [vmem:[%s5328_s29 + $0xa4] sm:$0x1]  ;;  %v5433_v2 = vld [vmem:[%s5328_s29 + $0x90] sm:$0xff]  }
  0x96   : > { %v554_v14 = vrot.slane %v443_v5, 1  ;;  %v4240_v18 = vpack.i.bf16 %v542_v12, %v540_v8  ;;  %v556_v19 = vrot.slane %v444_v9, 1  ;;  %v441_v20 = vunpack.c.l.bf16 %v393_v6 }
  0x97   : > { %4246 = vrot.lane.b32.xlu1 %v4245_v7, %s5075_s23  ;;  %v548_v21 = vrot.slane %v3856_v10, 1  ;;  %v549_v23 = vrot.slane %v3857_v15, 1  ;;  %v448_v24 = vunpack.c.l.bf16 %v400_v11  ;;  %v449_v25 = vunpack.c.h.bf16 %v400_v11 }
  0x98   : > { %v555_v22 = vsel %vm517_vm0, %v553_v13, %v554_v14  ;;  %v557_v27 = vsel %vm517_vm0, %v554_v14, %v556_v19  ;;  %v551_v28 = vrot.slane %v441_v20, 1  ;;  %v450_v29 = vunpack.c.l.bf16 %v402_v16  ;;  %v411_v14 = vld [vmem:[%s5328_s29 + $0x98] sm:$0x1] }
  0x99   : > { %4241 = vrot.lane.b32.xlu0 %v4240_v18, %s5075_s23  ;;  %v3860_v30 = vunpack.c.l.bf16 %v5397_v17  ;;  %v4255_v32 = vpack.i.bf16 %v557_v27, %v555_v22  ;;  %v550_v33 = vsel %vm517_vm0, %v548_v21, %v549_v23  ;;  %v563_v34 = vrot.slane %v448_v24, 1  ;;  %v418_v21 = vld [vmem:[%s5328_s29 + $0xb4] sm:$0xff]  }
  0x9a   : > { %v564_v35 = vrot.slane %v449_v25, 1  ;;  %v552_v36 = vsel %vm517_vm0, %v549_v23, %v551_v28  ;;  %v566_v37 = vrot.slane %v450_v29, 1  ;;  %v3861_v39 = vunpack.c.h.bf16 %v5397_v17  ;;  %v4023_v17 = vld [vmem:[%s5328_s29 + $0xc0] sm:$0xff]  }
  0x9b   : > { %v447_v40 = vunpack.c.l.bf16 %v399_v26  ;;  %4256 = vrot.lane.b32.xlu1 %v4255_v32, %s5075_s23  ;;  %v4250_v43 = vpack.i.bf16 %v552_v36, %v550_v33  ;;  %v558_v45 = vrot.slane %v3860_v30, 1  ;;  %v454_v46 = vunpack.c.l.bf16 %v406_v31  ;;  %v5457_v32 = vld [vmem:[%s5328_s29 + $0xa8] sm:$0xff]  }
  0x9c   : > { %v565_v44 = vsel %vm517_vm0, %v563_v34, %v564_v35  ;;  %v567_v47 = vsel %vm517_vm0, %v564_v35, %v566_v37  ;;  %v559_v48 = vrot.slane %v3861_v39, 1  ;;  %v455_v52 = vunpack.c.h.bf16 %v406_v31  ;;  %v420_v31 = vld [vmem:[%s5328_s29 + $0xbc] sm:$0x1] }
  0x9d   : > { %v561_v49 = vrot.slane %v447_v40, 1  ;;  %4251 = vrot.lane.b32.xlu0 %v4250_v43, %s5075_s23  ;;  %v4265_v54 = vpack.i.bf16 %v567_v47, %v565_v44  ;;  %v456_v55 = vunpack.c.l.bf16 %v408_v41  ;;  %v573_v56 = vrot.slane %v454_v46, 1  ;;  %v417_v44 = vld [vmem:[%s5328_s29 + $0xb0] sm:$0x1] }
  0x9e   : > { %v3864_v57 = vunpack.c.l.bf16 %v5415_v42  ;;  %v560_v60 = vsel %vm517_vm0, %v558_v45, %v559_v48  ;;  %v574_v62 = vrot.slane %v455_v52, 1  ;;  %v3865_v63 = vunpack.c.h.bf16 %v5415_v42  ;;  %v5472_v52 = vld [vmem:[%s5328_s29 + $0xc] sm:$0xff]  }
  0x9f   : > { %v562_v61 = vsel %vm517_vm0, %v559_v48, %v561_v49  ;;  %4266 = vrot.lane.b32.xlu1 %v4265_v54, %s5075_s23  ;;  %v576_v6 = vrot.slane %v456_v55, 1  ;;  %v453_v7 = vunpack.c.l.bf16 %v405_v53  ;;  %v460_v12 = vunpack.c.l.bf16 %v412_v59  ;;  %v730_v49 = vld [vmem:[%s5328_s29 + $0xc] sm:$0xe] }
  0xa0   : > { %v4260_v5 = vpack.i.bf16 %v562_v61, %v560_v60  ;;  %v568_v8 = vrot.slane %v3864_v57, 1  ;;  %v575_v9 = vsel %vm517_vm0, %v573_v56, %v574_v62  ;;  %v5441_v11 = vrot.slane %v3865_v63, 1  ;;  %v727_v60 = vld [vmem:[%s5328_s29] sm:$0xe] }
  0xa1   : > { %v461_v13 = vunpack.c.h.bf16 %v412_v59  ;;  %v577_v16 = vsel %vm517_vm0, %v574_v62, %v576_v6  ;;  %v571_v18 = vrot.slane %v453_v7, 1  ;;  %v462_v19 = vunpack.c.l.bf16 %v414_v1  ;;  %v732_v59 = vld [vmem:[%s5328_s29 + $0x14] sm:$0x1] }
  0xa2   : > { %4261 = vrot.lane.b32.xlu0 %v4260_v5, %s5075_s23  ;;  %v3868_v20 = vunpack.c.l.bf16 %v5433_v2  ;;  %v4275_v22 = vpack.i.bf16 %v577_v16, %v575_v9  ;;  %v5450_v23 = vsel %vm517_vm0, %v568_v8, %v5441_v11  ;;  %v583_v24 = vrot.slane %v460_v12, 1  ;;  %v728_v12 = vld [vmem:[%s5328_s29 + $0x4] ss:$24 sps:$4 sm:$0xff]  }
  0xa3   : > { %v584_v25 = vrot.slane %v461_v13, 1  ;;  %vm871_vm1 = vcmask 1045504   ;;  %v572_v26 = vsel %vm517_vm0, %v5441_v11, %v571_v18  ;;  %v586_v27 = vrot.slane %v462_v19, 1  ;;  %v729_v13 = vld [vmem:[%s5328_s29 + $0x8] sm:$0x1] }
  0xa4   : > { %v3869_v28 = vunpack.c.h.bf16 %v5433_v2  ;;  %v459_v29 = vunpack.c.l.bf16 %v411_v14  ;;  %4276 = vrot.lane.b32.xlu1 %v4275_v22, %s5075_s23  ;;  %v4270_v33 = vpack.i.bf16 %v572_v26, %v5450_v23  ;;  %v578_v35 = vrot.slane %v3868_v20, 1 }
  0xa5   : > { %v585_v34 = vsel %vm517_vm0, %v583_v24, %v584_v25  ;;  %v466_v36 = vunpack.c.l.bf16 %v418_v21  ;;  %v587_v37 = vsel %vm517_vm0, %v584_v25, %v586_v27  ;;  %v467_v43 = vunpack.c.h.bf16 %v418_v21  ;;  %v736_v21 = vld [vmem:[%s5328_s29 + $0x24] sm:$0xe] }
  0xa6   : > { %v579_v40 = vrot.slane %v3869_v28, 1  ;;  %v581_v41 = vrot.slane %v459_v29, 1  ;;  %4271 = vrot.lane.b32.xlu0 %v4270_v33, %s5075_s23  ;;  %v4285_v45 = vpack.i.bf16 %v587_v37, %v585_v34  ;;  %v468_v46 = vunpack.c.l.bf16 %v420_v31  ;;  %v5493_v27 = vld [vmem:[%s5328_s29 + $0x24] sm:$0xff]  }
  0xa7   : > { %v593_v47 = vrot.slane %v466_v36, 1  ;;  %v3872_v48 = vunpack.c.l.bf16 %v5457_v32  ;;  %v594_v55 = vrot.slane %v467_v43, 1  ;;  %v3873_v56 = vunpack.c.h.bf16 %v5457_v32  ;;  %v733_v36 = vld [vmem:[%s5328_s29 + $0x18] sm:$0xe] }
  0xa8   : > { %v580_v53 = vsel %vm517_vm0, %v578_v35, %v579_v40  ;;  %v582_v54 = vsel %vm517_vm0, %v579_v40, %v581_v41  ;;  %4286 = vrot.lane.b32.xlu1 %v4285_v45, %s5075_s23  ;;  %v596_v62 = vrot.slane %v468_v46, 1  ;;  %v465_v1 = vunpack.c.l.bf16 %v417_v44  ;;  %v738_v35 = vld [vmem:[%s5328_s29 + $0x2c] sm:$0x1] }
  0xa9   : > { %v4280_v61 = vpack.i.bf16 %v582_v54, %v580_v53  ;;  %v588_v5 = vrot.slane %v3872_v48, 1  ;;  %v595_v6 = vsel %vm517_vm0, %v593_v47, %v594_v55  ;;  %v589_v7 = vrot.slane %v3873_v56, 1 }
  0xaa   : > { %v778_v8 = vunpack.c.l.bf16 %v730_v49  ;;  %v779_v9 = vunpack.c.h.bf16 %v5472_v52  ;;  %v597_v14 = vsel %vm517_vm0, %v594_v55, %v596_v62  ;;  %v591_v16 = vrot.slane %v465_v1, 1  ;;  %v735_v49 = vld [vmem:[%s5328_s29 + $0x20] sm:$0x1] }
  0xab   : > { %4281 = vrot.lane.b32.xlu0 %v4280_v61, %s5075_s23  ;;  %v780_v18 = vunpack.c.l.bf16 %v732_v59  ;;  %v775_v19 = vunpack.c.l.bf16 %v727_v60  ;;  %v4295_v22 = vpack.i.bf16 %v597_v14, %v595_v6  ;;  %v590_v24 = vsel %vm517_vm0, %v588_v5, %v589_v7  ;;  %v742_v60 = vld [vmem:[%s5328_s29 + $0x3c] sm:$0xe] }
  0xac   : > { %v877_v25 = vrot.slane %v778_v8, 2  ;;  %v878_v26 = vrot.slane %v779_v9, 2  ;;  %v592_v29 = vsel %vm517_vm0, %v589_v7, %v591_v16  ;;  %v776_v33 = vunpack.c.l.bf16 %v728_v12  ;;  %v5506_v61 = vld [vmem:[%s5328_s29 + $0x3c] sm:$0xff]   ;;  %v744_v7 = vld [vmem:[%s5328_s29 + $0x44] sm:$0x1] }
  0xad   : > { %v880_v31 = vrot.slane %v780_v18, 2  ;;  %v777_v34 = vunpack.c.l.bf16 %v729_v13  ;;  %4296 = vrot.lane.b32.xlu1 %v4295_v22, %s5075_s23  ;;  %v4290_v37 = vpack.i.bf16 %v592_v29, %v590_v24  ;;  %v872_v41 = vrot.slane %v775_v19, 2  ;;  %v739_v8 = vld [vmem:[%s5328_s29 + $0x30] sm:$0xe]  ;;  %v740_v24 = vld [vmem:[%s5328_s29 + $0x34] ss:$24 sps:$4 sm:$0xff]  }
  0xae   : > { %v879_v40 = vsel %vm871_vm1, %v877_v25, %v878_v26  ;;  %v784_v43 = vunpack.c.l.bf16 %v736_v21  ;;  %v873_v45 = vrot.slane %v776_v33, 2  ;;  %v785_v47 = vunpack.c.h.bf16 %v5493_v27  ;;  %v741_v25 = vld [vmem:[%s5328_s29 + $0x38] sm:$0x1]  ;;  %v748_v33 = vld [vmem:[%s5328_s29 + $0x54] sm:$0xe] }
  0xaf   : > { %v881_v44 = vsel %vm871_vm1, %v878_v26, %v880_v31  ;;  %v875_v46 = vrot.slane %v777_v34, 2  ;;  %4291 = vrot.lane.b32.xlu0 %v4290_v37, %s5075_s23  ;;  %v786_v54 = vunpack.c.l.bf16 %v738_v35  ;;  %v781_v59 = vunpack.c.l.bf16 %v733_v36  ;;  %s5083_s23 = smov [#allocation11]  }
  0xb0   : > { %v4305_v53 = vpack.i.bf16 %v881_v44, %v879_v40  ;;  %v887_v55 = vrot.slane %v784_v43, 2  ;;  %v874_v62 = vsel %vm871_vm1, %v872_v41, %v873_v45  ;;  %v888_v5 = vrot.slane %v785_v47, 2  ;;  %v5522_v40 = vld [vmem:[%s5328_s29 + $0x54] sm:$0xff]   ;;  %v745_v47 = vld [vmem:[%s5328_s29 + $0x48] sm:$0xe] }
  0xb1   : > { %v876_v1 = vsel %vm871_vm1, %v873_v45, %v875_v46  ;;  %v782_v6 = vunpack.c.h.bf16 %v728_v12  ;;  %v890_v13 = vrot.slane %v786_v54, 2  ;;  %v783_v14 = vunpack.c.l.bf16 %v735_v49  ;;  %v750_v46 = vld [vmem:[%s5328_s29 + $0x5c] sm:$0x1] }
  0xb2   : > { %4306 = vrot.lane.b32.xlu1 %v4305_v53, %s5076_s25  ;;  %v4300_v9 = vpack.i.bf16 %v876_v1, %v874_v62  ;;  %v882_v16 = vrot.slane %v781_v59, 2  ;;  %v889_v18 = vsel %vm871_vm1, %v887_v55, %v888_v5  ;;  %v790_v21 = vunpack.c.l.bf16 %v742_v60 }
  0xb3   : > { %v883_v19 = vrot.slane %v782_v6, 2  ;;  %v791_v22 = vunpack.c.h.bf16 %v5506_v61  ;;  %v891_v12 = vsel %vm871_vm1, %v888_v5, %v890_v13  ;;  %v885_v26 = vrot.slane %v783_v14, 2  ;;  %v747_v5 = vld [vmem:[%s5328_s29 + $0x50] sm:$0x1]  ;;  %v754_v13 = vld [vmem:[%s5328_s29 + $0x6c] sm:$0xe] }
  0xb4   : > { %4301 = vrot.lane.b32.xlu0 %v4300_v9, %s5076_s25  ;;  %v792_v29 = vunpack.c.l.bf16 %v744_v7  ;;  %v787_v31 = vunpack.c.l.bf16 %v739_v8  ;;  %v4315_v34 = vpack.i.bf16 %v891_v12, %v889_v18  ;;  %v897_v36 = vrot.slane %v790_v21, 2  ;;  %v5535_v14 = vld [vmem:[%s5328_s29 + $0x6c] sm:$0xff]  }
  0xb5   : > { %v884_v35 = vsel %vm871_vm1, %v882_v16, %v883_v19  ;;  %v898_v37 = vrot.slane %v791_v22, 2  ;;  %v886_v41 = vsel %vm871_vm1, %v883_v19, %v885_v26  ;;  %v788_v44 = vunpack.c.l.bf16 %v740_v24  ;;  %v756_v22 = vld [vmem:[%s5328_s29 + $0x74] sm:$0x1] }
  0xb6   : > { %v900_v43 = vrot.slane %v792_v29, 2  ;;  %v789_v45 = vunpack.c.l.bf16 %v741_v25  ;;  %4316 = vrot.lane.b32.xlu1 %v4315_v34, %s5076_s25  ;;  %v4310_v49 = vpack.i.bf16 %v886_v41, %v884_v35  ;;  %v892_v54 = vrot.slane %v787_v31, 2  ;;  %v751_v25 = vld [vmem:[%s5328_s29 + $0x60] sm:$0xe]  ;;  %v753_v41 = vld [vmem:[%s5328_s29 + $0x68] sm:$0x1] }
  0xb7   : > { %v899_v53 = vsel %vm871_vm1, %v897_v36, %v898_v37  ;;  %v796_v55 = vunpack.c.l.bf16 %v748_v33  ;;  %v893_v60 = vrot.slane %v788_v44, 2  ;;  %v797_v1 = vunpack.c.h.bf16 %v5522_v40 }
  0xb8   : > { %v901_v59 = vsel %vm871_vm1, %v898_v37, %v900_v43  ;;  %v895_v62 = vrot.slane %v789_v45, 2  ;;  %4311 = vrot.lane.b32.xlu0 %v4310_v49, %s5076_s25  ;;  %v798_v7 = vunpack.c.l.bf16 %v750_v46  ;;  %v793_v9 = vunpack.c.l.bf16 %v745_v47  ;;  %v752_v37 = vld [vmem:[%s5328_s29 + $0x64] ss:$24 sps:$4 sm:$0xff]  }
  0xb9   : > { %v4325_v6 = vpack.i.bf16 %v901_v59, %v899_v53  ;;  %v907_v8 = vrot.slane %v796_v55, 2  ;;  %v894_v16 = vsel %vm871_vm1, %v892_v54, %v893_v60  ;;  %v908_v19 = vrot.slane %v797_v1, 2  ;;  %v760_v46 = vld [vmem:[%s5328_s29 + $0x84] sm:$0xe] }
  0xba   : > { %v896_v18 = vsel %vm871_vm1, %v893_v60, %v895_v62  ;;  %v794_v21 = vunpack.c.h.bf16 %v740_v24  ;;  %v910_v26 = vrot.slane %v798_v7, 2  ;;  %v795_v29 = vunpack.c.l.bf16 %v747_v5  ;;  %v5551_v55 = vld [vmem:[%s5328_s29 + $0x84] sm:$0xff]   ;;  %v762_v5 = vld [vmem:[%s5328_s29 + $0x8c] sm:$0x1] }
  0xbb   : > { %4326 = vrot.lane.b32.xlu1 %v4325_v6, %s5076_s25  ;;  %v4320_v12 = vpack.i.bf16 %v896_v18, %v894_v16  ;;  %v902_v31 = vrot.slane %v793_v9, 2  ;;  %v909_v33 = vsel %vm871_vm1, %v907_v8, %v908_v19  ;;  %v802_v35 = vunpack.c.l.bf16 %v754_v13  ;;  %v757_v6 = vld [vmem:[%s5328_s29 + $0x78] sm:$0xe] }
  0xbc   : > { %v903_v34 = vrot.slane %v794_v21, 2  ;;  %v803_v36 = vunpack.c.h.bf16 %v5535_v14  ;;  %v911_v24 = vsel %vm871_vm1, %v908_v19, %v910_v26  ;;  %v905_v43 = vrot.slane %v795_v29, 2 }
  0xbd   : > { %4321 = vrot.lane.b32.xlu0 %v4320_v12, %s5076_s25  ;;  %v804_v44 = vunpack.c.l.bf16 %v756_v22  ;;  %v799_v45 = vunpack.c.l.bf16 %v751_v25  ;;  %v4335_v47 = vpack.i.bf16 %v911_v24, %v909_v33  ;;  %v917_v53 = vrot.slane %v802_v35, 2  ;;  %v759_v22 = vld [vmem:[%s5328_s29 + $0x80] sm:$0x1]  ;;  %v768_v24 = vld [vmem:[%s5328_s29 + $0xa4] sm:$0x1] }
  0xbe   : > { %v904_v49 = vsel %vm871_vm1, %v902_v31, %v903_v34  ;;  %v918_v54 = vrot.slane %v803_v36, 2  ;;  %v906_v59 = vsel %vm871_vm1, %v903_v34, %v905_v43  ;;  %v800_v62 = vunpack.c.l.bf16 %v752_v37  ;;  %v766_v31 = vld [vmem:[%s5328_s29 + $0x9c] sm:$0xe]  ;;  %v763_v43 = vld [vmem:[%s5328_s29 + $0x90] sm:$0xe] }
  0xbf   : > { %v920_v60 = vrot.slane %v804_v44, 2  ;;  %v801_v1 = vunpack.c.l.bf16 %v753_v41  ;;  %4336 = vrot.lane.b32.xlu1 %v4335_v47, %s5076_s25  ;;  %v4330_v7 = vpack.i.bf16 %v906_v59, %v904_v49  ;;  %v912_v9 = vrot.slane %v799_v45, 2  ;;  %v5564_v33 = vld [vmem:[%s5328_s29 + $0x9c] sm:$0xff]  }
  0xc0   : > { %v919_v8 = vsel %vm871_vm1, %v917_v53, %v918_v54  ;;  %v808_v13 = vunpack.c.l.bf16 %v760_v46  ;;  %v913_v18 = vrot.slane %v800_v62, 2  ;;  %v809_v21 = vunpack.c.h.bf16 %v5551_v55  ;;  %v765_v62 = vld [vmem:[%s5328_s29 + $0x98] sm:$0x1] }
  0xc1   : > { %v921_v16 = vsel %vm871_vm1, %v918_v54, %v920_v60  ;;  %v915_v19 = vrot.slane %v801_v1, 2  ;;  %4331 = vrot.lane.b32.xlu0 %v4330_v7, %s5076_s25  ;;  %v810_v12 = vunpack.c.l.bf16 %v762_v5  ;;  %v805_v29 = vunpack.c.l.bf16 %v757_v6  ;;  %v764_v60 = vld [vmem:[%s5328_s29 + $0x94] ss:$24 sps:$4 sm:$0xff]  }
  0xc2   : > { %v4345_v25 = vpack.i.bf16 %v921_v16, %v919_v8  ;;  %v927_v26 = vrot.slane %v808_v13, 2  ;;  %v914_v34 = vsel %vm871_vm1, %v912_v9, %v913_v18  ;;  %v928_v36 = vrot.slane %v809_v21, 2  ;;  %v772_v7 = vld [vmem:[%s5328_s29 + $0xb4] sm:$0xe] }
  0xc3   : > { %v916_v35 = vsel %vm871_vm1, %v913_v18, %v915_v19  ;;  %v806_v41 = vunpack.c.h.bf16 %v752_v37  ;;  %v930_v45 = vrot.slane %v810_v12, 2  ;;  %v807_v46 = vunpack.c.l.bf16 %v759_v22  ;;  %v5579_v8 = vld [vmem:[%s5328_s29 + $0xb4] sm:$0xff]   ;;  %v774_v12 = vld [vmem:[%s5328_s29 + $0xbc] sm:$0x1] }
  0xc4   : > { %4346 = vrot.lane.b32.xlu1 %v4345_v25, %s5076_s25  ;;  %v4340_v44 = vpack.i.bf16 %v916_v35, %v914_v34  ;;  %v922_v47 = vrot.slane %v805_v29, 2  ;;  %v929_v49 = vsel %vm871_vm1, %v927_v26, %v928_v36  ;;  %v814_v54 = vunpack.c.l.bf16 %v766_v31  ;;  %v769_v26 = vld [vmem:[%s5328_s29 + $0xa8] sm:$0xe] }
  0xc5   : > { %v923_v53 = vrot.slane %v806_v41, 2  ;;  %v815_v59 = vunpack.c.h.bf16 %v5564_v33  ;;  %v931_v37 = vsel %vm871_vm1, %v928_v36, %v930_v45  ;;  %v925_v1 = vrot.slane %v807_v46, 2 }
  0xc6   : > { %4341 = vrot.lane.b32.xlu0 %v4340_v44, %s5076_s25  ;;  %v816_v5 = vunpack.c.l.bf16 %v768_v24  ;;  %v811_v6 = vunpack.c.l.bf16 %v763_v43  ;;  %v4355_v9 = vpack.i.bf16 %v931_v37, %v929_v49  ;;  %v937_v16 = vrot.slane %v814_v54, 2  ;;  %v771_v44 = vld [vmem:[%s5328_s29 + $0xb0] sm:$0x1] }
  0xc7   : > { %v924_v13 = vsel %vm871_vm1, %v922_v47, %v923_v53  ;;  %v938_v18 = vrot.slane %v815_v59, 2  ;;  %v926_v19 = vsel %vm871_vm1, %v923_v53, %v925_v1  ;;  %v812_v22 = vunpack.c.l.bf16 %v764_v60  ;;  %v5594_v37 = vld [vmem:[%s5328_s29 + $0xc] sm:$0xff]  }
  0xc8   : > { %v940_v21 = vrot.slane %v816_v5, 2  ;;  %v813_v25 = vunpack.c.l.bf16 %v765_v62  ;;  %4356 = vrot.lane.b32.xlu1 %v4355_v9, %s5076_s25  ;;  %v4350_v29 = vpack.i.bf16 %v926_v19, %v924_v13  ;;  %v932_v34 = vrot.slane %v811_v6, 2  ;;  %v5598_v9 = vld [vmem:[%s5328_s29 + $0x24] sm:$0xff]  }
  0xc9   : > { %v939_v31 = vsel %vm871_vm1, %v937_v16, %v938_v18  ;;  %v820_v35 = vunpack.c.l.bf16 %v772_v7  ;;  %v933_v41 = vrot.slane %v812_v22, 2  ;;  %v821_v43 = vunpack.c.h.bf16 %v5579_v8 }
  0xca   : > { %v941_v36 = vsel %vm871_vm1, %v938_v18, %v940_v21  ;;  %v935_v24 = vrot.slane %v813_v25, 2  ;;  %4351 = vrot.lane.b32.xlu0 %v4350_v29, %s5076_s25  ;;  %v822_v46 = vunpack.c.l.bf16 %v774_v12  ;;  %v817_v49 = vunpack.c.l.bf16 %v769_v26  ;;  %v5610_v25 = vld [vmem:[%s5328_s29 + $0x3c] sm:$0xff]  }
  0xcb   : > { %v4365_v45 = vpack.i.bf16 %v941_v36, %v939_v31  ;;  %v947_v47 = vrot.slane %v820_v35, 2  ;;  %v934_v53 = vsel %vm871_vm1, %v932_v34, %v933_v41  ;;  %v948_v59 = vrot.slane %v821_v43, 2 }
  0xcc   : > { %v936_v54 = vsel %vm871_vm1, %v933_v41, %v935_v24  ;;  %v818_v62 = vunpack.c.h.bf16 %v764_v60  ;;  %v950_v5 = vrot.slane %v822_v46, 2  ;;  %v819_v6 = vunpack.c.l.bf16 %v771_v44  ;;  %v3588_v44 = vld [vmem:[%s5328_s29 + $0x80] sm:$0x1] }
  0xcd   : > { %4366 = vrot.lane.b32.xlu1 %v4365_v45, %s5076_s25  ;;  %v4360_v1 = vpack.i.bf16 %v936_v54, %v934_v53  ;;  %v942_v7 = vrot.slane %v817_v49, 2  ;;  %v949_v13 = vsel %vm871_vm1, %v947_v47, %v948_v59  ;;  %v1117_v18 = vunpack.c.l.bf16 %v5472_v52  ;;  %v4024_v49 = vld [vmem:[%s5328_s29 + $0x18] sm:$0xff]  }
  0xce   : > { %v943_v16 = vrot.slane %v818_v62, 2  ;;  %v951_v60 = vsel %vm871_vm1, %v948_v59, %v950_v5  ;;  %v945_v19 = vrot.slane %v819_v6, 2  ;;  %v1118_v21 = vunpack.c.h.bf16 %v5594_v37 }
  0xcf   : > { %4361 = vrot.lane.b32.xlu0 %v4360_v1, %s5076_s25  ;;  %v4395_v22 = vpack.i.bf16 %v3853_v51, %v3852_v50  ;;  %v4375_v12 = vpack.i.bf16 %v951_v60, %v949_v13  ;;  %v1121_v52 = vunpack.c.l.bf16 %v5493_v27  ;;  %v1122_v29 = vunpack.c.h.bf16 %v5598_v9  ;;  %v3540_v50 = vld [vmem:[%s5328_s29 + $0x58] ss:$72 sps:$4 sm:$0xff]  }
  0xd0   : > { %v944_v26 = vsel %vm871_vm1, %v942_v7, %v943_v16  ;;  %v946_v31 = vsel %vm871_vm1, %v943_v16, %v945_v19  ;;  %v5620_v34 = vpack.i.bf16 %v3857_v15, %v3856_v10  ;;  %v1125_v38 = vunpack.c.l.bf16 %v5506_v61  ;;  %v3544_v15 = vld [vmem:[%s5328_s29 + $0x6c] sm:$0xff]   ;;  %v5638_v61 = vld [vmem:[%s5328_s29 + $0x84] sm:$0xff]   ;;  %v3564_v7 = vld [vmem:[%s5328_s29 + $0x20] sm:$0x1] }
  0xd1   : > { %4376 = vrot.lane.b32.xlu1 %v4375_v12, %s5076_s25  ;;  %v4370_v51 = vpack.i.bf16 %v946_v31, %v944_v26  ;;  %v4385_v27 = vpack.i.bf16 %v3849_v4, %v3848_v3  ;;  %v1126_v35 = vunpack.c.h.bf16 %v5610_v25  ;;  %v5634_v58 = vpack.i.bf16 %v3861_v39, %v3860_v30  ;;  %v5699_v12 = vld [vmem:[%s5328_s29 + $0x6c] sm:$0xff]  }
  0xd2   : > { %v4380_v10 = vpack.i.bf16 %v1118_v21, %v1117_v18  ;;  %v4390_v36 = vpack.i.bf16 %v1122_v29, %v1121_v52  ;;  %v1129_v0 = vunpack.c.l.bf16 %v5522_v40  ;;  %v1130_v3 = vunpack.c.l.bf16 %v3540_v50 }
  0xd3   : > { %4371 = vrot.lane.b32.xlu0 %v4370_v51, %s5076_s25  ;;  %v5646_v4 = vpack.i.bf16 %v3869_v28, %v3868_v20  ;;  %v5649_v30 = vpack.i.bf16 %v1126_v35, %v1125_v38  ;;  %v5655_v39 = vpack.i.bf16 %v3865_v63, %v3864_v57  ;;  %v1133_v40 = vunpack.c.l.bf16 %v5535_v14  ;;  %v3556_v20 = vld [vmem:[%s5328_s29 + $0x70] ss:$72 sps:$4 sm:$0xff]   ;;  %v3585_v28 = vld [vmem:[%s5328_s29 + $0x74] sm:$0x1] }
  0xd4   : > { %v5662_v2 = vpack.i.bf16 %v3873_v56, %v3872_v48  ;;  %v1134_v41 = vunpack.c.h.bf16 %v3544_v15  ;;  %v1137_v42 = vunpack.c.l.bf16 %v5551_v55  ;;  %v1138_v57 = vunpack.c.h.bf16 %v5638_v61  ;;  %v5671_v14 = vld [vmem:[%s5328_s29 + $0xc] sm:$0xff]   ;;  %v3561_v56 = vld [vmem:[%s5328_s29 + $0x14] sm:$0x1] }
  0xd5   : > { %4386 = vrot.lane.b32.xlu1 %v4385_v27, %s5077_s27  ;;  %v1141_v63 = vunpack.c.l.bf16 %v5564_v33  ;;  %v1142_v24 = vunpack.c.h.bf16 %v3540_v50  ;;  %v3904_v32 = vunpack.c.l.bf16 %v4023_v17  ;;  %v3905_v43 = vunpack.c.h.bf16 %v4023_v17  ;;  %v3633_v38 = vld [vmem:[%s5328_s29 + $0x74] sm:$0x1]  ;;  %v3607_v50 = vld [vmem:[%s5328_s29 + $0xc] sm:$0xe] }
  0xd6   : > { %v1382_v48 = vunpack.c.l.bf16 %v3544_v15  ;;  %v1145_v45 = vunpack.c.l.bf16 %v5579_v8  ;;  %v1146_v46 = vunpack.c.h.bf16 %v3556_v20  ;;  %v1383_v47 = vunpack.c.l.bf16 %v3556_v20  ;;  %v3608_v15 = vld [vmem:[%s5328_s29 + $0x10] ss:$108 sps:$4 sm:$0xff]  }
  0xd7   : > { %4381 = vrot.lane.b32.xlu0 %v4380_v10, %s5077_s27  ;;  %v1384_v55 = vunpack.c.l.bf16 %v3585_v28  ;;  %v4410_v53 = vpack.i.bf16 %v1130_v3, %v1129_v0  ;;  %v1358_v54 = vunpack.c.l.bf16 %v5594_v37  ;;  %v1359_v59 = vunpack.c.h.bf16 %v5671_v14  ;;  %v3631_v37 = vld [vmem:[%s5328_s29 + $0x6c] sm:$0xe] }
  0xd8   : > { %v1494_v33 = vrot.slane %v1382_v48, 1  ;;  %v1495_v62 = vrot.slane %v1383_v47, 1  ;;  %v1360_v5 = vunpack.c.l.bf16 %v3561_v56  ;;  %v1387_v6 = vunpack.c.l.bf16 %v3588_v44 }
  0xd9   : > { %4396 = vrot.lane.b32.xlu1 %v4395_v22, %s5077_s27  ;;  %v1497_v1 = vrot.slane %v1384_v55, 1  ;;  %v5682_v8 = vpack.i.bf16 %v1134_v41, %v1133_v40  ;;  %v5684_v13 = vpack.i.bf16 %v1138_v57, %v1137_v42  ;;  %v5686_v16 = vunpack.c.l.bf16 %v4024_v49  ;;  %v3634_v40 = vld [vmem:[%s5328_s29 + $0x78] sm:$0xe] }
  0xda   : > { %v5688_v18 = vunpack.c.h.bf16 %v4024_v49  ;;  %v5692_v60 = vpack.i.bf16 %v1142_v24, %v1141_v63  ;;  %v5694_v19 = vpack.i.bf16 %v3905_v43, %v3904_v32  ;;  %v5696_v21 = vpack.i.bf16 %v1146_v46, %v1145_v45  ;;  %v3636_v32 = vld [vmem:[%s5328_s29 + $0x80] sm:$0x1]  ;;  %v3610_v43 = vld [vmem:[%s5328_s29 + $0x18] sm:$0xe]  ;;  %v5742_v49 = vld [vmem:[%s5328_s29 + $0x10] ss:$12 sps:$4 sm:$0xff]  }
  0xdb   : > { %4391 = vrot.lane.b32.xlu0 %v4390_v36, %s5077_s27  ;;  %v1502_v22 = vrot.slane %v1387_v6, 1  ;;  %v5702_v26 = vsel %vm517_vm0, %v1494_v33, %v1495_v62  ;;  %v1454_v52 = vrot.slane %v1358_v54, 1  ;;  %v1455_v29 = vrot.slane %v1359_v59, 1  ;;  %v3609_v36 = vld [vmem:[%s5328_s29 + $0x14] sm:$0x1] }
  0xdc   : > { %v1363_v31 = vunpack.c.l.bf16 %v3564_v7  ;;  %v5709_v51 = vsel %vm517_vm0, %v1495_v62, %v1497_v1  ;;  %v1457_v27 = vrot.slane %v1360_v5, 1  ;;  %v1735_v10 = vunpack.c.l.bf16 %v3631_v37  ;;  %v3612_v33 = vld [vmem:[%s5328_s29 + $0x20] sm:$0x1] }
  0xdd   : > { %4406 = vrot.lane.b32.xlu1 %v5620_v34, %s5077_s27  ;;  %v5713_v35 = vsel %vm517_vm0, %v5441_v11, %v1502_v22  ;;  %v1459_v3 = vrot.slane %v5686_v16, 1  ;;  %v5721_v34 = vrot.slane %v5688_v18, 1  ;;  %v1736_v17 = vunpack.c.h.bf16 %v5699_v12 }
  0xde   : > { %v4475_v0 = vpack.i.bf16 %v5713_v35, %v5450_v23  ;;  %v1462_v11 = vrot.slane %v1363_v31, 1  ;;  %v1737_v20 = vunpack.c.l.bf16 %v3633_v38  ;;  %v1847_v28 = vrot.slane %v1735_v10, 2 }
  0xdf   : > { %4401 = vrot.lane.b32.xlu0 %v5649_v30, %s5077_s27  ;;  %v1711_v41 = vunpack.c.l.bf16 %v3607_v50  ;;  %v5728_v42 = vsel %vm517_vm0, %v1454_v52, %v1455_v29  ;;  %v1848_v57 = vrot.slane %v1736_v17, 2  ;;  %v1712_v63 = vunpack.c.l.bf16 %v3608_v15 }
  0xe0   : > { %v1713_v24 = vunpack.c.l.bf16 %v3609_v36  ;;  %v5735_v48 = vsel %vm517_vm0, %v1455_v29, %v1457_v27  ;;  %v1850_v30 = vrot.slane %v1737_v20, 2  ;;  %v1738_v44 = vunpack.c.l.bf16 %v3634_v40  ;;  %v3811_v29 = vld [vmem:[%s5328_s29] sm:$0xff]  }
  0xe1   : > { %4416 = vrot.lane.b32.xlu1 %v5634_v58, %s5077_s27  ;;  %v1807_v56 = vrot.slane %v1711_v41, 2  ;;  %v5739_v45 = vsel %vm517_vm0, %v1459_v3, %v5721_v34  ;;  %v1808_v46 = vrot.slane %v1712_v63, 2  ;;  %v1739_v55 = vunpack.c.h.bf16 %v3608_v15  ;;  %v5777_v3 = vld [vmem:[%s5328_s29 + $0x84] sm:$0xff]  }
  0xe2   : > { %v1810_v47 = vrot.slane %v1713_v24, 2  ;;  %v5748_v58 = vsel %vm517_vm0, %v5721_v34, %v1462_v11  ;;  %v5751_v54 = vsel %vm871_vm1, %v1847_v28, %v1848_v57  ;;  %v1740_v59 = vunpack.c.l.bf16 %v3636_v32  ;;  %v5789_v20 = vld [vmem:[%s5328_s29 + $0x24] sm:$0xff]   ;;  %v4044_v24 = vld [vmem:[%s5328_s29 + $0x78] sm:$0xff]   ;;  %v3713_v32 = vld [vmem:[%s5328_s29 + $0x80] sm:$0x1] }
  0xe3   : > { %4411 = vrot.lane.b32.xlu0 %v4410_v53, %s5077_s27  ;;  %v1714_v62 = vunpack.c.l.bf16 %v3610_v43  ;;  %v5754_v1 = vsel %vm871_vm1, %v1848_v57, %v1850_v30  ;;  %v5757_v5 = vsel %vm871_vm1, %v1807_v56, %v1808_v46  ;;  %v1852_v6 = vrot.slane %v1738_v44, 2  ;;  %v5802_v63 = vld [vmem:[%s5328_s29 + $0x24] sm:$0xff]   ;;  %v3689_v44 = vld [vmem:[%s5328_s29 + $0x20] sm:$0x1] }
  0xe4   : > { %v1853_v7 = vrot.slane %v1739_v55, 2  ;;  %v5762_v53 = vsel %vm871_vm1, %v1808_v46, %v1810_v47  ;;  %v1855_v37 = vrot.slane %v1740_v59, 2  ;;  %v1715_v22 = vunpack.c.h.bf16 %v5742_v49  ;;  %v5816_v46 = vld [vmem:[%s5328_s29 + $0x40] ss:$60 sps:$4 sm:$0xff]   ;;  %v4003_v47 = vld [vmem:[%s5328_s29 + $0x30] sm:$0xff]  }
  0xe5   : > { %4426 = vrot.lane.b32.xlu1 %v5655_v39, %s5077_s27  ;;  %v1716_v52 = vunpack.c.l.bf16 %v3612_v33  ;;  %v4465_v31 = vpack.i.bf16 %v5709_v51, %v5702_v26  ;;  %v4460_v38 = vpack.i.bf16 %v5735_v48, %v5728_v42  ;;  %v4470_v50 = vpack.i.bf16 %v5748_v58, %v5739_v45 }
  0xe6   : > { %v1812_v27 = vrot.slane %v1714_v62, 2  ;;  %v4485_v10 = vpack.i.bf16 %v5754_v1, %v5751_v54  ;;  %v1813_v15 = vrot.slane %v1715_v22, 2  ;;  %vm340_vm2 = vcmask 31744   ;;  %v5828_v22 = vld [vmem:[%s5328_s29 + $0x84] sm:$0xff]  }
  0xe7   : > { %4421 = vrot.lane.b32.xlu0 %v5682_v8, %s5077_s27  ;;  %v1815_v36 = vrot.slane %v1716_v52, 2  ;;  %v4480_v17 = vpack.i.bf16 %v5762_v53, %v5757_v5  ;;  %v5782_v40 = vsel %vm871_vm1, %v1852_v6, %v1853_v7  ;;  %345 = vst.msk [vmem:[#allocation2 + $0x20] sm:$0xff] %vm340_vm2, %v5686_v16  ;;  %346 = vst.msk [vmem:[#allocation2 + $0x28] sm:$0xff] %vm340_vm2, %v5688_v18  ;;  %v3812_v8 = vunpack.c.l.bf16 %v3811_v29  ;;  %v3716_v52 = vld [vmem:[%s5328_s29 + $0x8c] sm:$0x1] }
  0xe8   : > { %v3813_v11 = vunpack.c.h.bf16 %v3811_v29  ;;  %v5794_v28 = vsel %vm871_vm1, %v1853_v7, %v1855_v37  ;;  %v5797_v41 = vsel %vm871_vm1, %v1812_v27, %v1813_v15  ;;  %v4500_v57 = vpack.i.bf16 %v5688_v18, %v5686_v16 }
  0xe9   : > { %4436 = vrot.lane.b32.xlu1 %v5646_v4, %s5077_s27  ;;  %v5807_v43 = vsel %vm871_vm1, %v1813_v15, %v1815_v36  ;;  %341 = vst.msk [vmem:[#allocation2] sm:$0xff] %vm340_vm2, %v3812_v8  ;;  %v2070_v4 = vunpack.c.l.bf16 %v5638_v61  ;;  %v2071_v30 = vunpack.c.h.bf16 %v5777_v3  ;;  %v314_v56 = vunpack.c.l.bf16 %v5802_v63 }
  0xea   : > { %342 = vst.msk [vmem:[#allocation2 + $0x8] sm:$0xff] %vm340_vm2, %v3813_v11  ;;  %v2054_v55 = vunpack.c.l.bf16 %v5598_v9  ;;  %v315_v33 = vunpack.c.h.bf16 %v5789_v20  ;;  %v310_v59 = vunpack.c.l.bf16 %v5671_v14  ;;  %v311_v61 = vunpack.c.l.bf16 %v5742_v49 }
  0xeb   : > { %4431 = vrot.lane.b32.xlu0 %v5684_v13, %s5077_s27  ;;  %v2055_v62 = vunpack.c.h.bf16 %v5802_v63  ;;  %347 = vst.msk [vmem:[#allocation2 + $0x30] sm:$0xff] %vm340_vm2, %v314_v56  ;;  %v3988_v6 = vunpack.c.l.bf16 %v4044_v24  ;;  %v3989_v7 = vunpack.c.h.bf16 %v4044_v24  ;;  %v2319_v37 = vunpack.c.l.bf16 %v3713_v32  ;;  %v3692_v24 = vld [vmem:[%s5328_s29 + $0x2c] sm:$0x1] }
  0xec   : > { %348 = vst.msk [vmem:[#allocation2 + $0x38] sm:$0xff] %vm340_vm2, %v315_v33  ;;  %343 = vst.msk [vmem:[#allocation2 + $0x10] sm:$0xff] %vm340_vm2, %v310_v59  ;;  %v2295_v9 = vunpack.c.l.bf16 %v3689_v44  ;;  %v318_v14 = vunpack.c.l.bf16 %v5610_v25  ;;  %v319_v13 = vunpack.c.l.bf16 %v5816_v46  ;;  %v5838_v49 = vunpack.c.l.bf16 %v4003_v47  ;;  %v290_v44 = vld [vmem:[%s5328_s29 + $0x54] sm:$0xff]  }
  0xed   : > { %4446 = vrot.lane.b32.xlu1 %v5662_v2, %s5077_s27  ;;  %344 = vst.msk [vmem:[#allocation2 + $0x18] sm:$0xff] %vm340_vm2, %v311_v61  ;;  %v2429_v29 = vrot.slane %v3988_v6, 1  ;;  %v2430_v27 = vrot.slane %v3989_v7, 1  ;;  %v2432_v15 = vrot.slane %v2319_v37, 1  ;;  %v5840_v36 = vunpack.c.h.bf16 %v4003_v47  ;;  %v5843_v2 = vld [vmem:[%s5328_s29 + $0x24] sm:$0xff]   ;;  %361 = vst.msk [vmem:[#allocation2 + $0xa0] sm:$0xff] %vm340_vm2, %v3988_v6 }
  0xee   : > { %362 = vst.msk [vmem:[#allocation2 + $0xa8] sm:$0xff] %vm340_vm2, %v3989_v7  ;;  %v2392_v25 = vrot.slane %v2295_v9, 1  ;;  %351 = vst.msk [vmem:[#allocation2 + $0x50] sm:$0xff] %vm340_vm2, %v318_v14  ;;  %v2320_v8 = vunpack.c.l.bf16 %v5777_v3  ;;  %v2321_v11 = vunpack.c.h.bf16 %v5828_v22  ;;  %v2322_v63 = vunpack.c.l.bf16 %v3716_v52  ;;  %v5876_v6 = vld [vmem:[%s5328_s29 + $0x48] sm:$0xff]   ;;  %v3759_v52 = vld [vmem:[%s5328_s29 + $0x78] sm:$0xe] }
  0xef   : > { %4441 = vrot.lane.b32.xlu0 %v5692_v60, %s5077_s27  ;;  %352 = vst.msk [vmem:[#allocation2 + $0x58] sm:$0xff] %vm340_vm2, %v319_v13  ;;  %349 = vst.msk [vmem:[#allocation2 + $0x40] sm:$0xff] %vm340_vm2, %v5838_v49  ;;  %v4495_v32 = vpack.i.bf16 %v5794_v28, %v5782_v40  ;;  %v5859_v60 = vsel %vm517_vm0, %v2429_v29, %v2430_v27  ;;  %v5862_v56 = vsel %vm517_vm0, %v2430_v27, %v2432_v15  ;;  %v3735_v27 = vld [vmem:[%s5328_s29 + $0x18] sm:$0xe]  ;;  %v3736_v15 = vld [vmem:[%s5328_s29 + $0x1c] ss:$84 sps:$4 sm:$0xff]  }
  0xf0   : > { %350 = vst.msk [vmem:[#allocation2 + $0x48] sm:$0xff] %vm340_vm2, %v5840_v36  ;;  %v2296_v3 = vunpack.c.l.bf16 %v5789_v20  ;;  %v5872_v47 = vsel %vm517_vm0, %v5721_v34, %v2392_v25  ;;  %v2434_v33 = vrot.slane %v2320_v8, 1  ;;  %v2435_v59 = vrot.slane %v2321_v11, 1  ;;  %v3761_v34 = vld [vmem:[%s5328_s29 + $0x80] sm:$0x1] }
  0xf1   : > { %4456 = vrot.lane.b32.xlu1 %v5694_v19, %s5077_s27  ;;  %v2297_v61 = vunpack.c.h.bf16 %v5843_v2  ;;  %v4490_v7 = vpack.i.bf16 %v5807_v43, %v5797_v41  ;;  %v5880_v20 = vpack.i.bf16 %v2071_v30, %v2070_v4  ;;  %v5882_v37 = vpack.i.bf16 %v2055_v62, %v2054_v55  ;;  %v3737_v25 = vld [vmem:[%s5328_s29 + $0x20] sm:$0x1] }
  0xf2   : > { %v2298_v19 = vunpack.c.l.bf16 %v3692_v24  ;;  %v4525_v9 = vpack.i.bf16 %v5862_v56, %v5859_v60  ;;  %v2437_v14 = vrot.slane %v2322_v63, 1  ;;  %v322_v13 = vunpack.c.l.bf16 %v290_v44 }
  0xf3   : > { %4451 = vrot.lane.b32.xlu0 %v5696_v21, %s5077_s27  ;;  %v323_v29 = vunpack.c.h.bf16 %v290_v44  ;;  %v4520_v4 = vpack.i.bf16 %v5872_v47, %v5739_v45  ;;  %v2394_v30 = vrot.slane %v2296_v3, 1  ;;  %v3824_v55 = vunpack.c.l.bf16 %v5876_v6  ;;  %v4005_v3 = vld [vmem:[%s5328_s29 + $0x60] sm:$0xff]   ;;  %s4981_s27 = sshll.u32 %s5083_s23, 4  ;;  %s4982_s27 = int_to_ptr.vmem [resolvable:$false] %s4981_s27 }
  0xf4   : > { %v7165_v62 = vunpack.c.h.bf16 %v5876_v6  ;;  %v5902_v21 = vsel %vm517_vm0, %v2434_v33, %v2435_v59  ;;  %v2395_v8 = vrot.slane %v2297_v61, 1  ;;  %355 = vst.msk [vmem:[#allocation2 + $0x70] sm:$0xff] %vm340_vm2, %v322_v13  ;;  %v2670_v11 = vunpack.c.l.bf16 %v3759_v52  ;;  %p4984_p5 = scmp.lt.s32.totalorder %s7102_s5, %s4982_s27 }
  0xf5   : > { %4466 = vrot.lane.b32.xlu1 %v4465_v31, %s5078_s7  ;;  %356 = vst.msk [vmem:[#allocation2 + $0x78] sm:$0xff] %vm340_vm2, %v323_v29  ;;  %v2671_v63 = vunpack.c.h.bf16 %v5816_v46  ;;  %v2397_v24 = vrot.slane %v2298_v19, 1  ;;  %353 = vst.msk [vmem:[#allocation2 + $0x60] sm:$0xff] %vm340_vm2, %v3824_v55  ;;  %v2672_v26 = vunpack.c.l.bf16 %v3761_v34  ;;  %v2646_v51 = vunpack.c.l.bf16 %v3735_v27  ;;  %v3762_v19 = vld [vmem:[%s5328_s29 + $0x84] sm:$0xe] }
  0xf6   : > { %354 = vst.msk [vmem:[#allocation2 + $0x68] sm:$0xff] %vm340_vm2, %v7165_v62  ;;  %v2647_v31 = vunpack.c.l.bf16 %v3736_v15  ;;  %v5919_v46 = vsel %vm517_vm0, %v2435_v59, %v2437_v14  ;;  %v2782_v44 = vrot.slane %v2670_v11, 2  ;;  %v2648_v61 = vunpack.c.l.bf16 %v3737_v25  ;;  %v3763_v27 = vld [vmem:[%s5328_s29 + $0x84] sm:$0xff]   ;;  %v3764_v62 = vld [vmem:[%s5328_s29 + $0x8c] sm:$0x1] }
  0xf7   : > { %4461 = vrot.lane.b32.xlu0 %v4460_v38, %s5078_s7  ;;  %v2783_v33 = vrot.slane %v2671_v63, 2  ;;  %vm694_vm3 = vcmask 64544   ;;  %v2785_v52 = vrot.slane %v2672_v26, 2  ;;  %v2742_v34 = vrot.slane %v2646_v51, 2  ;;  %v3738_v14 = vld [vmem:[%s5328_s29 + $0x24] sm:$0xe] }
  0xf8   : > { %v2743_v13 = vrot.slane %v2647_v31, 2  ;;  %v326_v29 = vunpack.c.l.bf16 %v5699_v12  ;;  %v5930_v42 = vsel %vm517_vm0, %v2394_v30, %v2395_v8  ;;  %v2745_v48 = vrot.slane %v2648_v61, 2  ;;  %v5934_v25 = vld [vmem:[%s5328_s29 + $0x28] ss:$108 sps:$4 sm:$0xff]   ;;  %v3591_v61 = vld [vmem:[%s5328_s29 + $0x8c] sm:$0x1] }
  0xf9   : > { %4476 = vrot.lane.b32.xlu1 %v4475_v0, %s5078_s7  ;;  %v327_v38 = vunpack.c.h.bf16 %v3736_v15  ;;  %v3828_v59 = vunpack.c.l.bf16 %v4005_v3  ;;  %v5937_v11 = vsel %vm517_vm0, %v2395_v8, %v2397_v24  ;;  %v5940_v12 = vsel %vm871_vm1, %v2782_v44, %v2783_v33  ;;  %v3740_v0 = vld [vmem:[%s5328_s29 + $0x2c] sm:$0x1]  ;;  %v5957_v24 = vld [vmem:[%s5328_s29 + $0x34] ss:$84 sps:$4 sm:$0xff]  }
  0xfa   : > { %359 = vst.msk [vmem:[#allocation2 + $0x90] sm:$0xff] %vm340_vm2, %v326_v29  ;;  %v3829_v23 = vunpack.c.h.bf16 %v4005_v3  ;;  %v2673_v35 = vunpack.c.l.bf16 %v3762_v19  ;;  %v5949_v15 = vsel %vm871_vm1, %v2783_v33, %v2785_v52  ;;  %v5952_v30 = vsel %vm871_vm1, %v2742_v34, %v2743_v13  ;;  %v5965_v31 = vld [vmem:[%s5328_s29 + $0x88] ss:$12 sps:$4 sm:$0xff]  }
  0xfb   : > { %4471 = vrot.lane.b32.xlu0 %v4470_v50, %s5078_s7  ;;  %360 = vst.msk [vmem:[#allocation2 + $0x98] sm:$0xff] %vm340_vm2, %v327_v38  ;;  %357 = vst.msk [vmem:[#allocation2 + $0x80] sm:$0xff] %vm340_vm2, %v3828_v59  ;;  %v2674_v8 = vunpack.c.h.bf16 %v3763_v27  ;;  %v2675_v63 = vunpack.c.l.bf16 %v3764_v62  ;;  %v5960_v26 = vsel %vm871_vm1, %v2743_v13, %v2745_v48  ;;  %v2649_v50 = vunpack.c.l.bf16 %v3738_v14  ;;  %v5993_v48 = vld [vmem:[%s5328_s29 + $0x28] ss:$12 sps:$4 sm:$0xff]   ;;  %v3567_v38 = vld [vmem:[%s5328_s29 + $0x2c] sm:$0x1] }
  0xfc   : > { %358 = vst.msk [vmem:[#allocation2 + $0x88] sm:$0xff] %vm340_vm2, %v3829_v23  ;;  %v2787_v58 = vrot.slane %v2673_v35, 2  ;;  %v2650_v51 = vunpack.c.l.bf16 %v5934_v25  ;;  %v2651_v44 = vunpack.c.l.bf16 %v3740_v0  ;;  %v330_v33 = vunpack.c.l.bf16 %v5828_v22 }
  0xfd   : > { %4486 = vrot.lane.b32.xlu1 %v4485_v10, %s5079_s22  ;;  %v2788_v62 = vrot.slane %v2674_v8, 2  ;;  %v2790_v3 = vrot.slane %v2675_v63, 2  ;;  %v2747_v19 = vrot.slane %v2649_v50, 2  ;;  %v331_v34 = vunpack.c.h.bf16 %v5957_v24  ;;  %v302_v8 = vld [vmem:[%s5328_s29 + $0x9c] sm:$0xff]   ;;  %v4007_v63 = vld [vmem:[%s5328_s29 + $0x90] sm:$0xff]  }
  0xfe   : > { %v2748_v52 = vrot.slane %v2650_v51, 2  ;;  %v1388_v13 = vunpack.c.l.bf16 %v3763_v27  ;;  %v4535_v54 = vpack.i.bf16 %v5919_v46, %v5902_v21  ;;  %v4530_v1 = vpack.i.bf16 %v5937_v11, %v5930_v42  ;;  %363 = vst.msk [vmem:[#allocation2 + $0xb0] sm:$0xff] %vm340_vm2, %v330_v33  ;;  %v3616_v46 = vld [vmem:[%s5328_s29 + $0x30] sm:$0xe] }
  0xff   : > { %4481 = vrot.lane.b32.xlu0 %v4480_v17, %s5079_s22  ;;  %v4545_v10 = vpack.i.bf16 %v5949_v15, %v5940_v12  ;;  %v1389_v22 = vunpack.c.l.bf16 %v5965_v31  ;;  %v4540_v5 = vpack.i.bf16 %v5960_v26, %v5952_v30  ;;  %v5989_v53 = vsel %vm871_vm1, %v2787_v58, %v2788_v62  ;;  %364 = vst.msk [vmem:[#allocation2 + $0xb8] sm:$0xff] %vm340_vm2, %v331_v34 }
 0x100   : > { %v2750_v17 = vrot.slane %v2651_v44, 2  ;;  %v1390_v27 = vunpack.c.l.bf16 %v3591_v61  ;;  %v1504_v35 = vrot.slane %v1388_v13, 1  ;;  %v6003_v51 = vsel %vm871_vm1, %v2788_v62, %v2790_v3  ;;  %v3594_v3 = vld [vmem:[%s5328_s29 + $0x98] sm:$0x1] }
 0x101   : > { %v4232_v29 = vpop.permute.xlu1 %4231  ;;  %4496 = vrot.lane.b32.xlu1 %v4495_v32, %s5079_s22  ;;  %v4222_v23 = vpop.permute.xlu0 %4221  ;;  %v1505_v0 = vrot.slane %v1389_v22, 1  ;;  %v6006_v44 = vsel %vm871_vm1, %v2747_v19, %v2748_v52  ;;  %v1364_v28 = vunpack.c.l.bf16 %v5843_v2  ;;  %v1365_v32 = vunpack.c.l.bf16 %v5993_v48  ;;  %v3570_v22 = vld [vmem:[%s5328_s29 + $0x38] sm:$0x1] }
 0x102   : > { %v4234_v59 = vunpack.i.h.bf16 %v4232_v29  ;;  %v4233_v14 = vunpack.i.l.bf16 %v4232_v29  ;;  %v4224_v58 = vunpack.i.h.bf16 %v4222_v23  ;;  %v4223_v50 = vunpack.i.l.bf16 %v4222_v23 }
 0x103   : > { %4491 = vrot.lane.b32.xlu0 %v4490_v7, %s5079_s22  ;;  %v1507_v40 = vrot.slane %v1390_v27, 1  ;;  %v1366_v62 = vunpack.c.l.bf16 %v3567_v38  ;;  %v6020_v41 = vsel %vm871_vm1, %v2748_v52, %v2750_v17  ;;  %v334_v43 = vunpack.c.l.bf16 %v302_v8 }
 0x104   : > { %699 = vst.msk [vmem:[#allocation2 + $0x20] sm:$0xff] %vm694_vm3, %v4233_v14  ;;  %700 = vst.msk [vmem:[#allocation2 + $0x28] sm:$0xff] %vm694_vm3, %v4234_v59  ;;  %v335_v7 = vunpack.c.h.bf16 %v302_v8  ;;  %v6022_v61 = vunpack.c.l.bf16 %v4007_v63  ;;  %v6027_v34 = vsel %vm517_vm0, %v1504_v35, %v1505_v0  ;;  %v1464_v13 = vrot.slane %v1364_v28, 1  ;;  %v4008_v28 = vld [vmem:[%s5328_s29 + $0xa8] sm:$0xff]  }
 0x105   : > { %695 = vst.msk [vmem:[#allocation2] sm:$0xff] %vm694_vm3, %v4223_v50  ;;  %696 = vst.msk [vmem:[#allocation2 + $0x8] sm:$0xff] %vm694_vm3, %v4224_v58  ;;  %v4237_v33 = vpop.permute.xlu1 %4236  ;;  %4506 = vrot.lane.b32.xlu1 %v5655_v39, %s5080_s9  ;;  %v1465_v27 = vrot.slane %v1365_v32, 1  ;;  %v1467_v38 = vrot.slane %v1366_v62, 1  ;;  %v6032_v52 = vunpack.c.h.bf16 %v4007_v63  ;;  %v1393_v39 = vunpack.c.l.bf16 %v3594_v3  ;;  %v306_v63 = vld [vmem:[%s5328_s29 + $0xb4] sm:$0xff]  }
 0x106   : > { %v4239_v2 = vunpack.i.h.bf16 %v4237_v33  ;;  %v4238_v19 = vunpack.i.l.bf16 %v4237_v33  ;;  %367 = vst.msk [vmem:[#allocation2 + $0xd0] sm:$0xff] %vm340_vm2, %v334_v43  ;;  %368 = vst.msk [vmem:[#allocation2 + $0xd8] sm:$0xff] %vm340_vm2, %v335_v7  ;;  %v6043_v14 = vsel %vm517_vm0, %v1505_v0, %v1507_v40  ;;  %v1509_v23 = vrot.slane %v6022_v61, 1  ;;  %v3637_v43 = vld [vmem:[%s5328_s29 + $0x84] sm:$0xe] }
 0x107   : > { %v4227_v29 = vpop.permute.xlu0 %4226  ;;  %365 = vst.msk [vmem:[#allocation2 + $0xc0] sm:$0xff] %vm340_vm2, %v6022_v61  ;;  %4501 = vrot.lane.b32.xlu0 %v4500_v57, %s5080_s9  ;;  %v4555_v8 = vpack.i.bf16 %v6003_v51, %v5989_v53  ;;  %366 = vst.msk [vmem:[#allocation2 + $0xc8] sm:$0xff] %vm340_vm2, %v6032_v52  ;;  %v6051_v16 = vrot.slane %v6032_v52, 1  ;;  %v1512_v18 = vrot.slane %v1393_v39, 1  ;;  %v1369_v57 = vunpack.c.l.bf16 %v3570_v22  ;;  %v6075_v7 = vld [vmem:[%s5328_s29 + $0x88] ss:$24 sps:$4 sm:$0xff]  }
 0x108   : > { %701 = vst.msk [vmem:[#allocation2 + $0x30] sm:$0xff] %vm694_vm3, %v4238_v19  ;;  %702 = vst.msk [vmem:[#allocation2 + $0x38] sm:$0xff] %vm694_vm3, %v4239_v2  ;;  %v4229_v17 = vunpack.i.h.bf16 %v4227_v29  ;;  %v4228_v59 = vunpack.i.l.bf16 %v4227_v29  ;;  %v4550_v50 = vpack.i.bf16 %v6020_v41, %v6006_v44  ;;  %v1469_v40 = vrot.slane %v5838_v49, 1  ;;  %v3639_v29 = vld [vmem:[%s5328_s29 + $0x8c] sm:$0x1] }
 0x109   : > { %v4247_v35 = vpop.permute.xlu1 %4246  ;;  %4516 = vrot.lane.b32.xlu1 %v5880_v20, %s5080_s9  ;;  %v4565_v62 = vpack.i.bf16 %v6043_v14, %v6027_v34  ;;  %v6065_v20 = vsel %vm517_vm0, %v1464_v13, %v1465_v27  ;;  %v6068_v3 = vsel %vm517_vm0, %v1465_v27, %v1467_v38  ;;  %v6071_v33 = vrot.slane %v5840_v36, 1  ;;  %v3613_v27 = vld [vmem:[%s5328_s29 + $0x24] sm:$0xe] }
 0x10a   : > { %697 = vst.msk [vmem:[#allocation2 + $0x10] sm:$0xff] %vm694_vm3, %v4228_v59  ;;  %698 = vst.msk [vmem:[#allocation2 + $0x18] sm:$0xff] %vm694_vm3, %v4229_v17  ;;  %v4249_v0 = vunpack.i.h.bf16 %v4247_v35  ;;  %v4248_v58 = vunpack.i.l.bf16 %v4247_v35  ;;  %v6083_v13 = vsel %vm517_vm0, %v1509_v23, %v6051_v16  ;;  %v338_v22 = vunpack.c.l.bf16 %v306_v63  ;;  %v6094_v59 = vld [vmem:[%s5328_s29 + $0x28] ss:$24 sps:$4 sm:$0xff]   ;;  %v3615_v35 = vld [vmem:[%s5328_s29 + $0x2c] sm:$0x1] }
 0x10b   : > { %v4242_v32 = vpop.permute.xlu0 %4241  ;;  %4511 = vrot.lane.b32.xlu0 %v5882_v37, %s5080_s9  ;;  %v6089_v38 = vsel %vm517_vm0, %v6051_v16, %v1512_v18  ;;  %v1472_v39 = vrot.slane %v1369_v57, 1  ;;  %v339_v17 = vunpack.c.h.bf16 %v306_v63  ;;  %v6091_v37 = vunpack.c.l.bf16 %v4008_v28 }
 0x10c   : > { %705 = vst.msk [vmem:[#allocation2 + $0x50] sm:$0xff] %vm694_vm3, %v4248_v58  ;;  %706 = vst.msk [vmem:[#allocation2 + $0x58] sm:$0xff] %vm694_vm3, %v4249_v0  ;;  %v4244_v2 = vunpack.i.h.bf16 %v4242_v32  ;;  %v4243_v19 = vunpack.i.l.bf16 %v4242_v32  ;;  %v6105_v18 = vsel %vm517_vm0, %v1469_v40, %v6071_v33  ;;  %v6108_v57 = vunpack.c.h.bf16 %v4008_v28 }
 0x10d   : > { %4526 = vrot.lane.b32.xlu1 %v4525_v9, %s5081_s26  ;;  %v4257_v23 = vpop.permute.xlu1 %4256  ;;  %371 = vst.msk [vmem:[#allocation2 + $0xf0] sm:$0xff] %vm340_vm2, %v338_v22  ;;  %v1741_v63 = vunpack.c.l.bf16 %v3637_v43  ;;  %v1742_v0 = vunpack.c.l.bf16 %v6075_v7  ;;  %372 = vst.msk [vmem:[#allocation2 + $0xf8] sm:$0xff] %vm340_vm2, %v339_v17  ;;  %v1743_v56 = vunpack.c.l.bf16 %v3639_v29  ;;  %v1717_v9 = vunpack.c.l.bf16 %v3613_v27  ;;  %v4860_v22 = vld [vmem:[#allocation6] sm:$0xff]  }
 0x10e   : > { %703 = vst.msk [vmem:[#allocation2 + $0x40] sm:$0xff] %vm694_vm3, %v4243_v19  ;;  %704 = vst.msk [vmem:[#allocation2 + $0x48] sm:$0xff] %vm694_vm3, %v4244_v2  ;;  %v4259_v58 = vunpack.i.h.bf16 %v4257_v23  ;;  %v4258_v60 = vunpack.i.l.bf16 %v4257_v23  ;;  %v1718_v43 = vunpack.c.l.bf16 %v6094_v59  ;;  %v1719_v2 = vunpack.c.l.bf16 %v3615_v35  ;;  %v3640_v19 = vld [vmem:[%s5328_s29 + $0x90] sm:$0xe]  ;;  %4067 = vmatprep.subr.bf16.mxu0 %v4860_v22  ;;  %4105 = vmatprep.subr.bf16.mxu1 %v4860_v22 }
 0x10f   : > { %369 = vst.msk [vmem:[#allocation2 + $0xe0] sm:$0xff] %vm340_vm2, %v6091_v37  ;;  %4521 = vrot.lane.b32.xlu0 %v4520_v4, %s5081_s26  ;;  %v4252_v40 = vpop.permute.xlu0 %4251  ;;  %370 = vst.msk [vmem:[#allocation2 + $0xe8] sm:$0xff] %vm340_vm2, %v6108_v57  ;;  %v1857_v28 = vrot.slane %v1741_v63, 2  ;;  %v1858_v32 = vrot.slane %v1742_v0, 2  ;;  %v6126_v45 = vsel %vm517_vm0, %v6071_v33, %v1472_v39  ;;  %v1860_v47 = vrot.slane %v1743_v56, 2  ;;  %4068 = vmatpush3.bf16.msra.mxu0 %v4860_v22 }
 0x110   : > { %709 = vst.msk [vmem:[#allocation2 + $0x70] sm:$0xff] %vm694_vm3, %v4258_v60  ;;  %710 = vst.msk [vmem:[#allocation2 + $0x78] sm:$0xff] %vm694_vm3, %v4259_v58  ;;  %v4254_v29 = vunpack.i.h.bf16 %v4252_v40  ;;  %v4253_v27 = vunpack.i.l.bf16 %v4252_v40  ;;  %v1817_v35 = vrot.slane %v1717_v9, 2  ;;  %v1818_v23 = vrot.slane %v1718_v43, 2  ;;  %v3642_v0 = vld [vmem:[%s5328_s29 + $0x98] sm:$0x1]  ;;  %4108 = vmatpush3.bf16.msra.mxu1 %v4860_v22 }
 0x111   : > { %4536 = vrot.lane.b32.xlu1 %v4535_v54, %s5081_s26  ;;  %v4267_v4 = vpop.permute.xlu1 %4266  ;;  %v6133_v17 = vsel %vm871_vm1, %v1857_v28, %v1858_v32  ;;  %v1820_v63 = vrot.slane %v1719_v2, 2  ;;  %v6139_v60 = vsel %vm871_vm1, %v1858_v32, %v1860_v47  ;;  %v1744_v21 = vunpack.c.l.bf16 %v3640_v19  ;;  %v3618_v32 = vld [vmem:[%s5328_s29 + $0x38] sm:$0x1] }
 0x112   : > { %707 = vst.msk [vmem:[#allocation2 + $0x60] sm:$0xff] %vm694_vm3, %v4253_v27  ;;  %708 = vst.msk [vmem:[#allocation2 + $0x68] sm:$0xff] %vm694_vm3, %v4254_v29  ;;  %v4269_v39 = vunpack.i.h.bf16 %v4267_v4  ;;  %v4268_v58 = vunpack.i.l.bf16 %v4267_v4  ;;  %v4560_v56 = vpack.i.bf16 %v6068_v3, %v6065_v20  ;;  %v4575_v9 = vpack.i.bf16 %v6089_v38, %v6083_v13  ;;  %v4861_v43 = vld [vmem:[#allocation6 + $0x8] sm:$0xff]  }
 0x113   : > { %4531 = vrot.lane.b32.xlu0 %v4530_v1, %s5081_s26  ;;  %v4570_v40 = vpack.i.bf16 %v6126_v45, %v6105_v18  ;;  %v1745_v28 = vunpack.c.h.bf16 %v5934_v25  ;;  %v4585_v1 = vpack.i.bf16 %v6139_v60, %v6133_v17  ;;  %v1746_v2 = vunpack.c.l.bf16 %v3642_v0  ;;  %v3677_v27 = vld [vmem:[%s5328_s29 + $0x9c] sm:$0xff]   ;;  %4069 = vmatprep.subr.bf16.mxu0 %v4861_v43 }
 0x114   : > { %v4262_v54 = vpop.permute.xlu0 %4261  ;;  %713 = vst.msk [vmem:[#allocation2 + $0x90] sm:$0xff] %vm694_vm3, %v4268_v58  ;;  %714 = vst.msk [vmem:[#allocation2 + $0x98] sm:$0xff] %vm694_vm3, %v4269_v39  ;;  %v1862_v25 = vrot.slane %v1744_v21, 2  ;;  %v1720_v22 = vunpack.c.l.bf16 %v3616_v46  ;;  %v1721_v29 = vunpack.c.l.bf16 %v5957_v24  ;;  %v6167_v4 = vsel %vm871_vm1, %v1817_v35, %v1818_v23  ;;  %4106 = vmatprep.subr.bf16.mxu1 %v4861_v43  ;;  %4070 = vmatpush3.bf16.msra.mxu0 %v4861_v43 }
 0x115   : > { %v4264_v42 = vunpack.i.h.bf16 %v4262_v54  ;;  %v4263_v11 = vunpack.i.l.bf16 %v4262_v54  ;;  %4546 = vrot.lane.b32.xlu1 %v4545_v10, %s5082_s10  ;;  %v1863_v19 = vrot.slane %v1745_v28, 2  ;;  %v6170_v0 = vsel %vm871_vm1, %v1818_v23, %v1820_v63  ;;  %4109 = vmatpush3.bf16.msra.mxu1 %v4861_v43  ;;  %v3661_v54 = vld [vmem:[%s5328_s29 + $0x3c] sm:$0xff]  }
 0x116   : > { %v4277_v47 = vpop.permute.xlu1 %4276  ;;  %v1865_v12 = vrot.slane %v1746_v2, 2  ;;  %v1722_v15 = vunpack.c.l.bf16 %v3618_v32  ;;  %v1822_v35 = vrot.slane %v1720_v22, 2  ;;  %v1823_v58 = vrot.slane %v1721_v29, 2  ;;  %v3719_v32 = vld [vmem:[%s5328_s29 + $0x98] sm:$0x1]  ;;  %v3720_v29 = vld [vmem:[%s5328_s29 + $0x9c] sm:$0xff]  }
 0x117   : > { %711 = vst.msk [vmem:[#allocation2 + $0x80] sm:$0xff] %vm694_vm3, %v4263_v11  ;;  %712 = vst.msk [vmem:[#allocation2 + $0x88] sm:$0xff] %vm694_vm3, %v4264_v42  ;;  %4541 = vrot.lane.b32.xlu0 %v4540_v5, %s5082_s10  ;;  %v4279_v24 = vunpack.i.h.bf16 %v4277_v47  ;;  %v4278_v10 = vunpack.i.l.bf16 %v4277_v47  ;;  %v6177_v39 = vsel %vm871_vm1, %v1862_v25, %v1863_v19  ;;  %v2074_v46 = vunpack.c.l.bf16 %v3677_v27 }
 0x118   : > { %v4272_v23 = vpop.permute.xlu0 %4271  ;;  %v6180_v63 = vsel %vm871_vm1, %v1863_v19, %v1865_v12  ;;  %v1825_v21 = vrot.slane %v1722_v15, 2  ;;  %v4580_v5 = vpack.i.bf16 %v6170_v0, %v6167_v4  ;;  %v2075_v28 = vunpack.c.h.bf16 %v3677_v27  ;;  %v3696_v15 = vld [vmem:[%s5328_s29 + $0x3c] sm:$0xff]  }
 0x119   : > { %4556 = vrot.lane.b32.xlu1 %v4555_v8, %s5082_s10  ;;  %717 = vst.msk [vmem:[#allocation2 + $0xb0] sm:$0xff] %vm694_vm3, %v4278_v10  ;;  %718 = vst.msk [vmem:[#allocation2 + $0xb8] sm:$0xff] %vm694_vm3, %v4279_v24  ;;  %v4274_v30 = vunpack.i.h.bf16 %v4272_v23  ;;  %v4273_v26 = vunpack.i.l.bf16 %v4272_v23  ;;  %v6193_v42 = vsel %vm871_vm1, %v1822_v35, %v1823_v58  ;;  %v4605_v53 = vpack.i.bf16 %v6032_v52, %v6022_v61  ;;  %v3695_v8 = vld [vmem:[%s5328_s29 + $0x38] sm:$0x1] }
 0x11a   : > { %v4287_v43 = vpop.permute.xlu1 %4286  ;;  %v6196_v11 = vsel %vm871_vm1, %v1823_v58, %v1825_v21  ;;  %v4600_v51 = vpack.i.bf16 %v5840_v36, %v5838_v49  ;;  %vm1048_vm4 = vcmask 97344   ;;  %v4595_v19 = vpack.i.bf16 %v6180_v63, %v6177_v39 }
 0x11b   : > { %4551 = vrot.lane.b32.xlu0 %v4550_v50, %s5082_s10  ;;  %715 = vst.msk [vmem:[#allocation2 + $0xa0] sm:$0xff] %vm694_vm3, %v4273_v26  ;;  %716 = vst.msk [vmem:[#allocation2 + $0xa8] sm:$0xff] %vm694_vm3, %v4274_v30  ;;  %v4289_v2 = vunpack.i.h.bf16 %v4287_v43  ;;  %v4288_v25 = vunpack.i.l.bf16 %v4287_v43  ;;  %v2058_v22 = vunpack.c.l.bf16 %v3661_v54  ;;  %v4590_v47 = vpack.i.bf16 %v6196_v11, %v6193_v42  ;;  %v3722_v50 = vld [vmem:[%s5328_s29 + $0xa4] sm:$0x1]  ;;  %v3765_v43 = vld [vmem:[%s5328_s29 + $0x90] sm:$0xe] }
 0x11c   : > { %v6214_v12 = vpack.i.bf16 %v2075_v28, %v2074_v46  ;;  %v2059_v44 = vunpack.c.h.bf16 %v3661_v54  ;;  %v2325_v41 = vunpack.c.l.bf16 %v3719_v32  ;;  %v2301_v35 = vunpack.c.l.bf16 %v3695_v8  ;;  %v3698_v26 = vld [vmem:[%s5328_s29 + $0x44] sm:$0x1] }
 0x11d   : > { %v4282_v27 = vpop.permute.xlu0 %4281  ;;  %4566 = vrot.lane.b32.xlu1 %v4565_v62, %s5078_s7  ;;  %721 = vst.msk [vmem:[#allocation2 + $0xd0] sm:$0xff] %vm694_vm3, %v4288_v25  ;;  %722 = vst.msk [vmem:[#allocation2 + $0xd8] sm:$0xff] %vm694_vm3, %v4289_v2  ;;  %v2326_v23 = vunpack.c.l.bf16 %v3720_v29  ;;  %v2327_v62 = vunpack.c.h.bf16 %v3720_v29  ;;  %v2328_v58 = vunpack.c.l.bf16 %v3722_v50  ;;  %v2302_v21 = vunpack.c.l.bf16 %v3696_v15 }
 0x11e   : > { %v4284_v24 = vunpack.i.h.bf16 %v4282_v27  ;;  %v4283_v10 = vunpack.i.l.bf16 %v4282_v27  ;;  %v2402_v14 = vrot.slane %v2301_v35, 1  ;;  %v2442_v30 = vrot.slane %v2325_v41, 1  ;;  %v3767_v27 = vld [vmem:[%s5328_s29 + $0x98] sm:$0x1] }
 0x11f   : > { %4561 = vrot.lane.b32.xlu0 %v4560_v56, %s5078_s7  ;;  %v4297_v34 = vpop.permute.xlu1 %4296  ;;  %v6235_v3 = vpack.i.bf16 %v2059_v44, %v2058_v22  ;;  %v2444_v28 = vrot.slane %v2326_v23, 1  ;;  %v2445_v32 = vrot.slane %v2327_v62, 1  ;;  %v2303_v25 = vunpack.c.h.bf16 %v3696_v15 }
 0x120   : > { %719 = vst.msk [vmem:[#allocation2 + $0xc0] sm:$0xff] %vm694_vm3, %v4283_v10  ;;  %720 = vst.msk [vmem:[#allocation2 + $0xc8] sm:$0xff] %vm694_vm3, %v4284_v24  ;;  %v4299_v46 = vunpack.i.h.bf16 %v4297_v34  ;;  %v4298_v54 = vunpack.i.l.bf16 %v4297_v34  ;;  %v6239_v56 = vsel %vm517_vm0, %v6071_v33, %v2402_v14  ;;  %v2304_v22 = vunpack.c.l.bf16 %v3698_v26  ;;  %v3741_v10 = vld [vmem:[%s5328_s29 + $0x30] sm:$0xe]  ;;  %v3743_v34 = vld [vmem:[%s5328_s29 + $0x38] sm:$0x1] }
 0x121   : > { %4576 = vrot.lane.b32.xlu1 %v4575_v9, %s5078_s7  ;;  %v4292_v20 = vpop.permute.xlu0 %4291  ;;  %v4620_v38 = vpack.i.bf16 %v6239_v56, %v6105_v18  ;;  %v2447_v9 = vrot.slane %v2328_v58, 1  ;;  %v2404_v29 = vrot.slane %v2302_v21, 1  ;;  %v6255_v50 = vsel %vm517_vm0, %v6051_v16, %v2442_v30  ;;  %v3768_v21 = vld [vmem:[%s5328_s29 + $0x9c] sm:$0xe] }
 0x122   : > { %725 = vst.msk [vmem:[#allocation2 + $0xf0] sm:$0xff] %vm694_vm3, %v4298_v54  ;;  %726 = vst.msk [vmem:[#allocation2 + $0xf8] sm:$0xff] %vm694_vm3, %v4299_v46  ;;  %v4294_v8 = vunpack.i.h.bf16 %v4292_v20  ;;  %v4293_v2 = vunpack.i.l.bf16 %v4292_v20  ;;  %v2676_v24 = vunpack.c.l.bf16 %v3765_v43  ;;  %v2405_v15 = vrot.slane %v2303_v25, 1  ;;  %v3770_v43 = vld [vmem:[%s5328_s29 + $0xa4] sm:$0x1] }
 0x123   : > { %4571 = vrot.lane.b32.xlu0 %v4570_v40, %s5078_s7  ;;  %v6263_v40 = vsel %vm517_vm0, %v2444_v28, %v2445_v32  ;;  %v2407_v35 = vrot.slane %v2304_v22, 1  ;;  %v2677_v23 = vunpack.c.h.bf16 %v5965_v31  ;;  %v6270_v17 = vsel %vm517_vm0, %v2445_v32, %v2447_v9  ;;  %v3744_v22 = vld [vmem:[%s5328_s29 + $0x3c] sm:$0xe] }
 0x124   : > { %v4307_v33 = vpop.permute.xlu1 %4306  ;;  %723 = vst.msk [vmem:[#allocation2 + $0xe0] sm:$0xff] %vm694_vm3, %v4293_v2  ;;  %724 = vst.msk [vmem:[#allocation2 + $0xe8] sm:$0xff] %vm694_vm3, %v4294_v8  ;;  %v2678_v60 = vunpack.c.l.bf16 %v3767_v27  ;;  %v2792_v62 = vrot.slane %v2676_v24, 2  ;;  %v2652_v58 = vunpack.c.l.bf16 %v3741_v10  ;;  %v2653_v4 = vunpack.c.h.bf16 %v5993_v48  ;;  %v3746_v27 = vld [vmem:[%s5328_s29 + $0x44] sm:$0x1] }
 0x125   : > { %v4309_v44 = vunpack.i.h.bf16 %v4307_v33  ;;  %v4308_v41 = vunpack.i.l.bf16 %v4307_v33  ;;  %4586 = vrot.lane.b32.xlu1 %v4585_v1, %s5079_s22  ;;  %v6277_v1 = vsel %vm517_vm0, %v2404_v29, %v2405_v15  ;;  %v6280_v31 = vsel %vm517_vm0, %v2405_v15, %v2407_v35  ;;  %v6306_v29 = vld [vmem:[%s5328_s29 + $0x3c] sm:$0xff]  }
 0x126   : > { %v4302_v45 = vpop.permute.xlu0 %4301  ;;  %v2793_v54 = vrot.slane %v2677_v23, 2  ;;  %v2795_v30 = vrot.slane %v2678_v60, 2  ;;  %v2654_v0 = vunpack.c.l.bf16 %v3743_v34  ;;  %v4625_v28 = vpack.i.bf16 %v6255_v50, %v6083_v13  ;;  %v3597_v60 = vld [vmem:[%s5328_s29 + $0xa4] sm:$0x1] }
 0x127   : > { %1051 = vst.msk [vmem:[#allocation2 + $0x10] sm:$0xff] %vm1048_vm4, %v4308_v41  ;;  %1052 = vst.msk [vmem:[#allocation2 + $0x18] sm:$0xff] %vm1048_vm4, %v4309_v44  ;;  %v4304_v16 = vunpack.i.h.bf16 %v4302_v45  ;;  %v4303_v14 = vunpack.i.l.bf16 %v4302_v45  ;;  %4581 = vrot.lane.b32.xlu0 %v4580_v5, %s5079_s22  ;;  %v3769_v5 = vld [vmem:[%s5328_s29 + $0x9c] sm:$0xff]   ;;  %v2752_v32 = vrot.slane %v2652_v58, 2  ;;  %v4635_v48 = vpack.i.bf16 %v6270_v17, %v6263_v40 }
 0x128   : > { %v4317_v46 = vpop.permute.xlu1 %4316  ;;  %v4630_v2 = vpack.i.bf16 %v6280_v31, %v6277_v1  ;;  %v2753_v9 = vrot.slane %v2653_v4, 2  ;;  %v2679_v39 = vunpack.c.l.bf16 %v3768_v21  ;;  %v2755_v33 = vrot.slane %v2654_v0, 2  ;;  %v3573_v0 = vld [vmem:[%s5328_s29 + $0x44] sm:$0x1] }
 0x129   : > { %1049 = vst.msk [vmem:[#allocation2] sm:$0xff] %vm1048_vm4, %v4303_v14  ;;  %1050 = vst.msk [vmem:[#allocation2 + $0x8] sm:$0xff] %vm1048_vm4, %v4304_v16  ;;  %4596 = vrot.lane.b32.xlu1 %v4595_v19, %s5079_s22  ;;  %v4319_v26 = vunpack.i.h.bf16 %v4317_v46  ;;  %v4318_v20 = vunpack.i.l.bf16 %v4317_v46  ;;  %v2680_v25 = vunpack.c.h.bf16 %v3769_v5  ;;  %v6310_v41 = vsel %vm871_vm1, %v2792_v62, %v2793_v54 }
 0x12a   : > { %v4312_v8 = vpop.permute.xlu0 %4311  ;;  %v6313_v42 = vsel %vm871_vm1, %v2793_v54, %v2795_v30  ;;  %v2681_v11 = vunpack.c.l.bf16 %v3770_v43  ;;  %v6322_v45 = vsel %vm871_vm1, %v2752_v32, %v2753_v9  ;;  %v2655_v34 = vunpack.c.l.bf16 %v3744_v22 }
 0x12b   : > { %4591 = vrot.lane.b32.xlu0 %v4590_v47, %s5079_s22  ;;  %1055 = vst.msk [vmem:[#allocation2 + $0x30] sm:$0xff] %vm1048_vm4, %v4318_v20  ;;  %1056 = vst.msk [vmem:[#allocation2 + $0x38] sm:$0xff] %vm1048_vm4, %v4319_v26  ;;  %v4314_v63 = vunpack.i.h.bf16 %v4312_v8  ;;  %v4313_v19 = vunpack.i.l.bf16 %v4312_v8  ;;  %v2797_v47 = vrot.slane %v2679_v39, 2  ;;  %v2798_v15 = vrot.slane %v2680_v25, 2  ;;  %v3600_v25 = vld [vmem:[%s5328_s29 + $0xb0] sm:$0x1] }
 0x12c   : > { %v2800_v23 = vrot.slane %v2681_v11, 2  ;;  %v2656_v16 = vunpack.c.h.bf16 %v6306_v29  ;;  %v2657_v14 = vunpack.c.l.bf16 %v3746_v27  ;;  %v1394_v62 = vunpack.c.l.bf16 %v3769_v5 }
 0x12d   : > { %v4327_v44 = vpop.permute.xlu1 %4326  ;;  %1053 = vst.msk [vmem:[#allocation2 + $0x20] sm:$0xff] %vm1048_vm4, %v4313_v19  ;;  %1054 = vst.msk [vmem:[#allocation2 + $0x28] sm:$0xff] %vm1048_vm4, %v4314_v63  ;;  %4606 = vrot.lane.b32.xlu1 %v4605_v53, %s5080_s9  ;;  %v6333_v53 = vsel %vm871_vm1, %v2753_v9, %v2755_v33  ;;  %v6336_v58 = vsel %vm871_vm1, %v2797_v47, %v2798_v15  ;;  %v2757_v46 = vrot.slane %v2655_v34, 2  ;;  %v1395_v54 = vunpack.c.h.bf16 %v6075_v7 }
 0x12e   : > { %v4329_v24 = vunpack.i.h.bf16 %v4327_v44  ;;  %v4328_v10 = vunpack.i.l.bf16 %v4327_v44  ;;  %v6339_v21 = vsel %vm871_vm1, %v2798_v15, %v2800_v23  ;;  %v2758_v49 = vrot.slane %v2656_v16, 2  ;;  %v3643_v23 = vld [vmem:[%s5328_s29 + $0x9c] sm:$0xe] }
 0x12f   : > { %v4322_v35 = vpop.permute.xlu0 %4321  ;;  %4601 = vrot.lane.b32.xlu0 %v4600_v51, %s5080_s9  ;;  %v2760_v51 = vrot.slane %v2657_v14, 2  ;;  %v1396_v30 = vunpack.c.l.bf16 %v3597_v60  ;;  %v1514_v4 = vrot.slane %v1394_v62, 1  ;;  %v4645_v20 = vpack.i.bf16 %v6313_v42, %v6310_v41  ;;  %v3645_v62 = vld [vmem:[%s5328_s29 + $0xa4] sm:$0x1] }
 0x130   : > { %1059 = vst.msk [vmem:[#allocation2 + $0x50] sm:$0xff] %vm1048_vm4, %v4328_v10  ;;  %1060 = vst.msk [vmem:[#allocation2 + $0x58] sm:$0xff] %vm1048_vm4, %v4329_v24  ;;  %v4324_v61 = vunpack.i.h.bf16 %v4322_v35  ;;  %v4323_v52 = vunpack.i.l.bf16 %v4322_v35  ;;  %v4640_v32 = vpack.i.bf16 %v6333_v53, %v6322_v45  ;;  %v4655_v43 = vpack.i.bf16 %v6339_v21, %v6336_v58 }
 0x131   : > { %4616 = vrot.lane.b32.xlu1 %v6214_v12, %s5080_s9  ;;  %v4337_v36 = vpop.permute.xlu1 %4336  ;;  %v1515_v7 = vrot.slane %v1395_v54, 1  ;;  %v1517_v8 = vrot.slane %v1396_v30, 1  ;;  %v1370_v9 = vunpack.c.l.bf16 %v6306_v29  ;;  %v1371_v19 = vunpack.c.h.bf16 %v6094_v59  ;;  %v3576_v59 = vld [vmem:[%s5328_s29 + $0x50] sm:$0x1] }
 0x132   : > { %1057 = vst.msk [vmem:[#allocation2 + $0x40] sm:$0xff] %vm1048_vm4, %v4323_v52  ;;  %1058 = vst.msk [vmem:[#allocation2 + $0x48] sm:$0xff] %vm1048_vm4, %v4324_v61  ;;  %v4339_v5 = vunpack.i.h.bf16 %v4337_v36  ;;  %v4338_v26 = vunpack.i.l.bf16 %v4337_v36  ;;  %v1372_v33 = vunpack.c.l.bf16 %v3573_v0  ;;  %v6365_v22 = vsel %vm871_vm1, %v2757_v46, %v2758_v49 }
 0x133   : > { %4611 = vrot.lane.b32.xlu0 %v6235_v3, %s5080_s9  ;;  %v4332_v12 = vpop.permute.xlu0 %4331  ;;  %v6368_v29 = vsel %vm871_vm1, %v2758_v49, %v2760_v51  ;;  %v6371_v27 = vsel %vm517_vm0, %v1514_v4, %v1515_v7  ;;  %v1474_v44 = vrot.slane %v1370_v9, 1  ;;  %v6377_v50 = vsel %vm517_vm0, %v1515_v7, %v1517_v8  ;;  %v3619_v4 = vld [vmem:[%s5328_s29 + $0x3c] sm:$0xe] }
 0x134   : > { %1063 = vst.msk [vmem:[#allocation2 + $0x70] sm:$0xff] %vm1048_vm4, %v4338_v26  ;;  %1064 = vst.msk [vmem:[#allocation2 + $0x78] sm:$0xff] %vm1048_vm4, %v4339_v5  ;;  %v4334_v39 = vunpack.i.h.bf16 %v4332_v12  ;;  %v4333_v63 = vunpack.i.l.bf16 %v4332_v12  ;;  %v1477_v24 = vrot.slane %v1372_v33, 1  ;;  %v1399_v10 = vunpack.c.l.bf16 %v3600_v25  ;;  %v3646_v12 = vld [vmem:[%s5328_s29 + $0xa8] sm:$0xe] }
 0x135   : > { %4626 = vrot.lane.b32.xlu1 %v4625_v28, %s5081_s26  ;;  %v1475_v28 = vrot.slane %v1371_v19, 1  ;;  %v1519_v15 = vrot.slane %v6091_v37, 1  ;;  %v6385_v35 = vrot.slane %v6108_v57, 1  ;;  %v4650_v18 = vpack.i.bf16 %v6368_v29, %v6365_v22 }
 0x136   : > { %v4347_v3 = vpop.permute.xlu1 %4346  ;;  %1061 = vst.msk [vmem:[#allocation2 + $0x60] sm:$0xff] %vm1048_vm4, %v4333_v63  ;;  %1062 = vst.msk [vmem:[#allocation2 + $0x68] sm:$0xff] %vm1048_vm4, %v4334_v39  ;;  %v1375_v56 = vunpack.c.l.bf16 %v3576_v59  ;;  %v1522_v61 = vrot.slane %v1399_v10, 1  ;;  %v1479_v52 = vrot.slane %v3824_v55, 1  ;;  %v4665_v40 = vpack.i.bf16 %v6377_v50, %v6371_v27  ;;  %v3622_v10 = vld [vmem:[%s5328_s29 + $0x48] sm:$0xe] }
 0x137   : > { %v4349_v11 = vunpack.i.h.bf16 %v4347_v3  ;;  %v4348_v13 = vunpack.i.l.bf16 %v4347_v3  ;;  %4621 = vrot.lane.b32.xlu0 %v4620_v38, %s5081_s26  ;;  %v6393_v38 = vld [vmem:[%s5328_s29 + $0xa0] ss:$12 sps:$4 sm:$0xff]   ;;  %v6400_v14 = vsel %vm517_vm0, %v1474_v44, %v1475_v28  ;;  %v6403_v60 = vsel %vm517_vm0, %v1475_v28, %v1477_v24  ;;  %v3648_v44 = vld [vmem:[%s5328_s29 + $0xb0] sm:$0x1]  ;;  %v3681_v50 = vld [vmem:[%s5328_s29 + $0xb4] sm:$0xff]  }
 0x138   : > { %v4342_v47 = vpop.permute.xlu0 %4341  ;;  %v7181_v17 = vunpack.c.h.bf16 %v5876_v6  ;;  %v1482_v49 = vrot.slane %v1375_v56, 1  ;;  %v1747_v36 = vunpack.c.l.bf16 %v3643_v23  ;;  %v6420_v54 = vsel %vm517_vm0, %v1519_v15, %v6385_v35  ;;  %v6425_v6 = vld [vmem:[%s5328_s29 + $0x40] ss:$12 sps:$4 sm:$0xff]   ;;  %v3624_v15 = vld [vmem:[%s5328_s29 + $0x50] sm:$0x1] }
 0x139   : > { %1067 = vst.msk [vmem:[#allocation2 + $0x90] sm:$0xff] %vm1048_vm4, %v4348_v13  ;;  %1068 = vst.msk [vmem:[#allocation2 + $0x98] sm:$0xff] %vm1048_vm4, %v4349_v11  ;;  %v4344_v34 = vunpack.i.h.bf16 %v4342_v47  ;;  %v4343_v16 = vunpack.i.l.bf16 %v4342_v47  ;;  %4636 = vrot.lane.b32.xlu1 %v4635_v48, %s5081_s26  ;;  %v1748_v30 = vunpack.c.l.bf16 %v6393_v38  ;;  %v4660_v5 = vpack.i.bf16 %v6403_v60, %v6400_v14 }
 0x13a   : > { %v4357_v46 = vpop.permute.xlu1 %4356  ;;  %v1480_v48 = vrot.slane %v7181_v17, 1  ;;  %v6431_v26 = vsel %vm517_vm0, %v6385_v35, %v1522_v61  ;;  %v1749_v31 = vunpack.c.l.bf16 %v3645_v62  ;;  %v1867_v39 = vrot.slane %v1747_v36, 2 }
 0x13b   : > { %1065 = vst.msk [vmem:[#allocation2 + $0x80] sm:$0xff] %vm1048_vm4, %v4343_v16  ;;  %1066 = vst.msk [vmem:[#allocation2 + $0x88] sm:$0xff] %vm1048_vm4, %v4344_v34  ;;  %4631 = vrot.lane.b32.xlu0 %v4630_v2, %s5081_s26  ;;  %v4359_v55 = vunpack.i.h.bf16 %v4357_v46  ;;  %v4358_v51 = vunpack.i.l.bf16 %v4357_v46  ;;  %v3621_v2 = vld [vmem:[%s5328_s29 + $0x44] sm:$0x1]  ;;  %v1868_v19 = vrot.slane %v1748_v30, 2  ;;  %v1723_v25 = vunpack.c.l.bf16 %v3619_v4 }
 0x13c   : > { %v4352_v0 = vpop.permute.xlu0 %4351  ;;  %v6434_v1 = vsel %vm517_vm0, %v1479_v52, %v1480_v48  ;;  %v6445_v9 = vsel %vm517_vm0, %v1480_v48, %v1482_v49  ;;  %v1870_v33 = vrot.slane %v1749_v31, 2  ;;  %v1724_v3 = vunpack.c.l.bf16 %v6425_v6 }
 0x13d   : > { %1071 = vst.msk [vmem:[#allocation2 + $0xb0] sm:$0xff] %vm1048_vm4, %v4358_v51  ;;  %1072 = vst.msk [vmem:[#allocation2 + $0xb8] sm:$0xff] %vm1048_vm4, %v4359_v55  ;;  %v4354_v7 = vunpack.i.h.bf16 %v4352_v0  ;;  %v4353_v8 = vunpack.i.l.bf16 %v4352_v0  ;;  %4646 = vrot.lane.b32.xlu1 %v4645_v20, %s5082_s10  ;;  %vm1277_vm5 = vcmask 130144   ;;  %v1725_v20 = vunpack.c.l.bf16 %v3621_v2  ;;  %v4034_v55 = vld [vmem:[%s5328_s29 + $0x48] sm:$0xff]   ;;  %v3725_v2 = vld [vmem:[%s5328_s29 + $0xb0] sm:$0x1] }
 0x13e   : > { %v1750_v59 = vunpack.c.l.bf16 %v3646_v12  ;;  %v4675_v13 = vpack.i.bf16 %v6431_v26, %v6420_v54  ;;  %v4670_v28 = vpack.i.bf16 %v6445_v9, %v6434_v1  ;;  %v1827_v47 = vrot.slane %v1723_v25, 2 }
 0x13f   : > { %v4367_v63 = vpop.permute.xlu1 %4366  ;;  %1069 = vst.msk [vmem:[#allocation2 + $0xa0] sm:$0xff] %vm1048_vm4, %v4353_v8  ;;  %1070 = vst.msk [vmem:[#allocation2 + $0xa8] sm:$0xff] %vm1048_vm4, %v4354_v7  ;;  %4641 = vrot.lane.b32.xlu0 %v4640_v32, %s5082_s10  ;;  %v1828_v24 = vrot.slane %v1724_v3, 2  ;;  %v6468_v32 = vsel %vm871_vm1, %v1867_v39, %v1868_v19  ;;  %v1830_v23 = vrot.slane %v1725_v20, 2  ;;  %v6471_v34 = vsel %vm871_vm1, %v1868_v19, %v1870_v33  ;;  %v3665_v7 = vld [vmem:[%s5328_s29 + $0x54] sm:$0xff]  }
 0x140   : > { %v4369_v41 = vunpack.i.h.bf16 %v4367_v63  ;;  %v4368_v42 = vunpack.i.l.bf16 %v4367_v63  ;;  %v1751_v16 = vunpack.c.h.bf16 %v6393_v38  ;;  %v1752_v56 = vunpack.c.l.bf16 %v3648_v44  ;;  %v3701_v20 = vld [vmem:[%s5328_s29 + $0x50] sm:$0x1] }
 0x141   : > { %v4362_v11 = vpop.permute.xlu0 %4361  ;;  %4656 = vrot.lane.b32.xlu1 %v4655_v43, %s5082_s10  ;;  %v1872_v61 = vrot.slane %v1750_v59, 2  ;;  %v6481_v21 = vsel %vm871_vm1, %v1827_v47, %v1828_v24  ;;  %v1726_v43 = vunpack.c.l.bf16 %v3622_v10  ;;  %v1727_v52 = vunpack.c.h.bf16 %v6425_v6 }
 0x142   : > { %1075 = vst.msk [vmem:[#allocation2 + $0xd0] sm:$0xff] %vm1048_vm4, %v4368_v42  ;;  %1076 = vst.msk [vmem:[#allocation2 + $0xd8] sm:$0xff] %vm1048_vm4, %v4369_v41  ;;  %v4364_v45 = vunpack.i.h.bf16 %v4362_v11  ;;  %v4363_v53 = vunpack.i.l.bf16 %v4362_v11  ;;  %v1728_v38 = vunpack.c.l.bf16 %v3624_v15  ;;  %v6485_v17 = vsel %vm871_vm1, %v1828_v24, %v1830_v23 }
 0x143   : > { %4651 = vrot.lane.b32.xlu0 %v4650_v18, %s5082_s10  ;;  %v4377_v58 = vpop.permute.xlu1 %4376  ;;  %v1873_v48 = vrot.slane %v1751_v16, 2  ;;  %v1875_v22 = vrot.slane %v1752_v56, 2  ;;  %v1832_v29 = vrot.slane %v1726_v43, 2  ;;  %v1833_v18 = vrot.slane %v1727_v52, 2  ;;  %v3702_v56 = vld [vmem:[%s5328_s29 + $0x54] sm:$0xff]  }
 0x144   : > { %1073 = vst.msk [vmem:[#allocation2 + $0xc0] sm:$0xff] %vm1048_vm4, %v4363_v53  ;;  %1074 = vst.msk [vmem:[#allocation2 + $0xc8] sm:$0xff] %vm1048_vm4, %v4364_v45  ;;  %v4379_v62 = vunpack.i.h.bf16 %v4377_v58  ;;  %v4378_v46 = vunpack.i.l.bf16 %v4377_v58  ;;  %v1835_v36 = vrot.slane %v1728_v38, 2  ;;  %v4705_v27 = vpack.i.bf16 %v6108_v57, %v6091_v37  ;;  %v3728_v53 = vld [vmem:[%s5328_s29 + $0xbc] sm:$0x1] }
 0x145   : > { %v4372_v49 = vpop.permute.xlu0 %4371  ;;  %4666 = vrot.lane.b32.xlu1 %v4665_v40, %s5078_s7  ;;  %v6495_v4 = vsel %vm871_vm1, %v1872_v61, %v1873_v48  ;;  %v4685_v6 = vpack.i.bf16 %v6471_v34, %v6468_v32  ;;  %v1876_v0 = vsel %vm871_vm1, %v1873_v48, %v1875_v22  ;;  %v6508_v26 = vsel %vm871_vm1, %v1832_v29, %v1833_v18  ;;  %v3749_v37 = vld [vmem:[%s5328_s29 + $0x50] sm:$0x1] }
 0x146   : > { %1079 = vst.msk [vmem:[#allocation2 + $0xf0] sm:$0xff] %vm1048_vm4, %v4378_v46  ;;  %1080 = vst.msk [vmem:[#allocation2 + $0xf8] sm:$0xff] %vm1048_vm4, %v4379_v62  ;;  %v4374_v51 = vunpack.i.h.bf16 %v4372_v49  ;;  %v4373_v30 = vunpack.i.l.bf16 %v4372_v49  ;;  %v6511_v31 = vsel %vm871_vm1, %v1833_v18, %v1835_v36  ;;  %v4680_v60 = vpack.i.bf16 %v6485_v17, %v6481_v21  ;;  %v3704_v17 = vld [vmem:[%s5328_s29 + $0x5c] sm:$0x1]  ;;  %v3771_v36 = vld [vmem:[%s5328_s29 + $0xa8] sm:$0xe] }
 0x147   : > { %4661 = vrot.lane.b32.xlu0 %v4660_v5, %s5078_s7  ;;  %v4387_v40 = vpop.permute.xlu1 %4386  ;;  %v3948_v5 = vunpack.c.l.bf16 %v4034_v55  ;;  %v4695_v39 = vpack.i.bf16 %v1876_v0, %v6495_v4  ;;  %v4690_v63 = vpack.i.bf16 %v6511_v31, %v6508_v26  ;;  %v3949_v19 = vunpack.c.h.bf16 %v4034_v55 }
 0x148   : > { %1077 = vst.msk [vmem:[#allocation2 + $0xe0] sm:$0xff] %vm1048_vm4, %v4373_v30  ;;  %1078 = vst.msk [vmem:[#allocation2 + $0xe8] sm:$0xff] %vm1048_vm4, %v4374_v51  ;;  %v4389_v12 = vunpack.i.h.bf16 %v4387_v40  ;;  %v4388_v14 = vunpack.i.l.bf16 %v4387_v40  ;;  %v2078_v33 = vunpack.c.l.bf16 %v3681_v50  ;;  %v2079_v41 = vunpack.c.h.bf16 %v3681_v50  ;;  %v6562_v50 = vld [vmem:[%s5328_s29 + $0xac] ss:$12 sps:$4 sm:$0xff]  }
 0x149   : > { %v4382_v8 = vpop.permute.xlu0 %4381  ;;  %4676 = vrot.lane.b32.xlu1 %v4675_v13, %s5078_s7  ;;  %v2331_v42 = vunpack.c.l.bf16 %v3725_v2  ;;  %v2062_v59 = vunpack.c.l.bf16 %v3665_v7  ;;  %v2063_v11 = vunpack.c.h.bf16 %v3665_v7  ;;  %v3726_v13 = vld [vmem:[%s5328_s29 + $0xb4] sm:$0xff]   ;;  %v6533_v10 = vpack.i.bf16 %v3949_v19, %v3948_v5  ;;  %v3773_v2 = vld [vmem:[%s5328_s29 + $0xb0] sm:$0x1]  ;;  %v3747_v7 = vld [vmem:[%s5328_s29 + $0x48] sm:$0xe] }
 0x14a   : > { %1280 = vst.msk [vmem:[#allocation2 + $0x10] sm:$0xff] %vm1277_vm5, %v4388_v14  ;;  %1281 = vst.msk [vmem:[#allocation2 + $0x18] sm:$0xff] %vm1277_vm5, %v4389_v12  ;;  %v4384_v25 = vunpack.i.h.bf16 %v4382_v8  ;;  %v4383_v3 = vunpack.i.l.bf16 %v4382_v8  ;;  %v2307_v1 = vunpack.c.l.bf16 %v3701_v20  ;;  %v2409_v9 = vrot.slane %v3948_v5, 1  ;;  %v6576_v8 = vld [vmem:[%s5328_s29 + $0x4c] ss:$12 sps:$4 sm:$0xff]  }
 0x14b   : > { %4671 = vrot.lane.b32.xlu0 %v4670_v28, %s5078_s7  ;;  %v4397_v44 = vpop.permute.xlu1 %4396  ;;  %v2452_v15 = vrot.slane %v2331_v42, 1  ;;  %v2410_v28 = vrot.slane %v3949_v19, 1  ;;  %v2332_v16 = vunpack.c.l.bf16 %v3726_v13  ;;  %v6545_v58 = vpack.i.bf16 %v2079_v41, %v2078_v33 }
 0x14c   : > { %1278 = vst.msk [vmem:[#allocation2] sm:$0xff] %vm1277_vm5, %v4383_v3  ;;  %1279 = vst.msk [vmem:[#allocation2 + $0x8] sm:$0xff] %vm1277_vm5, %v4384_v25  ;;  %v4399_v47 = vunpack.i.h.bf16 %v4397_v44  ;;  %v4398_v24 = vunpack.i.l.bf16 %v4397_v44  ;;  %v2412_v43 = vrot.slane %v2307_v1, 1  ;;  %v2333_v52 = vunpack.c.h.bf16 %v3726_v13 }
 0x14d   : > { %v4392_v45 = vpop.permute.xlu0 %4391  ;;  %4686 = vrot.lane.b32.xlu1 %v4685_v6, %s5079_s22  ;;  %v6541_v34 = vsel %vm517_vm0, %v6385_v35, %v2452_v15  ;;  %v2334_v62 = vunpack.c.l.bf16 %v3728_v53  ;;  %v2454_v46 = vrot.slane %v2332_v16, 1  ;;  %v6553_v49 = vpack.i.bf16 %v2063_v11, %v2062_v59  ;;  %v3774_v15 = vld [vmem:[%s5328_s29 + $0xb4] sm:$0xe] }
 0x14e   : > { %1284 = vst.msk [vmem:[#allocation2 + $0x30] sm:$0xff] %vm1277_vm5, %v4398_v24  ;;  %1285 = vst.msk [vmem:[#allocation2 + $0x38] sm:$0xff] %vm1277_vm5, %v4399_v47  ;;  %v4394_v32 = vunpack.i.h.bf16 %v4392_v45  ;;  %v4393_v23 = vunpack.i.l.bf16 %v4392_v45  ;;  %v4725_v21 = vpack.i.bf16 %v6541_v34, %v6420_v54  ;;  %v2455_v22 = vrot.slane %v2333_v52, 1  ;;  %v6620_v52 = vld [vmem:[%s5328_s29 + $0x54] sm:$0xff]  }
 0x14f   : > { %4681 = vrot.lane.b32.xlu0 %v4680_v60, %s5079_s22  ;;  %v4407_v61 = vpop.permute.xlu1 %4406  ;;  %v2308_v29 = vunpack.c.l.bf16 %v3702_v56  ;;  %v2309_v18 = vunpack.c.h.bf16 %v3702_v56  ;;  %v6559_v30 = vsel %vm517_vm0, %v2409_v9, %v2410_v28  ;;  %v2457_v4 = vrot.slane %v2334_v62, 1 }
 0x150   : > { %1282 = vst.msk [vmem:[#allocation2 + $0x20] sm:$0xff] %vm1277_vm5, %v4393_v23  ;;  %1283 = vst.msk [vmem:[#allocation2 + $0x28] sm:$0xff] %vm1277_vm5, %v4394_v32  ;;  %v4409_v38 = vunpack.i.h.bf16 %v4407_v61  ;;  %v4408_v35 = vunpack.i.l.bf16 %v4407_v61  ;;  %v6566_v6 = vsel %vm517_vm0, %v2410_v28, %v2412_v43  ;;  %v2310_v0 = vunpack.c.l.bf16 %v3704_v17  ;;  %v6608_v32 = vld [vmem:[%s5328_s29 + $0xb4] sm:$0xff]   ;;  %v3776_v23 = vld [vmem:[%s5328_s29 + $0xbc] sm:$0x1] }
 0x151   : > { %v4402_v48 = vpop.permute.xlu0 %4401  ;;  %4696 = vrot.lane.b32.xlu1 %v4695_v39, %s5079_s22  ;;  %v2414_v26 = vrot.slane %v2308_v29, 1  ;;  %v2415_v31 = vrot.slane %v2309_v18, 1  ;;  %v6572_v60 = vsel %vm517_vm0, %v2454_v46, %v2455_v22  ;;  %v2682_v5 = vunpack.c.l.bf16 %v3771_v36  ;;  %v3750_v43 = vld [vmem:[%s5328_s29 + $0x54] sm:$0xe]  ;;  %v3752_v36 = vld [vmem:[%s5328_s29 + $0x5c] sm:$0x1] }
 0x152   : > { %1288 = vst.msk [vmem:[#allocation2 + $0x50] sm:$0xff] %vm1277_vm5, %v4408_v35  ;;  %1289 = vst.msk [vmem:[#allocation2 + $0x58] sm:$0xff] %vm1277_vm5, %v4409_v38  ;;  %v4404_v55 = vunpack.i.h.bf16 %v4402_v48  ;;  %v4403_v51 = vunpack.i.l.bf16 %v4402_v48  ;;  %v2417_v33 = vrot.slane %v2310_v0, 1  ;;  %v2683_v25 = vunpack.c.l.bf16 %v6562_v50 }
 0x153   : > { %4691 = vrot.lane.b32.xlu0 %v4690_v63, %s5079_s22  ;;  %v4417_v40 = vpop.permute.xlu1 %4416  ;;  %v6583_v63 = vsel %vm517_vm0, %v2455_v22, %v2457_v4  ;;  %v6586_v19 = vsel %vm517_vm0, %v2414_v26, %v2415_v31  ;;  %v2684_v42 = vunpack.c.l.bf16 %v3773_v2  ;;  %v2802_v20 = vrot.slane %v2682_v5, 2 }
 0x154   : > { %1286 = vst.msk [vmem:[#allocation2 + $0x40] sm:$0xff] %vm1277_vm5, %v4403_v51  ;;  %1287 = vst.msk [vmem:[#allocation2 + $0x48] sm:$0xff] %vm1277_vm5, %v4404_v55  ;;  %v4419_v12 = vunpack.i.h.bf16 %v4417_v40  ;;  %v4418_v14 = vunpack.i.l.bf16 %v4417_v40  ;;  %v2803_v44 = vrot.slane %v2683_v25, 2  ;;  %v2658_v59 = vunpack.c.l.bf16 %v3747_v7 }
 0x155   : > { %v4412_v39 = vpop.permute.xlu0 %4411  ;;  %4706 = vrot.lane.b32.xlu1 %v4705_v27, %s5080_s9  ;;  %v6595_v27 = vsel %vm517_vm0, %v2415_v31, %v2417_v33  ;;  %v2659_v11 = vunpack.c.l.bf16 %v6576_v8  ;;  %v4720_v24 = vpack.i.bf16 %v6566_v6, %v6559_v30  ;;  %v4735_v1 = vpack.i.bf16 %v6583_v63, %v6572_v60 }
 0x156   : > { %1292 = vst.msk [vmem:[#allocation2 + $0x70] sm:$0xff] %vm1277_vm5, %v4418_v14  ;;  %1293 = vst.msk [vmem:[#allocation2 + $0x78] sm:$0xff] %vm1277_vm5, %v4419_v12  ;;  %v4414_v3 = vunpack.i.h.bf16 %v4412_v39  ;;  %v4413_v41 = vunpack.i.l.bf16 %v4412_v39  ;;  %v2660_v9 = vunpack.c.l.bf16 %v3749_v37  ;;  %v2762_v28 = vrot.slane %v2658_v59, 2  ;;  %v3603_v12 = vld [vmem:[%s5328_s29 + $0xbc] sm:$0x1] }
 0x157   : > { %4701 = vrot.lane.b32.xlu0 %v6533_v10, %s5080_s9  ;;  %v4427_v57 = vpop.permute.xlu1 %4426  ;;  %v2805_v10 = vrot.slane %v2684_v42, 2  ;;  %v2763_v53 = vrot.slane %v2659_v11, 2  ;;  %v4730_v61 = vpack.i.bf16 %v6595_v27, %v6586_v19  ;;  %v2685_v17 = vunpack.c.l.bf16 %v3774_v15  ;;  %v3579_v37 = vld [vmem:[%s5328_s29 + $0x5c] sm:$0x1] }
 0x158   : > { %1290 = vst.msk [vmem:[#allocation2 + $0x60] sm:$0xff] %vm1277_vm5, %v4413_v41  ;;  %1291 = vst.msk [vmem:[#allocation2 + $0x68] sm:$0xff] %vm1277_vm5, %v4414_v3  ;;  %v4429_v13 = vunpack.i.h.bf16 %v4427_v57  ;;  %v4428_v47 = vunpack.i.l.bf16 %v4427_v57  ;;  %v2765_v46 = vrot.slane %v2660_v9, 2  ;;  %v2686_v29 = vunpack.c.h.bf16 %v6608_v32 }
 0x159   : > { %v4422_v45 = vpop.permute.xlu0 %4421  ;;  %4716 = vrot.lane.b32.xlu1 %v6545_v58, %s5080_s9  ;;  %v6616_v58 = vsel %vm871_vm1, %v2802_v20, %v2803_v44  ;;  %v6625_v35 = vsel %vm871_vm1, %v2803_v44, %v2805_v10  ;;  %v6628_v62 = vsel %vm871_vm1, %v2762_v28, %v2763_v53  ;;  %v2687_v18 = vunpack.c.l.bf16 %v3776_v23  ;;  %v6667_v10 = vld [vmem:[%s5328_s29 + $0xc0] sm:$0xff]  }
 0x15a   : > { %1296 = vst.msk [vmem:[#allocation2 + $0x90] sm:$0xff] %vm1277_vm5, %v4428_v47  ;;  %1297 = vst.msk [vmem:[#allocation2 + $0x98] sm:$0xff] %vm1277_vm5, %v4429_v13  ;;  %v4424_v16 = vunpack.i.h.bf16 %v4422_v45  ;;  %v4423_v56 = vunpack.i.l.bf16 %v4422_v45  ;;  %v6639_v55 = vsel %vm871_vm1, %v2763_v53, %v2765_v46  ;;  %v2807_v51 = vrot.slane %v2685_v17, 2  ;;  %v3606_v53 = vld [vmem:[%s5328_s29 + $0xc8] sm:$0x1] }
 0x15b   : > { %4711 = vrot.lane.b32.xlu0 %v6553_v49, %s5080_s9  ;;  %v4437_v38 = vpop.permute.xlu1 %4436  ;;  %v2661_v30 = vunpack.c.l.bf16 %v3750_v43  ;;  %v2662_v4 = vunpack.c.h.bf16 %v6620_v52  ;;  %v4745_v0 = vpack.i.bf16 %v6625_v35, %v6616_v58  ;;  %v2808_v26 = vrot.slane %v2686_v29, 2 }
 0x15c   : > { %1294 = vst.msk [vmem:[#allocation2 + $0x80] sm:$0xff] %vm1277_vm5, %v4423_v56  ;;  %1295 = vst.msk [vmem:[#allocation2 + $0x88] sm:$0xff] %vm1277_vm5, %v4424_v16  ;;  %v4439_v48 = vunpack.i.h.bf16 %v4437_v38  ;;  %v4438_v22 = vunpack.i.l.bf16 %v4437_v38  ;;  %vm1630_vm6 = vcmask 162944   ;;  %v2810_v34 = vrot.slane %v2687_v18, 2 }
 0x15d   : > { %v4432_v49 = vpop.permute.xlu0 %4431  ;;  %4726 = vrot.lane.b32.xlu1 %v4725_v21, %s5081_s26  ;;  %v2663_v21 = vunpack.c.l.bf16 %v3752_v36  ;;  %v2767_v31 = vrot.slane %v2661_v30, 2  ;;  %v2768_v2 = vrot.slane %v2662_v4, 2  ;;  %v4740_v5 = vpack.i.bf16 %v6639_v55, %v6628_v62  ;;  %v3649_v55 = vld [vmem:[%s5328_s29 + $0xb4] sm:$0xe] }
 0x15e   : > { %1300 = vst.msk [vmem:[#allocation2 + $0xb0] sm:$0xff] %vm1277_vm5, %v4438_v22  ;;  %1301 = vst.msk [vmem:[#allocation2 + $0xb8] sm:$0xff] %vm1277_vm5, %v4439_v48  ;;  %v4434_v40 = vunpack.i.h.bf16 %v4432_v49  ;;  %v4433_v6 = vunpack.i.l.bf16 %v4432_v49  ;;  %v1400_v7 = vunpack.c.l.bf16 %v6608_v32  ;;  %v2809_v63 = vsel %vm871_vm1, %v2807_v51, %v2808_v26  ;;  %v3582_v48 = vld [vmem:[%s5328_s29 + $0x68] sm:$0x1] }
 0x15f   : > { %4721 = vrot.lane.b32.xlu0 %v4720_v24, %s5081_s26  ;;  %v4447_v54 = vpop.permute.xlu1 %4446  ;;  %v2811_v19 = vsel %vm871_vm1, %v2808_v26, %v2810_v34  ;;  %v2770_v33 = vrot.slane %v2663_v21, 2  ;;  %v1401_v25 = vunpack.c.h.bf16 %v6562_v50  ;;  %v2769_v42 = vsel %vm871_vm1, %v2767_v31, %v2768_v2  ;;  %v3651_v31 = vld [vmem:[%s5328_s29 + $0xbc] sm:$0x1] }
 0x160   : > { %1298 = vst.msk [vmem:[#allocation2 + $0xa0] sm:$0xff] %vm1277_vm5, %v4433_v6  ;;  %1299 = vst.msk [vmem:[#allocation2 + $0xa8] sm:$0xff] %vm1277_vm5, %v4434_v40  ;;  %v4449_v14 = vunpack.i.h.bf16 %v4447_v54  ;;  %v4448_v60 = vunpack.i.l.bf16 %v4447_v54  ;;  %v1402_v20 = vunpack.c.l.bf16 %v3603_v12  ;;  %v1524_v44 = vrot.slane %v1400_v7, 1  ;;  %v6699_v6 = vld [vmem:[%s5328_s29 + $0xb8] ss:$12 sps:$4 sm:$0xff]  }
 0x161   : > { %v4442_v39 = vpop.permute.xlu0 %4441  ;;  %4736 = vrot.lane.b32.xlu1 %v4735_v1, %s5081_s26  ;;  %v2771_v27 = vsel %vm871_vm1, %v2768_v2, %v2770_v33  ;;  %v1525_v59 = vrot.slane %v1401_v25, 1  ;;  %v1376_v50 = vunpack.c.l.bf16 %v6620_v52  ;;  %v4755_v47 = vpack.i.bf16 %v2811_v19, %v2809_v63 }
 0x162   : > { %1304 = vst.msk [vmem:[#allocation2 + $0xd0] sm:$0xff] %vm1277_vm5, %v4448_v60  ;;  %1305 = vst.msk [vmem:[#allocation2 + $0xd8] sm:$0xff] %vm1277_vm5, %v4449_v14  ;;  %v4444_v3 = vunpack.i.h.bf16 %v4442_v39  ;;  %v4443_v41 = vunpack.i.l.bf16 %v4442_v39  ;;  %v1527_v24 = vrot.slane %v1402_v20, 1  ;;  %v1377_v1 = vunpack.c.h.bf16 %v6576_v8  ;;  %v6725_v20 = vld [vmem:[%s5328_s29 + $0x58] ss:$12 sps:$4 sm:$0xff]  }
 0x163   : > { %4731 = vrot.lane.b32.xlu0 %v4730_v61, %s5081_s26  ;;  %v4457_v57 = vpop.permute.xlu1 %4456  ;;  %v1526_v45 = vsel %vm517_vm0, %v1524_v44, %v1525_v59  ;;  %v1378_v9 = vunpack.c.l.bf16 %v3579_v37  ;;  %v1484_v28 = vrot.slane %v1376_v50, 1  ;;  %v4750_v16 = vpack.i.bf16 %v2771_v27, %v2769_v42  ;;  %v6677_v61 = vld [vmem:[%s5328_s29 + $0x60] sm:$0xff]   ;;  %v3625_v42 = vld [vmem:[%s5328_s29 + $0x54] sm:$0xe]  ;;  %v3627_v37 = vld [vmem:[%s5328_s29 + $0x5c] sm:$0x1] }
 0x164   : > { %1302 = vst.msk [vmem:[#allocation2 + $0xc0] sm:$0xff] %vm1277_vm5, %v4443_v41  ;;  %1303 = vst.msk [vmem:[#allocation2 + $0xc8] sm:$0xff] %vm1277_vm5, %v4444_v3  ;;  %v4459_v11 = vunpack.i.h.bf16 %v4457_v57  ;;  %v4458_v13 = vunpack.i.l.bf16 %v4457_v57  ;;  %v1528_v56 = vsel %vm517_vm0, %v1525_v59, %v1527_v24  ;;  %v1485_v8 = vrot.slane %v1377_v1, 1 }
 0x165   : > { %v4452_v15 = vpop.permute.xlu0 %4451  ;;  %4746 = vrot.lane.b32.xlu1 %v4745_v0, %s5082_s10  ;;  %v4765_v43 = vpack.i.bf16 %v1528_v56, %v1526_v45  ;;  %v1487_v52 = vrot.slane %v1378_v9, 1  ;;  %vm1983_vm7 = vcmask 195744   ;;  %v3936_v38 = vunpack.c.l.bf16 %v6667_v10  ;;  %v3654_v56 = vld [vmem:[%s5328_s29 + $0xc8] sm:$0x1] }
 0x166   : > { %1308 = vst.msk [vmem:[#allocation2 + $0xf0] sm:$0xff] %vm1277_vm5, %v4458_v13  ;;  %1309 = vst.msk [vmem:[#allocation2 + $0xf8] sm:$0xff] %vm1277_vm5, %v4459_v11  ;;  %v4454_v32 = vunpack.i.h.bf16 %v4452_v15  ;;  %v4453_v23 = vunpack.i.l.bf16 %v4452_v15  ;;  %v3937_v46 = vunpack.c.h.bf16 %v6667_v10  ;;  %v1405_v17 = vunpack.c.l.bf16 %v3606_v53  ;;  %v3652_v53 = vld [vmem:[%s5328_s29 + $0xc0] sm:$0xe] }
 0x167   : > { %4741 = vrot.lane.b32.xlu0 %v4740_v5, %s5082_s10  ;;  %v4467_v58 = vpop.permute.xlu1 %4466  ;;  %v1486_v29 = vsel %vm517_vm0, %v1484_v28, %v1485_v8  ;;  %v1488_v18 = vsel %vm517_vm0, %v1485_v8, %v1487_v52  ;;  %v1529_v36 = vrot.slane %v3936_v38, 1  ;;  %v3920_v49 = vunpack.c.l.bf16 %v6677_v61 }
 0x168   : > { %1306 = vst.msk [vmem:[#allocation2 + $0xe0] sm:$0xff] %vm1277_vm5, %v4453_v23  ;;  %1307 = vst.msk [vmem:[#allocation2 + $0xe8] sm:$0xff] %vm1277_vm5, %v4454_v32  ;;  %v4469_v35 = vunpack.i.h.bf16 %v4467_v58  ;;  %v4468_v62 = vunpack.i.l.bf16 %v4467_v58  ;;  %v4760_v4 = vpack.i.bf16 %v1488_v18, %v1486_v29  ;;  %v6696_v40 = vrot.slane %v3937_v46, 1  ;;  %v3628_v58 = vld [vmem:[%s5328_s29 + $0x60] sm:$0xe] }
 0x169   : > { %v4462_v22 = vpop.permute.xlu0 %4461  ;;  %4756 = vrot.lane.b32.xlu1 %v4755_v47, %s5082_s10  ;;  %v1532_v26 = vrot.slane %v1405_v17, 1  ;;  %v3921_v54 = vunpack.c.h.bf16 %v6677_v61  ;;  %v1381_v34 = vunpack.c.l.bf16 %v3582_v48  ;;  %v1489_v21 = vrot.slane %v3920_v49, 1  ;;  %v3630_v18 = vld [vmem:[%s5328_s29 + $0x68] sm:$0x1] }
 0x16a   : > { %1647 = vst.msk [vmem:[#allocation2 + $0x80] sm:$0xff] %vm1630_vm6, %v4468_v62  ;;  %1648 = vst.msk [vmem:[#allocation2 + $0x88] sm:$0xff] %vm1630_vm6, %v4469_v35  ;;  %v4464_v51 = vunpack.i.h.bf16 %v4462_v22  ;;  %v4463_v30 = vunpack.i.l.bf16 %v4462_v22  ;;  %v6710_v14 = vsel %vm517_vm0, %v1529_v36, %v6696_v40  ;;  %v1753_v60 = vunpack.c.l.bf16 %v3649_v55 }
 0x16b   : > { %4751 = vrot.lane.b32.xlu0 %v4750_v16, %s5082_s10  ;;  %v4477_v0 = vpop.permute.xlu1 %4476  ;;  %v1533_v7 = vsel %vm517_vm0, %v6696_v40, %v1532_v26  ;;  %v6717_v39 = vrot.slane %v3921_v54, 1  ;;  %v1492_v63 = vrot.slane %v1381_v34, 1  ;;  %v1754_v19 = vunpack.c.l.bf16 %v6699_v6 }
 0x16c   : > { %1631 = vst.msk [vmem:[#allocation2] sm:$0xff] %vm1630_vm6, %v4463_v30  ;;  %1632 = vst.msk [vmem:[#allocation2 + $0x8] sm:$0xff] %vm1630_vm6, %v4464_v51  ;;  %v4479_v2 = vunpack.i.h.bf16 %v4477_v0  ;;  %v4478_v12 = vunpack.i.l.bf16 %v4477_v0  ;;  %v4775_v3 = vpack.i.bf16 %v1533_v7, %v6710_v14  ;;  %v1755_v41 = vunpack.c.l.bf16 %v3651_v31 }
 0x16d   : > { %v4472_v5 = vpop.permute.xlu0 %4471  ;;  %4766 = vrot.lane.b32.xlu1 %v4765_v43, %s5078_s7  ;;  %v6731_v27 = vsel %vm517_vm0, %v1489_v21, %v6717_v39  ;;  %v1493_v44 = vsel %vm517_vm0, %v6717_v39, %v1492_v63  ;;  %v1877_v59 = vrot.slane %v1753_v60, 2  ;;  %v1878_v50 = vrot.slane %v1754_v19, 2  ;;  %v3685_v19 = vld [vmem:[%s5328_s29 + $0xcc] sm:$0xff]  }
 0x16e   : > { %1649 = vst.msk [vmem:[#allocation2 + $0x90] sm:$0xff] %vm1630_vm6, %v4478_v12  ;;  %1650 = vst.msk [vmem:[#allocation2 + $0x98] sm:$0xff] %vm1630_vm6, %v4479_v2  ;;  %v4474_v33 = vunpack.i.h.bf16 %v4472_v5  ;;  %v4473_v25 = vunpack.i.l.bf16 %v4472_v5  ;;  %v4770_v47 = vpack.i.bf16 %v1493_v44, %v6731_v27  ;;  %v1880_v24 = vrot.slane %v1755_v41, 2 }
 0x16f   : > { %4761 = vrot.lane.b32.xlu0 %v4760_v4, %s5078_s7  ;;  %v4487_v57 = vpop.permute.xlu1 %4486  ;;  %v1879_v45 = vsel %vm871_vm1, %v1877_v59, %v1878_v50  ;;  %v1729_v1 = vunpack.c.l.bf16 %v3625_v42  ;;  %v1730_v9 = vunpack.c.l.bf16 %v6725_v20  ;;  %v1731_v28 = vunpack.c.l.bf16 %v3627_v37  ;;  %v3669_v59 = vld [vmem:[%s5328_s29 + $0x6c] sm:$0xff]  }
 0x170   : > { %1633 = vst.msk [vmem:[#allocation2 + $0x10] sm:$0xff] %vm1630_vm6, %v4473_v25  ;;  %1634 = vst.msk [vmem:[#allocation2 + $0x18] sm:$0xff] %vm1630_vm6, %v4474_v33  ;;  %v4489_v11 = vunpack.i.h.bf16 %v4487_v57  ;;  %v4488_v13 = vunpack.i.l.bf16 %v4487_v57  ;;  %v1881_v16 = vsel %vm871_vm1, %v1878_v50, %v1880_v24  ;;  %vm2212_vm8 = vcmask 228544   ;;  %v3731_v50 = vld [vmem:[%s5328_s29 + $0xc8] sm:$0x1] }
 0x171   : > { %v4482_v15 = vpop.permute.xlu0 %4481  ;;  %4776 = vrot.lane.b32.xlu1 %v4775_v3, %s5078_s7  ;;  %v4785_v8 = vpack.i.bf16 %v1881_v16, %v1879_v45  ;;  %v1837_v52 = vrot.slane %v1729_v1, 2  ;;  %v1838_v35 = vrot.slane %v1730_v9, 2  ;;  %v1840_v62 = vrot.slane %v1731_v28, 2  ;;  %v3732_v9 = vld [vmem:[%s5328_s29 + $0xcc] sm:$0xff]   ;;  %v3734_v16 = vld [vmem:[%s5328_s29 + $0xd4] sm:$0x1] }
 0x172   : > { %2000 = vst.msk [vmem:[#allocation2 + $0x80] sm:$0xff] %vm1983_vm7, %v4488_v13  ;;  %2001 = vst.msk [vmem:[#allocation2 + $0x88] sm:$0xff] %vm1983_vm7, %v4489_v11  ;;  %v4484_v32 = vunpack.i.h.bf16 %v4482_v15  ;;  %v4483_v23 = vunpack.i.l.bf16 %v4482_v15  ;;  %v1756_v22 = vunpack.c.l.bf16 %v3652_v53  ;;  %v1757_v29 = vunpack.c.h.bf16 %v6699_v6  ;;  %v3707_v11 = vld [vmem:[%s5328_s29 + $0x68] sm:$0x1] }
 0x173   : > { %4771 = vrot.lane.b32.xlu0 %v4770_v47, %s5078_s7  ;;  %v4497_v43 = vpop.permute.xlu1 %4496  ;;  %v1839_v55 = vsel %vm871_vm1, %v1837_v52, %v1838_v35  ;;  %v1841_v51 = vsel %vm871_vm1, %v1838_v35, %v1840_v62  ;;  %v1758_v30 = vunpack.c.l.bf16 %v3654_v56  ;;  %v1732_v4 = vunpack.c.l.bf16 %v3628_v58  ;;  %v3708_v58 = vld [vmem:[%s5328_s29 + $0x6c] sm:$0xff]   ;;  %s4983_s7 = scalar_lea.vmem %s4982_s27, 8192 }
 0x174   : > { %1984 = vst.msk [vmem:[#allocation2] sm:$0xff] %vm1983_vm7, %v4483_v23  ;;  %1985 = vst.msk [vmem:[#allocation2 + $0x8] sm:$0xff] %vm1983_vm7, %v4484_v32  ;;  %v4499_v17 = vunpack.i.h.bf16 %v4497_v43  ;;  %v4498_v48 = vunpack.i.l.bf16 %v4497_v43  ;;  %v4780_v34 = vpack.i.bf16 %v1841_v51, %v1839_v55  ;;  %v1882_v21 = vrot.slane %v1756_v22, 2 }
 0x175   : > { %v4492_v36 = vpop.permute.xlu0 %4491  ;;  %4786 = vrot.lane.b32.xlu1 %v4785_v8, %s5079_s22  ;;  %v1883_v31 = vrot.slane %v1757_v29, 2  ;;  %v1885_v2 = vrot.slane %v1758_v30, 2  ;;  %v1733_v12 = vunpack.c.h.bf16 %v6725_v20  ;;  %v1734_v60 = vunpack.c.l.bf16 %v3630_v18  ;;  %v3710_v18 = vld [vmem:[%s5328_s29 + $0x74] sm:$0x1] }
 0x176   : > { %2002 = vst.msk [vmem:[#allocation2 + $0x90] sm:$0xff] %vm1983_vm7, %v4498_v48  ;;  %2003 = vst.msk [vmem:[#allocation2 + $0x98] sm:$0xff] %vm1983_vm7, %v4499_v17  ;;  %v4494_v0 = vunpack.i.h.bf16 %v4492_v36  ;;  %v4493_v26 = vunpack.i.l.bf16 %v4492_v36  ;;  %v1842_v63 = vrot.slane %v1732_v4, 2  ;;  %v4805_v44 = vpack.i.bf16 %v3937_v46, %v3936_v38 }
 0x177   : > { %v4507_v6 = vpop.permute.xlu1 %4506  ;;  %4781 = vrot.lane.b32.xlu0 %v4780_v34, %s5079_s22  ;;  %v1884_v25 = vsel %vm871_vm1, %v1882_v21, %v1883_v31  ;;  %v1886_v3 = vsel %vm871_vm1, %v1883_v31, %v1885_v2  ;;  %v1843_v41 = vrot.slane %v1733_v12, 2  ;;  %v1845_v42 = vrot.slane %v1734_v60, 2  ;;  %v6803_v60 = vld [vmem:[%s5328_s29 + $0xc4] ss:$12 sps:$4 sm:$0xff]  }
 0x178   : > { %1986 = vst.msk [vmem:[#allocation2 + $0x10] sm:$0xff] %vm1983_vm7, %v4493_v26  ;;  %1987 = vst.msk [vmem:[#allocation2 + $0x18] sm:$0xff] %vm1983_vm7, %v4494_v0  ;;  %v4509_v5 = vunpack.i.h.bf16 %v4507_v6  ;;  %v4508_v7 = vunpack.i.l.bf16 %v4507_v6  ;;  %v4795_v57 = vpack.i.bf16 %v1886_v3, %v1884_v25  ;;  %v4800_v15 = vpack.i.bf16 %v3921_v54, %v3920_v49  ;;  %v3777_v0 = vld [vmem:[%s5328_s29 + $0xc0] sm:$0xe] }
 0x179   : > { %v4502_v33 = vpop.permute.xlu0 %4501  ;;  %v1844_v13 = vsel %vm871_vm1, %v1842_v63, %v1843_v41  ;;  %v1846_v47 = vsel %vm871_vm1, %v1843_v41, %v1845_v42  ;;  %v2082_v45 = vunpack.c.l.bf16 %v3685_v19  ;;  %v2083_v1 = vunpack.c.h.bf16 %v3685_v19 }
 0x17a   : > { %2229 = vst.msk [vmem:[#allocation2 + $0x80] sm:$0xff] %vm2212_vm8, %v4508_v7  ;;  %2230 = vst.msk [vmem:[#allocation2 + $0x88] sm:$0xff] %vm2212_vm8, %v4509_v5  ;;  %v4504_v20 = vunpack.i.h.bf16 %v4502_v33  ;;  %v4503_v37 = vunpack.i.l.bf16 %v4502_v33  ;;  %4796 = vrot.lane.b32.xlu1 %v4795_v57, %s5079_s22  ;;  %v4790_v10 = vpack.i.bf16 %v1846_v47, %v1844_v13  ;;  %v2066_v53 = vunpack.c.l.bf16 %v3669_v59 }
 0x17b   : > { %v4517_v24 = vpop.permute.xlu1 %4516  ;;  %v2067_v32 = vunpack.c.h.bf16 %v3669_v59  ;;  %v2337_v23 = vunpack.c.l.bf16 %v3731_v50  ;;  %v2313_v61 = vunpack.c.l.bf16 %v3707_v11  ;;  %vm2565_vm9 = vcmask 261344   ;;  %v6817_v59 = vld [vmem:[%s5328_s29 + $0x64] ss:$12 sps:$4 sm:$0xff]   ;;  %v3755_v50 = vld [vmem:[%s5328_s29 + $0x68] sm:$0x1] }
 0x17c   : > { %2213 = vst.msk [vmem:[#allocation2] sm:$0xff] %vm2212_vm8, %v4503_v37  ;;  %2214 = vst.msk [vmem:[#allocation2 + $0x8] sm:$0xff] %vm2212_vm8, %v4504_v20  ;;  %v4519_v38 = vunpack.i.h.bf16 %v4517_v24  ;;  %v4518_v46 = vunpack.i.l.bf16 %v4517_v24  ;;  %4791 = vrot.lane.b32.xlu0 %v4790_v10, %s5079_s22  ;;  %v4815_v56 = vpack.i.bf16 %v2083_v1, %v2082_v45  ;;  %vm2918_vm10 = vcmask 294144   ;;  %v3780_v45 = vld [vmem:[%s5328_s29 + $0xcc] sm:$0xe] }
 0x17d   : > { %v4512_v28 = vpop.permute.xlu0 %4511  ;;  %v4810_v8 = vpack.i.bf16 %v2067_v32, %v2066_v53  ;;  %v2462_v52 = vrot.slane %v2337_v23, 1  ;;  %v2422_v35 = vrot.slane %v2313_v61, 1  ;;  %v2338_v62 = vunpack.c.l.bf16 %v3732_v9 }
 0x17e   : > { %2231 = vst.msk [vmem:[#allocation2 + $0x90] sm:$0xff] %vm2212_vm8, %v4518_v46  ;;  %2232 = vst.msk [vmem:[#allocation2 + $0x98] sm:$0xff] %vm2212_vm8, %v4519_v38  ;;  %v4514_v49 = vunpack.i.h.bf16 %v4512_v28  ;;  %v4513_v54 = vunpack.i.l.bf16 %v4512_v28  ;;  %4806 = vrot.lane.b32.xlu1 %v4805_v44, %s5080_s9  ;;  %v2339_v22 = vunpack.c.h.bf16 %v3732_v9  ;;  %v2340_v29 = vunpack.c.l.bf16 %v3734_v16  ;;  %v3753_v44 = vld [vmem:[%s5328_s29 + $0x60] sm:$0xe] }
 0x17f   : > { %v4527_v43 = vpop.permute.xlu1 %4526  ;;  %v2463_v55 = vsel %vm517_vm0, %v6696_v40, %v2462_v52  ;;  %v2423_v51 = vsel %vm517_vm0, %v6717_v39, %v2422_v35  ;;  %v2464_v30 = vrot.slane %v2338_v62, 1  ;;  %v2314_v4 = vunpack.c.l.bf16 %v3708_v58 }
 0x180   : > { %2215 = vst.msk [vmem:[#allocation2 + $0x10] sm:$0xff] %vm2212_vm8, %v4513_v54  ;;  %2216 = vst.msk [vmem:[#allocation2 + $0x18] sm:$0xff] %vm2212_vm8, %v4514_v49  ;;  %v4529_v17 = vunpack.i.h.bf16 %v4527_v43  ;;  %v4528_v48 = vunpack.i.l.bf16 %v4527_v43  ;;  %4801 = vrot.lane.b32.xlu0 %v4800_v15, %s5080_s9  ;;  %v4825_v21 = vpack.i.bf16 %v2463_v55, %v6710_v14  ;;  %v4820_v40 = vpack.i.bf16 %v2423_v51, %v6731_v27  ;;  %v3779_v14 = vld [vmem:[%s5328_s29 + $0xc8] sm:$0x1]  ;;  %v3782_v54 = vld [vmem:[%s5328_s29 + $0xd4] sm:$0x1] }
 0x181   : > { %v4522_v36 = vpop.permute.xlu0 %4521  ;;  %v2465_v31 = vrot.slane %v2339_v22, 1  ;;  %v2467_v39 = vrot.slane %v2340_v29, 1  ;;  %v2315_v2 = vunpack.c.h.bf16 %v3708_v58  ;;  %v2316_v12 = vunpack.c.l.bf16 %v3710_v18  ;;  %v3756_v29 = vld [vmem:[%s5328_s29 + $0x6c] sm:$0xe]  ;;  %v3758_v18 = vld [vmem:[%s5328_s29 + $0x74] sm:$0x1] }
 0x182   : > { %2582 = vst.msk [vmem:[#allocation2 + $0x80] sm:$0xff] %vm2565_vm9, %v4528_v48  ;;  %2583 = vst.msk [vmem:[#allocation2 + $0x88] sm:$0xff] %vm2565_vm9, %v4529_v17  ;;  %v4524_v26 = vunpack.i.h.bf16 %v4522_v36  ;;  %v4523_v34 = vunpack.i.l.bf16 %v4522_v36  ;;  %4816 = vrot.lane.b32.xlu1 %v4815_v56, %s5080_s9  ;;  %v2424_v63 = vrot.slane %v2314_v4, 1  ;;  %v2688_v27 = vunpack.c.l.bf16 %v3777_v0  ;;  %v4862_v0 = vld [vmem:[#allocation6 + $0x10] ss:$0 sps:$4 sm:$0x33]  }
 0x183   : > { %v4537_v6 = vpop.permute.xlu1 %4536  ;;  %v2466_v33 = vsel %vm517_vm0, %v2464_v30, %v2465_v31  ;;  %v2468_v25 = vsel %vm517_vm0, %v2465_v31, %v2467_v39  ;;  %v2425_v3 = vrot.slane %v2315_v2, 1  ;;  %v2427_v41 = vrot.slane %v2316_v12, 1  ;;  %s4977_s29 = scalar_lea.vmem %s7102_s5, 4096 }
 0x184   : > { %2566 = vst.msk [vmem:[#allocation2] sm:$0xff] %vm2565_vm9, %v4523_v34  ;;  %2567 = vst.msk [vmem:[#allocation2 + $0x8] sm:$0xff] %vm2565_vm9, %v4524_v26  ;;  %v4539_v5 = vunpack.i.h.bf16 %v4537_v6  ;;  %v4538_v7 = vunpack.i.l.bf16 %v4537_v6  ;;  %4811 = vrot.lane.b32.xlu0 %v4810_v8, %s5080_s9  ;;  %v4835_v37 = vpack.i.bf16 %v2468_v25, %v2466_v33  ;;  %v2689_v57 = vunpack.c.l.bf16 %v6803_v60  ;;  %p4978_p13 = scmp.ne.s32.totalorder %s7102_s5, %s4977_s29  ;;  %p4985_p7 = scmp.lt.s32.totalorder %s4983_s7, %s4977_s29 }
 0x185   : > { %v4532_v19 = vpop.permute.xlu0 %4531  ;;  %v2426_v13 = vsel %vm517_vm0, %v2424_v63, %v2425_v3  ;;  %v2428_v47 = vsel %vm517_vm0, %v2425_v3, %v2427_v41  ;;  %v2690_v24 = vunpack.c.l.bf16 %v3779_v14  ;;  %v2812_v15 = vrot.slane %v2688_v27, 2 }
 0x186   : > { %2584 = vst.msk [vmem:[#allocation2 + $0x90] sm:$0xff] %vm2565_vm9, %v4538_v7  ;;  %2585 = vst.msk [vmem:[#allocation2 + $0x98] sm:$0xff] %vm2565_vm9, %v4539_v5  ;;  %v4534_v42 = vunpack.i.h.bf16 %v4532_v19  ;;  %v4533_v20 = vunpack.i.l.bf16 %v4532_v19  ;;  %4826 = vrot.lane.b32.xlu1 %v4825_v21, %s5081_s26  ;;  %v4830_v46 = vpack.i.bf16 %v2428_v47, %v2426_v13  ;;  %v2813_v1 = vrot.slane %v2689_v57, 2  ;;  %p4979_p6 = pnand %p4978_p13, %p5265_p10  ;;  %p4986_p9 = por %p4985_p7, %p4984_p5 }
 0x187   : > { %v4547_v11 = vpop.permute.xlu1 %4546  ;;  %v2815_v28 = vrot.slane %v2690_v24, 2  ;;  %v2664_v53 = vunpack.c.l.bf16 %v3753_v44  ;;  %v2665_v32 = vunpack.c.l.bf16 %v6817_v59  ;;  %v2666_v23 = vunpack.c.l.bf16 %v3755_v50 }
 0x188   : > { %2568 = vst.msk [vmem:[#allocation2 + $0x10] sm:$0xff] %vm2565_vm9, %v4533_v20  ;;  %2569 = vst.msk [vmem:[#allocation2 + $0x18] sm:$0xff] %vm2565_vm9, %v4534_v42  ;;  %v4549_v10 = vunpack.i.h.bf16 %v4547_v11  ;;  %v4548_v38 = vunpack.i.l.bf16 %v4547_v11  ;;  %4821 = vrot.lane.b32.xlu0 %v4820_v40, %s5081_s26  ;;  %v2814_v49 = vsel %vm871_vm1, %v2812_v15, %v2813_v1  ;;  %v2691_v56 = vunpack.c.l.bf16 %v3780_v45  ;;  %p4980_p3 = pneg %p4979_p6 }
 0x189   : > { %v4542_v9 = vpop.permute.xlu0 %4541  ;;  %v2816_v43 = vsel %vm871_vm1, %v2813_v1, %v2815_v28  ;;  %v2772_v8 = vrot.slane %v2664_v53, 2  ;;  %v2773_v52 = vrot.slane %v2665_v32, 2  ;;  %v2775_v35 = vrot.slane %v2666_v23, 2 }
 0x18a   : > { %2935 = vst.msk [vmem:[#allocation2 + $0x80] sm:$0xff] %vm2918_vm10, %v4548_v38  ;;  %2936 = vst.msk [vmem:[#allocation2 + $0x88] sm:$0xff] %vm2918_vm10, %v4549_v10  ;;  %v4544_v61 = vunpack.i.h.bf16 %v4542_v9  ;;  %v4543_v16 = vunpack.i.l.bf16 %v4542_v9  ;;  %4836 = vrot.lane.b32.xlu1 %v4835_v37, %s5081_s26  ;;  %v4845_v48 = vpack.i.bf16 %v2816_v43, %v2814_v49  ;;  %v2692_v22 = vunpack.c.h.bf16 %v6803_v60  ;;  %p4987_p0 = pnand %p4986_p9, %p4980_p3 }
 0x18b   : > { %v4557_v58 = vpop.permute.xlu1 %4556  ;;  %v2774_v55 = vsel %vm871_vm1, %v2772_v8, %v2773_v52  ;;  %v2776_v51 = vsel %vm871_vm1, %v2773_v52, %v2775_v35  ;;  %v2693_v30 = vunpack.c.l.bf16 %v3782_v54  ;;  %v2817_v4 = vrot.slane %v2691_v56, 2 }
 0x18c   : > { %2919 = vst.msk [vmem:[#allocation2] sm:$0xff] %vm2918_vm10, %v4543_v16  ;;  %2920 = vst.msk [vmem:[#allocation2 + $0x8] sm:$0xff] %vm2918_vm10, %v4544_v61  ;;  %v4559_v62 = vunpack.i.h.bf16 %v4557_v58  ;;  %v4558_v17 = vunpack.i.l.bf16 %v4557_v58  ;;  %4831 = vrot.lane.b32.xlu0 %v4830_v46, %s5081_s26  ;;  %v4840_v21 = vpack.i.bf16 %v2776_v51, %v2774_v55  ;;  %v2818_v40 = vrot.slane %v2692_v22, 2 }
 0x18d   : > { %v4552_v36 = vpop.permute.xlu0 %4551  ;;  %v2820_v31 = vrot.slane %v2693_v30, 2  ;;  %v2667_v39 = vunpack.c.l.bf16 %v3756_v29  ;;  %v2668_v2 = vunpack.c.h.bf16 %v6817_v59  ;;  %v2669_v12 = vunpack.c.l.bf16 %v3758_v18 }
 0x18e   : > { %2937 = vst.msk [vmem:[#allocation2 + $0x90] sm:$0xff] %vm2918_vm10, %v4558_v17  ;;  %2938 = vst.msk [vmem:[#allocation2 + $0x98] sm:$0xff] %vm2918_vm10, %v4559_v62  ;;  %v4554_v26 = vunpack.i.h.bf16 %v4552_v36  ;;  %v4553_v34 = vunpack.i.l.bf16 %v4552_v36  ;;  %4846 = vrot.lane.b32.xlu1 %v4845_v48, %s5082_s10  ;;  %v2819_v7 = vsel %vm871_vm1, %v2817_v4, %v2818_v40  ;;  %vm3068_vm11 = vcmask 1041408  }
 0x18f   : > { %v4567_v6 = vpop.permute.xlu1 %4566  ;;  %v2821_v14 = vsel %vm871_vm1, %v2818_v40, %v2820_v31  ;;  %v2777_v27 = vrot.slane %v2667_v39, 2  ;;  %v2778_v19 = vrot.slane %v2668_v2, 2  ;;  %v2780_v33 = vrot.slane %v2669_v12, 2  ;;  %4111 = vmatprep.subr.msk.bf16.mxu0 %vm3068_vm11, %v4862_v0  ;;  %4112 = vmatprep.subr.msk.bf16.mxu1 %vm3068_vm11, %v4862_v0 }
 0x190   : > { %2921 = vst.msk [vmem:[#allocation2 + $0x10] sm:$0xff] %vm2918_vm10, %v4553_v34  ;;  %2922 = vst.msk [vmem:[#allocation2 + $0x18] sm:$0xff] %vm2918_vm10, %v4554_v26  ;;  %v4569_v60 = vunpack.i.h.bf16 %v4567_v6  ;;  %v4568_v5 = vunpack.i.l.bf16 %v4567_v6  ;;  %4841 = vrot.lane.b32.xlu0 %v4840_v21, %s5082_s10  ;;  %v4855_v20 = vpack.i.bf16 %v2821_v14, %v2819_v7  ;;  %vm3019_vm12 = vcmask 293888  }
 0x191   : > { %v4562_v63 = vpop.permute.xlu0 %4561  ;;  %v2967_v25 = vld [vmem:[#allocation2 + $0x80] sm:$0xff]  ;;  %v2968_v3 = vld [vmem:[#allocation2 + $0x88] sm:$0xff]  ;;  %v2779_v37 = vsel %vm871_vm1, %v2777_v27, %v2778_v19  ;;  %v2781_v57 = vsel %vm871_vm1, %v2778_v19, %v2780_v33  ;;  %v3070_v13 = vsel %vm3068_vm11, %v4862_v0, 0 }
 0x192   : > { %1651 = vst.msk [vmem:[#allocation2 + $0xa0] sm:$0xff] %vm1630_vm6, %v4568_v5  ;;  %1652 = vst.msk [vmem:[#allocation2 + $0xa8] sm:$0xff] %vm1630_vm6, %v4569_v60  ;;  %v4564_v41 = vunpack.i.h.bf16 %v4562_v63  ;;  %v4563_v42 = vunpack.i.l.bf16 %v4562_v63  ;;  %v2991_v11 = vpack.c.bf16 %v2968_v3, %v2967_v25  ;;  %4856 = vrot.lane.b32.xlu1 %v4855_v20, %s5082_s10  ;;  %v4850_v47 = vpack.i.bf16 %v2781_v57, %v2779_v37 }
 0x193   : > { %v4577_v44 = vpop.permute.xlu1 %4576  ;;  %v2951_v59 = vld [vmem:[#allocation2] sm:$0xff]  ;;  %v2952_v50 = vld [vmem:[#allocation2 + $0x8] sm:$0xff]  ;;  %4072 = vmatpush3.bf16.msra.mxu0 %v3070_v13  ;;  %4110 = vmatpush3.bf16.msra.mxu1 %v3070_v13 }
 0x194   : > { %1635 = vst.msk [vmem:[#allocation2 + $0x20] sm:$0xff] %vm1630_vm6, %v4563_v42  ;;  %1636 = vst.msk [vmem:[#allocation2 + $0x28] sm:$0xff] %vm1630_vm6, %v4564_v41  ;;  %v4579_v24 = vunpack.i.h.bf16 %v4577_v44  ;;  %v4578_v15 = vunpack.i.l.bf16 %v4577_v44  ;;  %v2983_v45 = vpack.c.bf16 %v2952_v50, %v2951_v59  ;;  %4089 = vmatprep.mubr.msk.bf16.mxu1 %vm3019_vm12, %v2991_v11  ;;  %4851 = vrot.lane.b32.xlu0 %v4850_v47, %s5082_s10 }
 0x195   : > { %v4572_v10 = vpop.permute.xlu0 %4571  ;;  %v2969_v38 = vld [vmem:[#allocation2 + $0x90] sm:$0xff]  ;;  %v2970_v46 = vld [vmem:[#allocation2 + $0x98] sm:$0xff] }
 0x196   : > { %1653 = vst.msk [vmem:[#allocation2 + $0xb0] sm:$0xff] %vm1630_vm6, %v4578_v15  ;;  %1654 = vst.msk [vmem:[#allocation2 + $0xb8] sm:$0xff] %vm1630_vm6, %v4579_v24  ;;  %v4574_v1 = vunpack.i.h.bf16 %v4572_v10  ;;  %v4573_v9 = vunpack.i.l.bf16 %v4572_v10  ;;  %4073 = vmatprep.mubr.msk.bf16.mxu0 %vm3019_vm12, %v2983_v45  ;;  %v2992_v28 = vpack.c.bf16 %v2970_v46, %v2969_v38 }
 0x197   : > { %v4587_v53 = vpop.permute.xlu1 %4586  ;;  %v2953_v32 = vld [vmem:[#allocation2 + $0x10] sm:$0xff]  ;;  %v2954_v23 = vld [vmem:[#allocation2 + $0x18] sm:$0xff] }
 0x198   : > { %1637 = vst.msk [vmem:[#allocation2 + $0x30] sm:$0xff] %vm1630_vm6, %v4573_v9  ;;  %1638 = vst.msk [vmem:[#allocation2 + $0x38] sm:$0xff] %vm1630_vm6, %v4574_v1  ;;  %v4589_v61 = vunpack.i.h.bf16 %v4587_v53  ;;  %v4588_v16 = vunpack.i.l.bf16 %v4587_v53  ;;  %v2984_v49 = vpack.c.bf16 %v2954_v23, %v2953_v32  ;;  %4090 = vmatmul.mubr.msk.bf16.vlgmr.msra.gmra.mrb[0].mxu1 %vm3019_vm12, %v2992_v28 }
 0x199   : > { %v4582_v54 = vpop.permute.xlu0 %4581 }
 0x19a   : > { %2004 = vst.msk [vmem:[#allocation2 + $0xa0] sm:$0xff] %vm1983_vm7, %v4588_v16  ;;  %2005 = vst.msk [vmem:[#allocation2 + $0xa8] sm:$0xff] %vm1983_vm7, %v4589_v61  ;;  %v4584_v56 = vunpack.i.h.bf16 %v4582_v54  ;;  %v4583_v58 = vunpack.i.l.bf16 %v4582_v54  ;;  %4074 = vmatmul.mubr.msk.bf16.vlgmr.msra.gmra.mrb[0].mxu0 %vm3019_vm12, %v2984_v49 }
 0x19b   : > { %v4597_v43 = vpop.permute.xlu1 %4596 }
 0x19c   : > { %1988 = vst.msk [vmem:[#allocation2 + $0x20] sm:$0xff] %vm1983_vm7, %v4583_v58  ;;  %1989 = vst.msk [vmem:[#allocation2 + $0x28] sm:$0xff] %vm1983_vm7, %v4584_v56  ;;  %v4599_v8 = vunpack.i.h.bf16 %v4597_v43  ;;  %v4598_v52 = vunpack.i.l.bf16 %v4597_v43 }
 0x19d   : > { %v4592_v35 = vpop.permute.xlu0 %4591 }
 0x19e   : > { %2006 = vst.msk [vmem:[#allocation2 + $0xb0] sm:$0xff] %vm1983_vm7, %v4598_v52  ;;  %2007 = vst.msk [vmem:[#allocation2 + $0xb8] sm:$0xff] %vm1983_vm7, %v4599_v8  ;;  %v4594_v62 = vunpack.i.h.bf16 %v4592_v35  ;;  %v4593_v17 = vunpack.i.l.bf16 %v4592_v35 }
 0x19f   : > { %v4607_v48 = vpop.permute.xlu1 %4606 }
 0x1a0   : > { %1990 = vst.msk [vmem:[#allocation2 + $0x30] sm:$0xff] %vm1983_vm7, %v4593_v17  ;;  %1991 = vst.msk [vmem:[#allocation2 + $0x38] sm:$0xff] %vm1983_vm7, %v4594_v62  ;;  %v4609_v22 = vunpack.i.h.bf16 %v4607_v48  ;;  %v4608_v29 = vunpack.i.l.bf16 %v4607_v48 }
 0x1a1   : > { %v4602_v18 = vpop.permute.xlu0 %4601 }
 0x1a2   : > { %2233 = vst.msk [vmem:[#allocation2 + $0xa0] sm:$0xff] %vm2212_vm8, %v4608_v29  ;;  %2234 = vst.msk [vmem:[#allocation2 + $0xa8] sm:$0xff] %vm2212_vm8, %v4609_v22  ;;  %v4604_v36 = vunpack.i.h.bf16 %v4602_v18  ;;  %v4603_v55 = vunpack.i.l.bf16 %v4602_v18 }
 0x1a3   : > { %v4617_v51 = vpop.permute.xlu1 %4616 }
 0x1a4   : > { %2217 = vst.msk [vmem:[#allocation2 + $0x20] sm:$0xff] %vm2212_vm8, %v4603_v55  ;;  %2218 = vst.msk [vmem:[#allocation2 + $0x28] sm:$0xff] %vm2212_vm8, %v4604_v36  ;;  %v4619_v30 = vunpack.i.h.bf16 %v4617_v51  ;;  %v4618_v4 = vunpack.i.l.bf16 %v4617_v51 }
 0x1a5   : > { %v4612_v0 = vpop.permute.xlu0 %4611 }
 0x1a6   : > { %2235 = vst.msk [vmem:[#allocation2 + $0xb0] sm:$0xff] %vm2212_vm8, %v4618_v4  ;;  %2236 = vst.msk [vmem:[#allocation2 + $0xb8] sm:$0xff] %vm2212_vm8, %v4619_v30  ;;  %v4614_v26 = vunpack.i.h.bf16 %v4612_v0  ;;  %v4613_v34 = vunpack.i.l.bf16 %v4612_v0 }
 0x1a7   : > { %v4627_v21 = vpop.permute.xlu1 %4626 }
 0x1a8   : > { %2219 = vst.msk [vmem:[#allocation2 + $0x30] sm:$0xff] %vm2212_vm8, %v4613_v34  ;;  %2220 = vst.msk [vmem:[#allocation2 + $0x38] sm:$0xff] %vm2212_vm8, %v4614_v26  ;;  %v4629_v40 = vunpack.i.h.bf16 %v4627_v21  ;;  %v4628_v6 = vunpack.i.l.bf16 %v4627_v21 }
 0x1a9   : > { %v4622_v31 = vpop.permute.xlu0 %4621 }
 0x1aa   : > { %2586 = vst.msk [vmem:[#allocation2 + $0xa0] sm:$0xff] %vm2565_vm9, %v4628_v6  ;;  %2587 = vst.msk [vmem:[#allocation2 + $0xa8] sm:$0xff] %vm2565_vm9, %v4629_v40  ;;  %v4624_v39 = vunpack.i.h.bf16 %v4622_v31  ;;  %v4623_v2 = vunpack.i.l.bf16 %v4622_v31 }
 0x1ab   : > { %v4637_v12 = vpop.permute.xlu1 %4636 }
 0x1ac   : > { %2570 = vst.msk [vmem:[#allocation2 + $0x20] sm:$0xff] %vm2565_vm9, %v4623_v2  ;;  %2571 = vst.msk [vmem:[#allocation2 + $0x28] sm:$0xff] %vm2565_vm9, %v4624_v39  ;;  %v4639_v60 = vunpack.i.h.bf16 %v4637_v12  ;;  %v4638_v5 = vunpack.i.l.bf16 %v4637_v12 }
 0x1ad   : > { %v4632_v7 = vpop.permute.xlu0 %4631 }
 0x1ae   : > { %2588 = vst.msk [vmem:[#allocation2 + $0xb0] sm:$0xff] %vm2565_vm9, %v4638_v5  ;;  %2589 = vst.msk [vmem:[#allocation2 + $0xb8] sm:$0xff] %vm2565_vm9, %v4639_v60  ;;  %v4634_v63 = vunpack.i.h.bf16 %v4632_v7  ;;  %v4633_v14 = vunpack.i.l.bf16 %v4632_v7 }
 0x1af   : > { %v4647_v27 = vpop.permute.xlu1 %4646 }
 0x1b0   : > { %2572 = vst.msk [vmem:[#allocation2 + $0x30] sm:$0xff] %vm2565_vm9, %v4633_v14  ;;  %2573 = vst.msk [vmem:[#allocation2 + $0x38] sm:$0xff] %vm2565_vm9, %v4634_v63  ;;  %v4649_v19 = vunpack.i.h.bf16 %v4647_v27  ;;  %v4648_v33 = vunpack.i.l.bf16 %v4647_v27 }
 0x1b1   : > { %v4642_v25 = vpop.permute.xlu0 %4641 }
 0x1b2   : > { %2939 = vst.msk [vmem:[#allocation2 + $0xa0] sm:$0xff] %vm2918_vm10, %v4648_v33  ;;  %2940 = vst.msk [vmem:[#allocation2 + $0xa8] sm:$0xff] %vm2918_vm10, %v4649_v19  ;;  %v4644_v3 = vunpack.i.h.bf16 %v4642_v25  ;;  %v4643_v41 = vunpack.i.l.bf16 %v4642_v25 }
 0x1b3   : > { %v4657_v42 = vpop.permute.xlu1 %4656 }
 0x1b4   : > { %2923 = vst.msk [vmem:[#allocation2 + $0x20] sm:$0xff] %vm2918_vm10, %v4643_v41  ;;  %2924 = vst.msk [vmem:[#allocation2 + $0x28] sm:$0xff] %vm2918_vm10, %v4644_v3  ;;  %v4659_v20 = vunpack.i.h.bf16 %v4657_v42  ;;  %v4658_v37 = vunpack.i.l.bf16 %v4657_v42 }
 0x1b5   : > { %v4652_v57 = vpop.permute.xlu0 %4651 }
 0x1b6   : > { %2941 = vst.msk [vmem:[#allocation2 + $0xb0] sm:$0xff] %vm2918_vm10, %v4658_v37  ;;  %2942 = vst.msk [vmem:[#allocation2 + $0xb8] sm:$0xff] %vm2918_vm10, %v4659_v20  ;;  %v4654_v44 = vunpack.i.h.bf16 %v4652_v57  ;;  %v4653_v59 = vunpack.i.l.bf16 %v4652_v57 }
 0x1b7   : > { %v4667_v50 = vpop.permute.xlu1 %4666 }
 0x1b8   : > { %2925 = vst.msk [vmem:[#allocation2 + $0x30] sm:$0xff] %vm2918_vm10, %v4653_v59  ;;  %2926 = vst.msk [vmem:[#allocation2 + $0x38] sm:$0xff] %vm2918_vm10, %v4654_v44  ;;  %v4669_v11 = vunpack.i.h.bf16 %v4667_v50  ;;  %v4668_v13 = vunpack.i.l.bf16 %v4667_v50 }
 0x1b9   : > { %v4662_v47 = vpop.permute.xlu0 %4661  ;;  %v2971_v24 = vld [vmem:[#allocation2 + $0xa0] sm:$0xff]  ;;  %v2972_v15 = vld [vmem:[#allocation2 + $0xa8] sm:$0xff] }
 0x1ba   : > { %1655 = vst.msk [vmem:[#allocation2 + $0xc0] sm:$0xff] %vm1630_vm6, %v4668_v13  ;;  %1656 = vst.msk [vmem:[#allocation2 + $0xc8] sm:$0xff] %vm1630_vm6, %v4669_v11  ;;  %v4664_v45 = vunpack.i.h.bf16 %v4662_v47  ;;  %v4663_v10 = vunpack.i.l.bf16 %v4662_v47  ;;  %v2993_v38 = vpack.c.bf16 %v2972_v15, %v2971_v24 }
 0x1bb   : > { %v4677_v46 = vpop.permute.xlu1 %4676  ;;  %v2955_v1 = vld [vmem:[#allocation2 + $0x20] sm:$0xff]  ;;  %v2956_v9 = vld [vmem:[#allocation2 + $0x28] sm:$0xff] }
 0x1bc   : > { %1639 = vst.msk [vmem:[#allocation2 + $0x40] sm:$0xff] %vm1630_vm6, %v4663_v10  ;;  %1640 = vst.msk [vmem:[#allocation2 + $0x48] sm:$0xff] %vm1630_vm6, %v4664_v45  ;;  %v4679_v28 = vunpack.i.h.bf16 %v4677_v46  ;;  %v4678_v53 = vunpack.i.l.bf16 %v4677_v46  ;;  %v2985_v32 = vpack.c.bf16 %v2956_v9, %v2955_v1  ;;  %4093 = vmatprep.mubr.msk.bf16.mxu1 %vm3019_vm12, %v2993_v38 }
 0x1bd   : > { %v4672_v23 = vpop.permute.xlu0 %4671  ;;  %v2973_v61 = vld [vmem:[#allocation2 + $0xb0] sm:$0xff]  ;;  %v2974_v16 = vld [vmem:[#allocation2 + $0xb8] sm:$0xff] }
 0x1be   : > { %1657 = vst.msk [vmem:[#allocation2 + $0xd0] sm:$0xff] %vm1630_vm6, %v4678_v53  ;;  %1658 = vst.msk [vmem:[#allocation2 + $0xd8] sm:$0xff] %vm1630_vm6, %v4679_v28  ;;  %v4674_v49 = vunpack.i.h.bf16 %v4672_v23  ;;  %v4673_v54 = vunpack.i.l.bf16 %v4672_v23  ;;  %4077 = vmatprep.mubr.msk.bf16.mxu0 %vm3019_vm12, %v2985_v32  ;;  %v2994_v56 = vpack.c.bf16 %v2974_v16, %v2973_v61 }
 0x1bf   : > { %v4687_v58 = vpop.permute.xlu1 %4686  ;;  %v2957_v43 = vld [vmem:[#allocation2 + $0x30] sm:$0xff]  ;;  %v2958_v8 = vld [vmem:[#allocation2 + $0x38] sm:$0xff] }
 0x1c0   : > { %1641 = vst.msk [vmem:[#allocation2 + $0x50] sm:$0xff] %vm1630_vm6, %v4673_v54  ;;  %1642 = vst.msk [vmem:[#allocation2 + $0x58] sm:$0xff] %vm1630_vm6, %v4674_v49  ;;  %v4689_v52 = vunpack.i.h.bf16 %v4687_v58  ;;  %v4688_v35 = vunpack.i.l.bf16 %v4687_v58  ;;  %v2986_v62 = vpack.c.bf16 %v2958_v8, %v2957_v43  ;;  %4094 = vmatmul.mubr.msk.bf16.gmra.mrb[4].mxu1 %vm3019_vm12, %v2994_v56 }
 0x1c1   : > { %v4682_v17 = vpop.permute.xlu0 %4681 }
 0x1c2   : > { %2008 = vst.msk [vmem:[#allocation2 + $0xc0] sm:$0xff] %vm1983_vm7, %v4688_v35  ;;  %2009 = vst.msk [vmem:[#allocation2 + $0xc8] sm:$0xff] %vm1983_vm7, %v4689_v52  ;;  %v4684_v48 = vunpack.i.h.bf16 %v4682_v17  ;;  %v4683_v22 = vunpack.i.l.bf16 %v4682_v17  ;;  %4078 = vmatmul.mubr.msk.bf16.gmra.mrb[4].mxu0 %vm3019_vm12, %v2986_v62 }
 0x1c3   : > { %v4697_v29 = vpop.permute.xlu1 %4696 }
 0x1c4   : > { %1992 = vst.msk [vmem:[#allocation2 + $0x40] sm:$0xff] %vm1983_vm7, %v4683_v22  ;;  %1993 = vst.msk [vmem:[#allocation2 + $0x48] sm:$0xff] %vm1983_vm7, %v4684_v48  ;;  %v4699_v18 = vunpack.i.h.bf16 %v4697_v29  ;;  %v4698_v36 = vunpack.i.l.bf16 %v4697_v29 }
 0x1c5   : > { %v4692_v55 = vpop.permute.xlu0 %4691 }
 0x1c6   : > { %2010 = vst.msk [vmem:[#allocation2 + $0xd0] sm:$0xff] %vm1983_vm7, %v4698_v36  ;;  %2011 = vst.msk [vmem:[#allocation2 + $0xd8] sm:$0xff] %vm1983_vm7, %v4699_v18  ;;  %v4694_v51 = vunpack.i.h.bf16 %v4692_v55  ;;  %v4693_v30 = vunpack.i.l.bf16 %v4692_v55 }
 0x1c7   : > { %v4707_v4 = vpop.permute.xlu1 %4706 }
 0x1c8   : > { %1994 = vst.msk [vmem:[#allocation2 + $0x50] sm:$0xff] %vm1983_vm7, %v4693_v30  ;;  %1995 = vst.msk [vmem:[#allocation2 + $0x58] sm:$0xff] %vm1983_vm7, %v4694_v51  ;;  %v4709_v0 = vunpack.i.h.bf16 %v4707_v4  ;;  %v4708_v26 = vunpack.i.l.bf16 %v4707_v4 }
 0x1c9   : > { %v4702_v34 = vpop.permute.xlu0 %4701 }
 0x1ca   : > { %2237 = vst.msk [vmem:[#allocation2 + $0xc0] sm:$0xff] %vm2212_vm8, %v4708_v26  ;;  %2238 = vst.msk [vmem:[#allocation2 + $0xc8] sm:$0xff] %vm2212_vm8, %v4709_v0  ;;  %v4704_v21 = vunpack.i.h.bf16 %v4702_v34  ;;  %v4703_v40 = vunpack.i.l.bf16 %v4702_v34 }
 0x1cb   : > { %v4717_v6 = vpop.permute.xlu1 %4716 }
 0x1cc   : > { %2221 = vst.msk [vmem:[#allocation2 + $0x40] sm:$0xff] %vm2212_vm8, %v4703_v40  ;;  %2222 = vst.msk [vmem:[#allocation2 + $0x48] sm:$0xff] %vm2212_vm8, %v4704_v21  ;;  %v4719_v31 = vunpack.i.h.bf16 %v4717_v6  ;;  %v4718_v39 = vunpack.i.l.bf16 %v4717_v6 }
 0x1cd   : > { %v4712_v2 = vpop.permute.xlu0 %4711 }
 0x1ce   : > { %2239 = vst.msk [vmem:[#allocation2 + $0xd0] sm:$0xff] %vm2212_vm8, %v4718_v39  ;;  %2240 = vst.msk [vmem:[#allocation2 + $0xd8] sm:$0xff] %vm2212_vm8, %v4719_v31  ;;  %v4714_v12 = vunpack.i.h.bf16 %v4712_v2  ;;  %v4713_v60 = vunpack.i.l.bf16 %v4712_v2 }
 0x1cf   : > { %v4727_v5 = vpop.permute.xlu1 %4726 }
 0x1d0   : > { %2223 = vst.msk [vmem:[#allocation2 + $0x50] sm:$0xff] %vm2212_vm8, %v4713_v60  ;;  %2224 = vst.msk [vmem:[#allocation2 + $0x58] sm:$0xff] %vm2212_vm8, %v4714_v12  ;;  %v4729_v7 = vunpack.i.h.bf16 %v4727_v5  ;;  %v4728_v63 = vunpack.i.l.bf16 %v4727_v5 }
 0x1d1   : > { %v4722_v14 = vpop.permute.xlu0 %4721 }
 0x1d2   : > { %2590 = vst.msk [vmem:[#allocation2 + $0xc0] sm:$0xff] %vm2565_vm9, %v4728_v63  ;;  %2591 = vst.msk [vmem:[#allocation2 + $0xc8] sm:$0xff] %vm2565_vm9, %v4729_v7  ;;  %v4724_v27 = vunpack.i.h.bf16 %v4722_v14  ;;  %v4723_v19 = vunpack.i.l.bf16 %v4722_v14 }
 0x1d3   : > { %v4737_v33 = vpop.permute.xlu1 %4736 }
 0x1d4   : > { %2574 = vst.msk [vmem:[#allocation2 + $0x40] sm:$0xff] %vm2565_vm9, %v4723_v19  ;;  %2575 = vst.msk [vmem:[#allocation2 + $0x48] sm:$0xff] %vm2565_vm9, %v4724_v27  ;;  %v4739_v25 = vunpack.i.h.bf16 %v4737_v33  ;;  %v4738_v3 = vunpack.i.l.bf16 %v4737_v33 }
 0x1d5   : > { %v4732_v41 = vpop.permute.xlu0 %4731 }
 0x1d6   : > { %2592 = vst.msk [vmem:[#allocation2 + $0xd0] sm:$0xff] %vm2565_vm9, %v4738_v3  ;;  %2593 = vst.msk [vmem:[#allocation2 + $0xd8] sm:$0xff] %vm2565_vm9, %v4739_v25  ;;  %v4734_v42 = vunpack.i.h.bf16 %v4732_v41  ;;  %v4733_v20 = vunpack.i.l.bf16 %v4732_v41 }
 0x1d7   : > { %v4747_v37 = vpop.permute.xlu1 %4746 }
 0x1d8   : > { %2576 = vst.msk [vmem:[#allocation2 + $0x50] sm:$0xff] %vm2565_vm9, %v4733_v20  ;;  %2577 = vst.msk [vmem:[#allocation2 + $0x58] sm:$0xff] %vm2565_vm9, %v4734_v42  ;;  %v4749_v57 = vunpack.i.h.bf16 %v4747_v37  ;;  %v4748_v44 = vunpack.i.l.bf16 %v4747_v37 }
 0x1d9   : > { %v4742_v59 = vpop.permute.xlu0 %4741 }
 0x1da   : > { %2943 = vst.msk [vmem:[#allocation2 + $0xc0] sm:$0xff] %vm2918_vm10, %v4748_v44  ;;  %2944 = vst.msk [vmem:[#allocation2 + $0xc8] sm:$0xff] %vm2918_vm10, %v4749_v57  ;;  %v4744_v50 = vunpack.i.h.bf16 %v4742_v59  ;;  %v4743_v11 = vunpack.i.l.bf16 %v4742_v59 }
 0x1db   : > { %v4757_v13 = vpop.permute.xlu1 %4756 }
 0x1dc   : > { %2927 = vst.msk [vmem:[#allocation2 + $0x40] sm:$0xff] %vm2918_vm10, %v4743_v11  ;;  %2928 = vst.msk [vmem:[#allocation2 + $0x48] sm:$0xff] %vm2918_vm10, %v4744_v50  ;;  %v4759_v47 = vunpack.i.h.bf16 %v4757_v13  ;;  %v4758_v24 = vunpack.i.l.bf16 %v4757_v13 }
 0x1dd   : > { %v4752_v15 = vpop.permute.xlu0 %4751 }
 0x1de   : > { %2945 = vst.msk [vmem:[#allocation2 + $0xd0] sm:$0xff] %vm2918_vm10, %v4758_v24  ;;  %2946 = vst.msk [vmem:[#allocation2 + $0xd8] sm:$0xff] %vm2918_vm10, %v4759_v47  ;;  %v4754_v45 = vunpack.i.h.bf16 %v4752_v15  ;;  %v4753_v10 = vunpack.i.l.bf16 %v4752_v15 }
 0x1df   : > { %v4767_v38 = vpop.permute.xlu1 %4766 }
 0x1e0   : > { %2929 = vst.msk [vmem:[#allocation2 + $0x50] sm:$0xff] %vm2918_vm10, %v4753_v10  ;;  %2930 = vst.msk [vmem:[#allocation2 + $0x58] sm:$0xff] %vm2918_vm10, %v4754_v45  ;;  %v4769_v46 = vunpack.i.h.bf16 %v4767_v38  ;;  %v4768_v1 = vunpack.i.l.bf16 %v4767_v38 }
 0x1e1   : > { %v4762_v9 = vpop.permute.xlu0 %4761  ;;  %v2975_v28 = vld [vmem:[#allocation2 + $0xc0] sm:$0xff]  ;;  %v2976_v53 = vld [vmem:[#allocation2 + $0xc8] sm:$0xff] }
 0x1e2   : > { %1659 = vst.msk [vmem:[#allocation2 + $0xe0] sm:$0xff] %vm1630_vm6, %v4768_v1  ;;  %1660 = vst.msk [vmem:[#allocation2 + $0xe8] sm:$0xff] %vm1630_vm6, %v4769_v46  ;;  %v4764_v32 = vunpack.i.h.bf16 %v4762_v9  ;;  %v4763_v23 = vunpack.i.l.bf16 %v4762_v9  ;;  %v2995_v61 = vpack.c.bf16 %v2976_v53, %v2975_v28 }
 0x1e3   : > { %v4777_v16 = vpop.permute.xlu1 %4776  ;;  %v2959_v49 = vld [vmem:[#allocation2 + $0x40] sm:$0xff]  ;;  %v2960_v54 = vld [vmem:[#allocation2 + $0x48] sm:$0xff] }
 0x1e4   : > { %1643 = vst.msk [vmem:[#allocation2 + $0x60] sm:$0xff] %vm1630_vm6, %v4763_v23  ;;  %1644 = vst.msk [vmem:[#allocation2 + $0x68] sm:$0xff] %vm1630_vm6, %v4764_v32  ;;  %v4779_v56 = vunpack.i.h.bf16 %v4777_v16  ;;  %v4778_v58 = vunpack.i.l.bf16 %v4777_v16  ;;  %v2987_v43 = vpack.c.bf16 %v2960_v54, %v2959_v49  ;;  %4097 = vmatprep.mubr.msk.bf16.mxu1 %vm3019_vm12, %v2995_v61 }
 0x1e5   : > { %v4772_v8 = vpop.permute.xlu0 %4771  ;;  %v2977_v52 = vld [vmem:[#allocation2 + $0xd0] sm:$0xff]  ;;  %v2978_v35 = vld [vmem:[#allocation2 + $0xd8] sm:$0xff] }
 0x1e6   : > { %1661 = vst.msk [vmem:[#allocation2 + $0xf0] sm:$0xff] %vm1630_vm6, %v4778_v58  ;;  %1662 = vst.msk [vmem:[#allocation2 + $0xf8] sm:$0xff] %vm1630_vm6, %v4779_v56  ;;  %v4774_v62 = vunpack.i.h.bf16 %v4772_v8  ;;  %v4773_v17 = vunpack.i.l.bf16 %v4772_v8  ;;  %4081 = vmatprep.mubr.msk.bf16.mxu0 %vm3019_vm12, %v2987_v43  ;;  %v2996_v48 = vpack.c.bf16 %v2978_v35, %v2977_v52 }
 0x1e7   : > { %v4787_v22 = vpop.permute.xlu1 %4786  ;;  %v2961_v29 = vld [vmem:[#allocation2 + $0x50] sm:$0xff]  ;;  %v2962_v18 = vld [vmem:[#allocation2 + $0x58] sm:$0xff] }
 0x1e8   : > { %1645 = vst.msk [vmem:[#allocation2 + $0x70] sm:$0xff] %vm1630_vm6, %v4773_v17  ;;  %1646 = vst.msk [vmem:[#allocation2 + $0x78] sm:$0xff] %vm1630_vm6, %v4774_v62  ;;  %v4789_v36 = vunpack.i.h.bf16 %v4787_v22  ;;  %v4788_v55 = vunpack.i.l.bf16 %v4787_v22  ;;  %v2988_v51 = vpack.c.bf16 %v2962_v18, %v2961_v29  ;;  %4098 = vmatmul.mubr.msk.bf16.gmra.mrb[8].mxu1 %vm3019_vm12, %v2996_v48  ;;  %v6994_v48 = vld [vmem:[#allocation8] ss:$0 sm:$0xff]  ;;  %v6996_v22 = vld [vmem:[#allocation9] ss:$0 sm:$0xff] }
 0x1e9   : > { %v4782_v30 = vpop.permute.xlu0 %4781 }
 0x1ea   : > { %2012 = vst.msk [vmem:[#allocation2 + $0xe0] sm:$0xff] %vm1983_vm7, %v4788_v55  ;;  %2013 = vst.msk [vmem:[#allocation2 + $0xe8] sm:$0xff] %vm1983_vm7, %v4789_v36  ;;  %4082 = vmatmul.mubr.msk.bf16.gmra.mrb[8].mxu0 %vm3019_vm12, %v2988_v51  ;;  %v4784_v4 = vunpack.i.h.bf16 %v4782_v30  ;;  %v4783_v0 = vunpack.i.l.bf16 %v4782_v30 }
 0x1ec   : > { %1996 = vst.msk [vmem:[#allocation2 + $0x60] sm:$0xff] %vm1983_vm7, %v4783_v0  ;;  %1997 = vst.msk [vmem:[#allocation2 + $0x68] sm:$0xff] %vm1983_vm7, %v4784_v4  ;;  %v4797_v26 = vpop.permute.xlu1 %4796 }
 0x1ed   : > { %v4799_v34 = vunpack.i.h.bf16 %v4797_v26  ;;  %v4798_v21 = vunpack.i.l.bf16 %v4797_v26 }
 0x1ee   : > { %v4792_v40 = vpop.permute.xlu0 %4791 }
 0x1ef   : > { %2014 = vst.msk [vmem:[#allocation2 + $0xf0] sm:$0xff] %vm1983_vm7, %v4798_v21  ;;  %2015 = vst.msk [vmem:[#allocation2 + $0xf8] sm:$0xff] %vm1983_vm7, %v4799_v34  ;;  %v4794_v6 = vunpack.i.h.bf16 %v4792_v40  ;;  %v4793_v31 = vunpack.i.l.bf16 %v4792_v40 }
 0x1f0   : > { %v4807_v39 = vpop.permute.xlu1 %4806 }
 0x1f1   : > { %1998 = vst.msk [vmem:[#allocation2 + $0x70] sm:$0xff] %vm1983_vm7, %v4793_v31  ;;  %1999 = vst.msk [vmem:[#allocation2 + $0x78] sm:$0xff] %vm1983_vm7, %v4794_v6  ;;  %v4809_v2 = vunpack.i.h.bf16 %v4807_v39  ;;  %v4808_v12 = vunpack.i.l.bf16 %v4807_v39 }
 0x1f2   : > { %v4802_v60 = vpop.permute.xlu0 %4801 }
 0x1f3   : > { %2241 = vst.msk [vmem:[#allocation2 + $0xe0] sm:$0xff] %vm2212_vm8, %v4808_v12  ;;  %2242 = vst.msk [vmem:[#allocation2 + $0xe8] sm:$0xff] %vm2212_vm8, %v4809_v2  ;;  %v4804_v5 = vunpack.i.h.bf16 %v4802_v60  ;;  %v4803_v7 = vunpack.i.l.bf16 %v4802_v60 }
 0x1f4   : > { %v4817_v63 = vpop.permute.xlu1 %4816 }
 0x1f5   : > { %2225 = vst.msk [vmem:[#allocation2 + $0x60] sm:$0xff] %vm2212_vm8, %v4803_v7  ;;  %2226 = vst.msk [vmem:[#allocation2 + $0x68] sm:$0xff] %vm2212_vm8, %v4804_v5  ;;  %v4819_v14 = vunpack.i.h.bf16 %v4817_v63  ;;  %v4818_v27 = vunpack.i.l.bf16 %v4817_v63 }
 0x1f6   : > { %v4812_v19 = vpop.permute.xlu0 %4811 }
 0x1f7   : > { %2243 = vst.msk [vmem:[#allocation2 + $0xf0] sm:$0xff] %vm2212_vm8, %v4818_v27  ;;  %2244 = vst.msk [vmem:[#allocation2 + $0xf8] sm:$0xff] %vm2212_vm8, %v4819_v14  ;;  %v4814_v33 = vunpack.i.h.bf16 %v4812_v19  ;;  %v4813_v25 = vunpack.i.l.bf16 %v4812_v19 }
 0x1f8   : > { %v4827_v3 = vpop.permute.xlu1 %4826 }
 0x1f9   : > { %2227 = vst.msk [vmem:[#allocation2 + $0x70] sm:$0xff] %vm2212_vm8, %v4813_v25  ;;  %2228 = vst.msk [vmem:[#allocation2 + $0x78] sm:$0xff] %vm2212_vm8, %v4814_v33  ;;  %v4829_v41 = vunpack.i.h.bf16 %v4827_v3  ;;  %v4828_v42 = vunpack.i.l.bf16 %v4827_v3 }
 0x1fa   : > { %v4822_v20 = vpop.permute.xlu0 %4821 }
 0x1fb   : > { %2594 = vst.msk [vmem:[#allocation2 + $0xe0] sm:$0xff] %vm2565_vm9, %v4828_v42  ;;  %2595 = vst.msk [vmem:[#allocation2 + $0xe8] sm:$0xff] %vm2565_vm9, %v4829_v41  ;;  %v4824_v37 = vunpack.i.h.bf16 %v4822_v20  ;;  %v4823_v57 = vunpack.i.l.bf16 %v4822_v20 }
 0x1fc   : > { %v4837_v44 = vpop.permute.xlu1 %4836 }
 0x1fd   : > { %2578 = vst.msk [vmem:[#allocation2 + $0x60] sm:$0xff] %vm2565_vm9, %v4823_v57  ;;  %2579 = vst.msk [vmem:[#allocation2 + $0x68] sm:$0xff] %vm2565_vm9, %v4824_v37  ;;  %v4839_v59 = vunpack.i.h.bf16 %v4837_v44  ;;  %v4838_v50 = vunpack.i.l.bf16 %v4837_v44 }
 0x1fe   : > { %v4832_v11 = vpop.permute.xlu0 %4831 }
 0x1ff   : > { %2596 = vst.msk [vmem:[#allocation2 + $0xf0] sm:$0xff] %vm2565_vm9, %v4838_v50  ;;  %2597 = vst.msk [vmem:[#allocation2 + $0xf8] sm:$0xff] %vm2565_vm9, %v4839_v59  ;;  %v4834_v13 = vunpack.i.h.bf16 %v4832_v11  ;;  %v4833_v47 = vunpack.i.l.bf16 %v4832_v11 }
 0x200   : > { %v4847_v24 = vpop.permute.xlu1 %4846 }
 0x201   : > { %2580 = vst.msk [vmem:[#allocation2 + $0x70] sm:$0xff] %vm2565_vm9, %v4833_v47  ;;  %2581 = vst.msk [vmem:[#allocation2 + $0x78] sm:$0xff] %vm2565_vm9, %v4834_v13  ;;  %v4849_v15 = vunpack.i.h.bf16 %v4847_v24  ;;  %v4848_v45 = vunpack.i.l.bf16 %v4847_v24 }
 0x202   : > { %v4842_v10 = vpop.permute.xlu0 %4841 }
 0x203   : > { %2947 = vst.msk [vmem:[#allocation2 + $0xe0] sm:$0xff] %vm2918_vm10, %v4848_v45  ;;  %2948 = vst.msk [vmem:[#allocation2 + $0xe8] sm:$0xff] %vm2918_vm10, %v4849_v15  ;;  %v4844_v38 = vunpack.i.h.bf16 %v4842_v10  ;;  %v4843_v46 = vunpack.i.l.bf16 %v4842_v10 }
 0x204   : > { %v4857_v1 = vpop.permute.xlu1 %4856 }
 0x205   : > { %2931 = vst.msk [vmem:[#allocation2 + $0x60] sm:$0xff] %vm2918_vm10, %v4843_v46  ;;  %2932 = vst.msk [vmem:[#allocation2 + $0x68] sm:$0xff] %vm2918_vm10, %v4844_v38  ;;  %v4859_v9 = vunpack.i.h.bf16 %v4857_v1  ;;  %v4858_v28 = vunpack.i.l.bf16 %v4857_v1 }
 0x206   : > { %v4852_v53 = vpop.permute.xlu0 %4851 }
 0x207   : > { %2949 = vst.msk [vmem:[#allocation2 + $0xf0] sm:$0xff] %vm2918_vm10, %v4858_v28  ;;  %2950 = vst.msk [vmem:[#allocation2 + $0xf8] sm:$0xff] %vm2918_vm10, %v4859_v9  ;;  %v4854_v32 = vunpack.i.h.bf16 %v4852_v53  ;;  %v4853_v23 = vunpack.i.l.bf16 %v4852_v53 }
 0x209   : > { %2933 = vst.msk [vmem:[#allocation2 + $0x70] sm:$0xff] %vm2918_vm10, %v4853_v23  ;;  %2934 = vst.msk [vmem:[#allocation2 + $0x78] sm:$0xff] %vm2918_vm10, %v4854_v32 }
 0x20a   : > { %v2979_v61 = vld [vmem:[#allocation2 + $0xe0] sm:$0xff]  ;;  %v2980_v16 = vld [vmem:[#allocation2 + $0xe8] sm:$0xff] }
 0x20b   : > { %v2997_v49 = vpack.c.bf16 %v2980_v16, %v2979_v61 }
 0x20c   : > { %v2963_v54 = vld [vmem:[#allocation2 + $0x60] sm:$0xff]  ;;  %v2964_v56 = vld [vmem:[#allocation2 + $0x68] sm:$0xff] }
 0x20d   : > { %v2989_v58 = vpack.c.bf16 %v2964_v56, %v2963_v54  ;;  %4101 = vmatprep.mubr.msk.bf16.mxu1 %vm3019_vm12, %v2997_v49 }
 0x20e   : > { %v2981_v43 = vld [vmem:[#allocation2 + $0xf0] sm:$0xff]  ;;  %v2982_v8 = vld [vmem:[#allocation2 + $0xf8] sm:$0xff] }
 0x20f   : > { %4085 = vmatprep.mubr.msk.bf16.mxu0 %vm3019_vm12, %v2989_v58  ;;  %v2998_v52 = vpack.c.bf16 %v2982_v8, %v2981_v43 }
 0x210   : > { %v2965_v35 = vld [vmem:[#allocation2 + $0x70] sm:$0xff]  ;;  %v2966_v62 = vld [vmem:[#allocation2 + $0x78] sm:$0xff] }
 0x211   : > { %v2990_v17 = vpack.c.bf16 %v2966_v62, %v2965_v35  ;;  %4102 = vmatmul.mubr.msk.bf16.gmra.mrb[12].mxu1 %vm3019_vm12, %v2998_v52 }
 0x213   : > { %4086 = vmatmul.mubr.msk.bf16.gmra.mrb[12].mxu0 %vm3019_vm12, %v2990_v17 }
 0x26b   : > { %v4091_v29 = vpop.f32.mrb[0].mxu1 }
 0x26c   : > { %v3258_v18 = vmul.f32 %v4091_v29, %v6994_v48  ;;  %v3170_v36 = vpop.f32.mrb[1].mxu1 }
 0x26d   : > { %v4075_v55 = vpop.f32.mrb[0].mxu0  ;;  %v3256_v51 = vmul.f32 %v6994_v48, %v3170_v36  ;;  %v4092_v30 = vpop.f32.mrb[2].mxu1 }
 0x26e   : > { %v3242_v4 = vmul.f32 %v4075_v55, %v6994_v48  ;;  %v3297_v0 = vadd.f32 %v6996_v22, %v3258_v18  ;;  %v3106_v26 = vpop.f32.mrb[1].mxu0  ;;  %v3259_v34 = vmul.f32 %v4092_v30, %v6994_v48  ;;  %v3173_v21 = vpop.f32.mrb[3].mxu1 }
 0x26f   : > { %v3240_v40 = vmul.f32 %v6994_v48, %v3106_v26  ;;  %v3295_v6 = vadd.f32 %v6996_v22, %v3256_v51  ;;  %v4076_v31 = vpop.f32.mrb[2].mxu0  ;;  %v3257_v39 = vmul.f32 %v6994_v48, %v3173_v21 }
 0x270   : > { %v3281_v2 = vadd.f32 %v6996_v22, %v3242_v4  ;;  %v3329_v12 = vmax.f32 %v3297_v0, 0.0  ;;  %v3243_v60 = vmul.f32 %v4076_v31, %v6994_v48  ;;  %v3298_v5 = vadd.f32 %v6996_v22, %v3259_v34  ;;  %v3109_v7 = vpop.f32.mrb[3].mxu0 }
 0x271   : > { %v3279_v63 = vadd.f32 %v6996_v22, %v3240_v40  ;;  %v3327_v14 = vmax.f32 %v3295_v6, 0.0  ;;  %v3241_v27 = vmul.f32 %v6994_v48, %v3109_v7  ;;  %v3296_v19 = vadd.f32 %v6996_v22, %v3257_v39 }
 0x272   : > { %v3313_v33 = vmax.f32 %v3281_v2, 0.0  ;;  %3361 = vst [vmem:[%s7013_s8 + $0x90] sm:$0xff] %v3329_v12  ;;  %v3282_v25 = vadd.f32 %v6996_v22, %v3243_v60  ;;  %v3330_v3 = vmax.f32 %v3298_v5, 0.0 }
 0x273   : > { %v3311_v41 = vmax.f32 %v3279_v63, 0.0  ;;  %3359 = vst [vmem:[%s7013_s8 + $0x80] sm:$0xff] %v3327_v14  ;;  %v3280_v42 = vadd.f32 %v6996_v22, %v3241_v27  ;;  %v3328_v20 = vmax.f32 %v3296_v19, 0.0 }
 0x274   : > { %3345 = vst [vmem:[%s7013_s8 + $0x10] sm:$0xff] %v3313_v33  ;;  %v3314_v37 = vmax.f32 %v3282_v25, 0.0  ;;  %3362 = vst [vmem:[%s7013_s8 + $0x98] sm:$0xff] %v3330_v3 }
 0x275   : > { %3343 = vst [vmem:[%s7013_s8] sm:$0xff] %v3311_v41  ;;  %v3312_v57 = vmax.f32 %v3280_v42, 0.0  ;;  %3360 = vst [vmem:[%s7013_s8 + $0x88] sm:$0xff] %v3328_v20 }
 0x276   : > { %3346 = vst [vmem:[%s7013_s8 + $0x18] sm:$0xff] %v3314_v37 }
 0x277   : > { %3344 = vst [vmem:[%s7013_s8 + $0x8] sm:$0xff] %v3312_v57 }
 0x293   : > { %v4095_v44 = vpop.f32.mrb[4].mxu1 }
 0x294   : > { %v3262_v59 = vmul.f32 %v4095_v44, %v6994_v48  ;;  %v3186_v50 = vpop.f32.mrb[5].mxu1 }
 0x295   : > { %v4079_v11 = vpop.f32.mrb[4].mxu0  ;;  %v3260_v13 = vmul.f32 %v6994_v48, %v3186_v50  ;;  %v4096_v47 = vpop.f32.mrb[6].mxu1 }
 0x296   : > { %v3246_v24 = vmul.f32 %v4079_v11, %v6994_v48  ;;  %v3301_v15 = vadd.f32 %v6996_v22, %v3262_v59  ;;  %v3122_v45 = vpop.f32.mrb[5].mxu0  ;;  %v3263_v10 = vmul.f32 %v4096_v47, %v6994_v48  ;;  %v3189_v38 = vpop.f32.mrb[7].mxu1 }
 0x297   : > { %v3244_v46 = vmul.f32 %v6994_v48, %v3122_v45  ;;  %v3299_v1 = vadd.f32 %v6996_v22, %v3260_v13  ;;  %v4080_v9 = vpop.f32.mrb[6].mxu0  ;;  %v3261_v28 = vmul.f32 %v6994_v48, %v3189_v38 }
 0x298   : > { %v3285_v53 = vadd.f32 %v6996_v22, %v3246_v24  ;;  %v3333_v32 = vmax.f32 %v3301_v15, 0.0  ;;  %v3247_v23 = vmul.f32 %v4080_v9, %v6994_v48  ;;  %v3302_v61 = vadd.f32 %v6996_v22, %v3263_v10  ;;  %v3125_v16 = vpop.f32.mrb[7].mxu0 }
 0x299   : > { %v3283_v49 = vadd.f32 %v6996_v22, %v3244_v46  ;;  %v3331_v54 = vmax.f32 %v3299_v1, 0.0  ;;  %v3245_v56 = vmul.f32 %v6994_v48, %v3125_v16  ;;  %v3300_v58 = vadd.f32 %v6996_v22, %v3261_v28 }
 0x29a   : > { %v3317_v43 = vmax.f32 %v3285_v53, 0.0  ;;  %3365 = vst [vmem:[%s7013_s8 + $0xb0] sm:$0xff] %v3333_v32  ;;  %v3286_v8 = vadd.f32 %v6996_v22, %v3247_v23  ;;  %v3334_v52 = vmax.f32 %v3302_v61, 0.0 }
 0x29b   : > { %v3315_v35 = vmax.f32 %v3283_v49, 0.0  ;;  %3363 = vst [vmem:[%s7013_s8 + $0xa0] sm:$0xff] %v3331_v54  ;;  %v3284_v62 = vadd.f32 %v6996_v22, %v3245_v56  ;;  %v3332_v17 = vmax.f32 %v3300_v58, 0.0 }
 0x29c   : > { %3349 = vst [vmem:[%s7013_s8 + $0x30] sm:$0xff] %v3317_v43  ;;  %v3318_v29 = vmax.f32 %v3286_v8, 0.0  ;;  %3366 = vst [vmem:[%s7013_s8 + $0xb8] sm:$0xff] %v3334_v52 }
 0x29d   : > { %3347 = vst [vmem:[%s7013_s8 + $0x20] sm:$0xff] %v3315_v35  ;;  %v3316_v18 = vmax.f32 %v3284_v62, 0.0  ;;  %3364 = vst [vmem:[%s7013_s8 + $0xa8] sm:$0xff] %v3332_v17 }
 0x29e   : > { %3350 = vst [vmem:[%s7013_s8 + $0x38] sm:$0xff] %v3318_v29 }
 0x29f   : > { %3348 = vst [vmem:[%s7013_s8 + $0x28] sm:$0xff] %v3316_v18 }
 0x2bb   : > { %v4099_v36 = vpop.f32.mrb[8].mxu1 }
 0x2bc   : > { %v3266_v55 = vmul.f32 %v4099_v36, %v6994_v48  ;;  %v3202_v51 = vpop.f32.mrb[9].mxu1 }
 0x2bd   : > { %v4083_v30 = vpop.f32.mrb[8].mxu0  ;;  %v3264_v4 = vmul.f32 %v6994_v48, %v3202_v51  ;;  %v4100_v0 = vpop.f32.mrb[10].mxu1 }
 0x2be   : > { %v3250_v26 = vmul.f32 %v4083_v30, %v6994_v48  ;;  %v3305_v34 = vadd.f32 %v6996_v22, %v3266_v55  ;;  %v3138_v21 = vpop.f32.mrb[9].mxu0  ;;  %v3267_v40 = vmul.f32 %v4100_v0, %v6994_v48  ;;  %v3205_v6 = vpop.f32.mrb[11].mxu1 }
 0x2bf   : > { %v3248_v31 = vmul.f32 %v6994_v48, %v3138_v21  ;;  %v3303_v39 = vadd.f32 %v6996_v22, %v3264_v4  ;;  %v4084_v2 = vpop.f32.mrb[10].mxu0  ;;  %v3265_v12 = vmul.f32 %v6994_v48, %v3205_v6 }
 0x2c0   : > { %v3289_v60 = vadd.f32 %v6996_v22, %v3250_v26  ;;  %v3337_v5 = vmax.f32 %v3305_v34, 0.0  ;;  %v3251_v7 = vmul.f32 %v4084_v2, %v6994_v48  ;;  %v3306_v63 = vadd.f32 %v6996_v22, %v3267_v40  ;;  %v3141_v14 = vpop.f32.mrb[11].mxu0 }
 0x2c1   : > { %v3287_v27 = vadd.f32 %v6996_v22, %v3248_v31  ;;  %v3335_v19 = vmax.f32 %v3303_v39, 0.0  ;;  %v3249_v33 = vmul.f32 %v6994_v48, %v3141_v14  ;;  %v3304_v25 = vadd.f32 %v6996_v22, %v3265_v12 }
 0x2c2   : > { %v3321_v3 = vmax.f32 %v3289_v60, 0.0  ;;  %3369 = vst [vmem:[%s7013_s8 + $0xd0] sm:$0xff] %v3337_v5  ;;  %v3290_v41 = vadd.f32 %v6996_v22, %v3251_v7  ;;  %v3338_v42 = vmax.f32 %v3306_v63, 0.0 }
 0x2c3   : > { %v3319_v20 = vmax.f32 %v3287_v27, 0.0  ;;  %3367 = vst [vmem:[%s7013_s8 + $0xc0] sm:$0xff] %v3335_v19  ;;  %v3288_v37 = vadd.f32 %v6996_v22, %v3249_v33  ;;  %v3336_v57 = vmax.f32 %v3304_v25, 0.0 }
 0x2c4   : > { %3353 = vst [vmem:[%s7013_s8 + $0x50] sm:$0xff] %v3321_v3  ;;  %v3322_v44 = vmax.f32 %v3290_v41, 0.0  ;;  %3370 = vst [vmem:[%s7013_s8 + $0xd8] sm:$0xff] %v3338_v42 }
 0x2c5   : > { %3351 = vst [vmem:[%s7013_s8 + $0x40] sm:$0xff] %v3319_v20  ;;  %v3320_v59 = vmax.f32 %v3288_v37, 0.0  ;;  %3368 = vst [vmem:[%s7013_s8 + $0xc8] sm:$0xff] %v3336_v57 }
 0x2c6   : > { %3354 = vst [vmem:[%s7013_s8 + $0x58] sm:$0xff] %v3322_v44 }
 0x2c7   : > { %3352 = vst [vmem:[%s7013_s8 + $0x48] sm:$0xff] %v3320_v59 }
 0x2e4   : > { %v4103_v50 = vpop.f32.mrb[12].mxu1 }
 0x2e5   : > { %v3270_v11 = vmul.f32 %v4103_v50, %v6994_v48  ;;  %v3218_v13 = vpop.f32.mrb[13].mxu1 }
 0x2e6   : > { %v4087_v47 = vpop.f32.mrb[12].mxu0  ;;  %v3268_v24 = vmul.f32 %v6994_v48, %v3218_v13  ;;  %v4104_v15 = vpop.f32.mrb[14].mxu1 }
 0x2e7   : > { %v3254_v45 = vmul.f32 %v4087_v47, %v6994_v48  ;;  %v3309_v10 = vadd.f32 %v6996_v22, %v3270_v11  ;;  %v3154_v38 = vpop.f32.mrb[13].mxu0  ;;  %v3271_v46 = vmul.f32 %v4104_v15, %v6994_v48  ;;  %v3221_v1 = vpop.f32.mrb[15].mxu1 }
 0x2e8   : > { %v3252_v9 = vmul.f32 %v6994_v48, %v3154_v38  ;;  %v3307_v28 = vadd.f32 %v6996_v22, %v3268_v24  ;;  %v4088_v53 = vpop.f32.mrb[14].mxu0  ;;  %v3269_v32 = vmul.f32 %v6994_v48, %v3221_v1 }
 0x2e9   : > { %v3293_v23 = vadd.f32 %v6996_v22, %v3254_v45  ;;  %v3341_v61 = vmax.f32 %v3309_v10, 0.0  ;;  %v3255_v16 = vmul.f32 %v4088_v53, %v6994_v48  ;;  %v3310_v49 = vadd.f32 %v6996_v22, %v3271_v46  ;;  %v3157_v54 = vpop.f32.mrb[15].mxu0 }
 0x2ea   : > { %v3291_v56 = vadd.f32 %v6996_v22, %v3252_v9  ;;  %v3339_v58 = vmax.f32 %v3307_v28, 0.0  ;;  %v3253_v43 = vmul.f32 %v6994_v48, %v3157_v54  ;;  %v3308_v8 = vadd.f32 %v6996_v22, %v3269_v32 }
 0x2eb   : > { %v3325_v52 = vmax.f32 %v3293_v23, 0.0  ;;  %3373 = vst [vmem:[%s7013_s8 + $0xf0] sm:$0xff] %v3341_v61  ;;  %v3294_v35 = vadd.f32 %v6996_v22, %v3255_v16  ;;  %v3342_v62 = vmax.f32 %v3310_v49, 0.0 }
 0x2ec   : > { %v3323_v17 = vmax.f32 %v3291_v56, 0.0  ;;  %3371 = vst [vmem:[%s7013_s8 + $0xe0] sm:$0xff] %v3339_v58  ;;  %v3292_v29 = vadd.f32 %v6996_v22, %v3253_v43  ;;  %v3340_v48 = vmax.f32 %v3308_v8, 0.0 }
 0x2ed   : > { %3357 = vst [vmem:[%s7013_s8 + $0x70] sm:$0xff] %v3325_v52  ;;  %v3326_v18 = vmax.f32 %v3294_v35, 0.0  ;;  %3374 = vst [vmem:[%s7013_s8 + $0xf8] sm:$0xff] %v3342_v62 }
 0x2ee   : > { %3355 = vst [vmem:[%s7013_s8 + $0x60] sm:$0xff] %v3323_v17  ;;  %v3324_v36 = vmax.f32 %v3292_v29, 0.0  ;;  %3372 = vst [vmem:[%s7013_s8 + $0xe8] sm:$0xff] %v3340_v48 }
 0x2ef   : > { %3358 = vst [vmem:[%s7013_s8 + $0x78] sm:$0xff] %v3326_v18 }
 0x2f0   : > { %3356 = vst [vmem:[%s7013_s8 + $0x68] sm:$0xff] %v3324_v36 }
 0x2f1   : > { %4990 = shalt.err (!%p4987_p0)
}
 0x2f2   : > { %s4991_s22 = scalar_lea.hbm %s7098_s21, 4096  ;;  %s4995_s10 = scalar_lea.hbm %s7158_s4, 8192 }
 0x2f3   : > { %p4992_p4 = scmp.ne.s32.totalorder %s7098_s21, %s4991_s22  ;;  %p4996_p12 = scmp.lt.u32.totalorder %s7098_s21, %s7158_s4 }
 0x2f4   : > { %p4997_p1 = scmp.lt.u32.totalorder %s4995_s10, %s4991_s22  ;;  %p4999_p13 = scmp.lt.u32.totalorder %s4991_s22, %s7098_s21 }
 0x2f5   : > { %p4993_p2 = pnand %p4992_p4, %p5265_p10 }
 0x2f6   : > { %p4998_p11 = por %p4997_p1, %p4996_p12 }
 0x2f7   : > { %p4994_p8 = pneg %p4993_p2 }
 0x2f8   : > { %p5000_p6 = por %p4999_p13, %p4998_p11 }
 0x2fa   : > { %p5001_p3 = pnand %p5000_p6, %p4994_p8 }
 0x2fc   : > { %5004 = shalt.err (!%p5001_p3)
}
 0x2fd   : > { %s5084_s6 = smov 128  }
 0x2fe   : > { %4130 = dma.vmem_to_hbm [thread:$0]  (%p5265_p10), %s7102_s5, 4096, %s7098_s21, %s3376_s28, %s5084_s6, %s5084_s6, %s5076_s25  }
 0x2ff PF: > { %s7182_s18 = sld [smem:[#allocation16_spill]]  ;;  %s3406_s13 = sand.u32 1, %s5047_s15  }
 0x300   : > { %p7184_p7 = scmp.ge.s32.totalorder %s5067_s20, 2  ;;  %s3407_s29 = scalar_lea.sflag [#allocation5], %s3406_s13 }
 0x305   : > { %p7183_p5 = scmp.ne.s32.totalorder %s7182_s18, 0 }
 0x307   : > { %p4147_p9 = pnand %p7184_p7, %p7183_p5 }
 0x309   : > { %5042 = dma.done.wait (!%p4147_p9), %s3407_s29, 4096  }
 0x30a   : > { %5044 = vsyncadd (!%p4147_p9), %s3407_s29, 4294963200  ;;  %s22_s20 = sadd.s32 1, %s5067_s20   ;;  %s7185_s15 = smov %s5051_s16 }
 0x30b   : > { %p19_p0 = scmp.ge.s32.totalorder %s22_s20, 4   ;;  %s7186_s16 = smov %s5055_s17 }
 0x30c   : > { %s7187_s17 = smov %s5281_s24  ;;  %s7188_s18 = smov %s5063_s19 }
 0x30d   : > { %s7189_s19 = smov %s7191_s11  ;;  %21 = sbr.rel (!%p19_p0) target bundleno = 8 (0x8), region = 96 }
 0x314   :  { %3412 = vsyncpa [#allocation4], 1 }
 0x315   :  { %3414 = vsyncpa [#allocation4 + $0x1], 1 }
 0x316   :  { %3415 = vsyncpa [#allocation7], 1 }
 0x317   :  { %3416 = vsyncpa [#allocation10], 1 }
 0x318   :  { %3417 = vsyncpa [#allocation5], 1 }
 0x319   :  { %3419 = vsyncpa [#allocation5 + $0x1], 1 }

</bundles_post_ra>
